<compile_context>
chip_gen: v7x
topology: tpu7x:2x2x1
jax: 0.10.0
libtpu: 0.0.40
codegen_flags: <defaults>
</compile_context>

<pallas_src>
import math

import jax
import jax.numpy as jnp
import numpy as np
from jax import lax
from jax.experimental import pallas as pl
from jax.experimental.pallas import tpu as pltpu


def _round_up(v, m):
    return (v + m - 1) // m * m


def _structured_attention_kernel(x_ref, mrow_ref, mcol_ref, vrow_ref, vcol_ref,
                                 wkq_ref, bkq_ref, wr_ref, br_ref,
                                 attn_ref, d0_ref,
                                 m_ref, inv_ref, p_ref, pi_ref):
    S = m_ref.shape[0]           # padded sequence length (multiple of 128)
    D = x_ref.shape[2]
    NB = p_ref.shape[0]          # elimination panel width
    NP = S // NB

    def _eye_mask(nr, nc):
        return (lax.broadcasted_iota(jnp.int32, (nr, 1), 0)
                == lax.broadcasted_iota(jnp.int32, (1, nc), 1))

    x = x_ref[0]                 # (S, D)
    mrow = mrow_ref[0]           # (1, S)  module mask, column-indexed
    mcol = mcol_ref[0]           # (S, 1)  module mask, row-indexed
    vrow = vrow_ref[...]         # (1, S)  1.0 real position, 0.0 pad
    vcol = vcol_ref[...]         # (S, 1)

    # ---- fused projections: one MXU pass for [key | query]; root on the VPU ----
    proj = jnp.dot(x, wkq_ref[...], preferred_element_type=jnp.float32) + bkq_ref[...]
    key = proj[:, :D]
    query = proj[:, D:2 * D]                     # 1/sqrt(D) folded into the weights
    scores = lax.dot_general(query, key, (((1,), (1,)), ((), ())),
                             preferred_element_type=jnp.float32)          # (S, S)
    root = jnp.sum(x * wr_ref[...], axis=-1, keepdims=True) + br_ref[...]  # (S, 1)

    # ---- module masking / clamping, then neutralize the padded rows/cols ----
    root = jnp.maximum(root - mcol * 50.0, -40.0)
    root = root * vcol + (1.0 - vcol)            # pad rows: root = 1 (identity block)
    A = jnp.maximum(scores - mrow * 50.0 - mcol * 50.0, -40.0)
    A = A * vrow * vcol                          # pad rows/cols -> exactly 0

    # Park A in the attn output block (free VMEM scratch until the final write).
    attn_ref[0] = A

    # ---- Laplacian  LL = diag(colsum(A) + root) - A   (matrix-tree theorem) ----
    diag_mask = _eye_mask(S, S)
    lsum = jnp.sum(A, axis=0, keepdims=True)     # (1, S): column sums (torch dim=1)
    m_ref[...] = jnp.where(diag_mask, lsum + root, 0.0) - A
    inv_ref[...] = jnp.where(diag_mask, 1.0, 0.0)

    # ---- blocked Gauss-Jordan inverse of LL over the augmented system [M | Inv] ----
    # TODO(synk): no partial pivoting (torch.inverse uses pivoted LU); fine for
    # generically well-conditioned Laplacians.
    lane_i = lax.broadcasted_iota(jnp.int32, (1, NB), 1)
    srow_i = lax.broadcasted_iota(jnp.int32, (S, 1), 0)
    eye_nb = jnp.where(_eye_mask(NB, NB), 1.0, 0.0)

    def panel_gj(j, carry):
        # Unblocked elimination of column j inside the NB x NB diagonal block.
        prow = p_ref[pl.ds(j, 1), :]                                        # (1, NB)
        pirow = pi_ref[pl.ds(j, 1), :]
        sel = lane_i == j
        pivot = jnp.sum(jnp.where(sel, prow, 0.0), axis=1, keepdims=True)   # (1, 1)
        inv_piv = pl.reciprocal(pivot, approx=False)
        prow = prow * inv_piv
        pirow = pirow * inv_piv
        p_all = p_ref[...]
        colv = jnp.sum(jnp.where(sel, p_all, 0.0), axis=1, keepdims=True)   # (NB, 1)
        p_ref[...] = p_all - colv * prow
        pi_ref[...] = pi_ref[...] - colv * pirow
        p_ref[pl.ds(j, 1), :] = prow
        pi_ref[pl.ds(j, 1), :] = pirow
        return carry

    for p in range(NP):                           # static panel loop
        kb = p * NB
        # (a) invert the NB x NB diagonal block on VMEM scratch (VPU).
        p_ref[...] = m_ref[pl.ds(kb, NB), pl.ds(kb, NB)]
        pi_ref[...] = eye_nb
        lax.fori_loop(0, NB, panel_gj, 0)
        ainv = pi_ref[...]                        # = block^{-1}

        # (b) rank-NB trailing update of [M | Inv] on the MXU.
        rm = jnp.dot(ainv, m_ref[pl.ds(kb, NB), :], preferred_element_type=jnp.float32)
        ri = jnp.dot(ainv, inv_ref[pl.ds(kb, NB), :], preferred_element_type=jnp.float32)
        in_panel = (srow_i >= kb) & (srow_i < kb + NB)
        cm = jnp.where(in_panel, 0.0, m_ref[:, pl.ds(kb, NB)])              # (S, NB)
        m_ref[...] = m_ref[...] - jnp.dot(cm, rm, preferred_element_type=jnp.float32)
        inv_ref[...] = inv_ref[...] - jnp.dot(cm, ri, preferred_element_type=jnp.float32)
        m_ref[pl.ds(kb, NB), :] = rm
        inv_ref[pl.ds(kb, NB), :] = ri

    ll_inv = inv_ref[...]

    # ---- matrix-tree marginals ----
    diag_mask = _eye_mask(S, S)
    diag_m = jnp.where(diag_mask, ll_inv, 0.0)
    diag_col = jnp.sum(diag_m, axis=1, keepdims=True)          # (S, 1): LL_inv[i, i]
    d0_row = jnp.sum(diag_m * root, axis=0, keepdims=True)     # (1, S): root_j * LL_inv[j, j]

    a_t = attn_ref[0].T                                        # A^T (parked earlier)
    attn = a_t * (diag_col - ll_inv)                           # A[j,i]*(diag_i - LL_inv[i,j])
    attn = jnp.where(mrow != 0.0, 0.0, attn)
    attn_ref[0] = attn
    d0_ref[0] = d0_row


def structured_attention(x, mask, params, *, block=128):
    """attn, d0 = StructuredAttention.forward(x, mask).  x: (B,S,D), mask: (B,1,S)."""
    B, S, D = x.shape
    nb = int(block)
    s_pad = _round_up(S, math.lcm(128, nb))      # lane-dense stores + whole panels

    scale = 1.0 / math.sqrt(D)                   # fold 1/sqrt(D) into Wq/bq once
    wkq = jnp.concatenate([params["wk"], params["wq"] * scale], axis=1).astype(jnp.float32)
    bkq = jnp.concatenate([params["bk"], params["bq"] * scale], axis=1).astype(jnp.float32)
    wr_row = params["wr"].reshape(1, D).astype(jnp.float32)
    br = params["br"].reshape(1, 1).astype(jnp.float32)

    x_p = jnp.pad(x.astype(jnp.float32), ((0, 0), (0, s_pad - S), (0, 0)))
    m_row = jnp.pad(mask.astype(jnp.float32).reshape(B, 1, S),
                    ((0, 0), (0, 0), (0, s_pad - S)))
    m_col = jnp.swapaxes(m_row, 1, 2)
    valid = (jnp.arange(s_pad) < S).astype(jnp.float32)
    v_row = valid.reshape(1, s_pad)
    v_col = valid.reshape(s_pad, 1)

    # TODO(synk): on v7x (64 MiB physical VMEM) very large S would need the attn
    # writeback tiled over S; for moderate S the resident working set fits.
    vmem_est = 4 * (7 * s_pad * s_pad + 6 * s_pad * D + 4 * nb * nb) + (4 << 20)
    vmem_limit = int(min(128 << 20, max(32 << 20, vmem_est)))

    attn_p, d0_p = pl.pallas_call(
        _structured_attention_kernel,
        out_shape=(jax.ShapeDtypeStruct((B, s_pad, s_pad), jnp.float32),
                   jax.ShapeDtypeStruct((B, 1, s_pad), jnp.float32)),
        grid_spec=pltpu.PrefetchScalarGridSpec(
            num_scalar_prefetch=0,
            grid=(B,),
            in_specs=[
                pl.BlockSpec((1, s_pad, D), lambda b: (b, 0, 0)),     # x
                pl.BlockSpec((1, 1, s_pad), lambda b: (b, 0, 0)),     # mask (row form)
                pl.BlockSpec((1, s_pad, 1), lambda b: (b, 0, 0)),     # mask (col form)
                pl.BlockSpec((1, s_pad), lambda b: (0, 0)),           # valid (row form)
                pl.BlockSpec((s_pad, 1), lambda b: (0, 0)),           # valid (col form)
                pl.BlockSpec((D, 2 * D), lambda b: (0, 0)),           # [Wk | Wq/sqrt(D)]
                pl.BlockSpec((1, 2 * D), lambda b: (0, 0)),           # [bk | bq/sqrt(D)]
                pl.BlockSpec((1, D), lambda b: (0, 0)),               # wr (row layout)
                pl.BlockSpec((1, 1), lambda b: (0, 0)),               # br
            ],
            out_specs=[
                pl.BlockSpec((1, s_pad, s_pad), lambda b: (b, 0, 0)),  # attn
                pl.BlockSpec((1, 1, s_pad), lambda b: (b, 0, 0)),      # d0 (lane-dense)
            ],
            scratch_shapes=[
                pltpu.VMEM((s_pad, s_pad), jnp.float32),   # M   (Laplacian, reduced in place)
                pltpu.VMEM((s_pad, s_pad), jnp.float32),   # Inv (accumulates LL^-1)
                pltpu.VMEM((nb, nb), jnp.float32),         # panel diagonal block
                pltpu.VMEM((nb, nb), jnp.float32),         # panel block inverse
            ],
        ),
        compiler_params=pltpu.CompilerParams(
            dimension_semantics=("parallel",),
            vmem_limit_bytes=vmem_limit,
        ),
    )(x_p, m_row, m_col, v_row, v_col, wkq, bkq, wr_row, br)

    return attn_p[:, :S, :S], d0_p[:, 0, :S]


def init_params(key, D):
    # Deterministic init mimicking nn.Linear default U(-1/sqrt(in), 1/sqrt(in)).
    ks = jax.random.split(key, 6)
    bound = 1.0 / math.sqrt(D)
    u = lambda k, shape: jax.random.uniform(k, shape, jnp.float32, -bound, bound)
    return dict(
        wk=u(ks[0], (D, D)), bk=u(ks[1], (1, D)),
        wq=u(ks[2], (D, D)), bq=u(ks[3], (1, D)),
        wr=u(ks[4], (D, 1)), br=u(ks[5], (1, 1)),
    )


def structured_attention_ref(x, mask, params):
    # Pure-JAX reference mirroring the PyTorch forward.
    D = x.shape[-1]
    key = x @ params["wk"] + params["bk"]
    query = (x @ params["wq"] + params["bq"]) / math.sqrt(D)
    scores = jnp.einsum("bid,bjd->bij", query, key)
    root = (x @ params["wr"] + params["br"])[..., 0]        # (B, S)
    m = mask.astype(jnp.float32)                            # (B, 1, S)
    root = jnp.maximum(root - m[:, 0, :] * 50.0, -40.0)
    scores = jnp.maximum(scores - m * 50.0 - jnp.swapaxes(m, 1, 2) * 50.0, -40.0)
    A = scores
    Lsum = jnp.sum(A, axis=1)                               # (B, S)
    LL = -A + jax.vmap(jnp.diag)(Lsum + root)
    LL_inv = jnp.linalg.inv(LL)
    diag = jnp.diagonal(LL_inv, axis1=1, axis2=2)
    d0 = root * diag
    d = A * diag[:, None, :] - A * jnp.swapaxes(LL_inv, 1, 2)
    attn = jnp.swapaxes(d, 1, 2)
    attn = jnp.where(m != 0.0, 0.0, attn)
    return attn, d0


if __name__ == "__main__":
    # --- spec shape: B=2, S=8, D=32 (padded to 128 inside the wrapper) ---
    B, S, D = 2, 8, 32
    kx, kp = jax.random.split(jax.random.PRNGKey(0))
    x = jax.random.normal(kx, (B, S, D), jnp.float32)
    params = init_params(kp, D)
    mask = jnp.zeros((B, 1, S), jnp.float32).at[1, 0, S - 2:].set(1.0)

    attn, d0 = jax.block_until_ready(structured_attention(x, mask, params))
    ref_attn, ref_d0 = structured_attention_ref(x, mask, params)
    # Tolerance absorbs the TPU's default f32-matmul precision (bf16 multiplies)
    # on either side, amplified through the Laplacian inverse.
    np.testing.assert_allclose(np.asarray(attn), np.asarray(ref_attn), rtol=2e-2, atol=2e-3)
    np.testing.assert_allclose(np.asarray(d0), np.asarray(ref_d0), rtol=2e-2, atol=2e-3)

    # --- multi-panel coverage: real length > panel width so the MXU rank-NB
    #     trailing update has nonzero coupling blocks.  Positive activations and
    #     weights keep the Laplacian diagonally dominant, so the pivot-free
    #     elimination is well conditioned vs. the pivoted-LU reference. ---
    B2, S2, D2 = 2, 192, 32
    k1, k2 = jax.random.split(jax.random.PRNGKey(1))
    x2 = jnp.abs(jax.random.normal(k1, (B2, S2, D2), jnp.float32))
    params2 = {k: jnp.abs(v) for k, v in init_params(k2, D2).items()}
    mask2 = jnp.zeros((B2, 1, S2), jnp.float32)
    attn2, d02 = jax.block_until_ready(structured_attention(x2, mask2, params2))
    ref_attn2, ref_d02 = structured_attention_ref(x2, mask2, params2)
    np.testing.assert_allclose(np.asarray(attn2), np.asarray(ref_attn2), rtol=2e-2, atol=2e-5)
    np.testing.assert_allclose(np.asarray(d02), np.asarray(ref_d02), rtol=2e-2, atol=2e-5)

    print("KERNEL_OK")
</pallas_src>

<mosaic_0001>
module attributes {stable_mosaic.version = 11 : i64} {
  func.func @_structured_attention_kernel(%arg0: i32, %arg1: memref<1x128x32xf32, #tpu.memory_space<vmem>>, %arg2: memref<1x1x128xf32, #tpu.memory_space<vmem>>, %arg3: memref<1x128x1xf32, #tpu.memory_space<vmem>>, %arg4: memref<1x128xf32, #tpu.memory_space<vmem>>, %arg5: memref<128x1xf32, #tpu.memory_space<vmem>>, %arg6: memref<32x64xf32, #tpu.memory_space<vmem>>, %arg7: memref<1x64xf32, #tpu.memory_space<vmem>>, %arg8: memref<1x32xf32, #tpu.memory_space<vmem>>, %arg9: memref<1x1xf32, #tpu.memory_space<vmem>>, %arg10: memref<1x128x128xf32, #tpu.memory_space<vmem>>, %arg11: memref<1x1x128xf32, #tpu.memory_space<vmem>>, %arg12: memref<128x128xf32, #tpu.memory_space<vmem>>, %arg13: memref<128x128xf32, #tpu.memory_space<vmem>>, %arg14: memref<128x128xf32, #tpu.memory_space<vmem>>, %arg15: memref<128x128xf32, #tpu.memory_space<vmem>>) attributes {dimension_semantics = [#tpu.dimension_semantics<parallel>], iteration_bounds = array<i64: 2>, scalar_prefetch = 0 : i64, scratch_operands = 4 : i64, tpu.core_type = #tpu.core_type<tc>, window_params = [{transform_indices = @transform_0, window_bounds = array<i64: 1, 128, 32>}, {transform_indices = @transform_1, window_bounds = array<i64: 1, 1, 128>}, {transform_indices = @transform_2, window_bounds = array<i64: 1, 128, 1>}, {pipeline_mode = #tpu.pipeline_mode<synchronous>, transform_indices = @transform_3, window_bounds = array<i64: 1, 128>}, {pipeline_mode = #tpu.pipeline_mode<synchronous>, transform_indices = @transform_4, window_bounds = array<i64: 128, 1>}, {pipeline_mode = #tpu.pipeline_mode<synchronous>, transform_indices = @transform_5, window_bounds = array<i64: 32, 64>}, {pipeline_mode = #tpu.pipeline_mode<synchronous>, transform_indices = @transform_6, window_bounds = array<i64: 1, 64>}, {pipeline_mode = #tpu.pipeline_mode<synchronous>, transform_indices = @transform_7, window_bounds = array<i64: 1, 32>}, {pipeline_mode = #tpu.pipeline_mode<synchronous>, transform_indices = @transform_8, window_bounds = array<i64: 1, 1>}, {transform_indices = @transform_9, window_bounds = array<i64: 1, 128, 128>}, {transform_indices = @transform_10, window_bounds = array<i64: 1, 1, 128>}]} {
    %c0 = arith.constant 0 : index
    %c0_0 = arith.constant 0 : index
    %c0_1 = arith.constant 0 : index
    %0 = vector.load %arg1[%c0, %c0_0, %c0_1] : memref<1x128x32xf32, #tpu.memory_space<vmem>>, vector<1x128x32xf32>
    %1 = vector.shape_cast %0 : vector<1x128x32xf32> to vector<128x32xf32>
    %c0_2 = arith.constant 0 : index
    %c0_3 = arith.constant 0 : index
    %c0_4 = arith.constant 0 : index
    %2 = vector.load %arg2[%c0_2, %c0_3, %c0_4] : memref<1x1x128xf32, #tpu.memory_space<vmem>>, vector<1x1x128xf32>
    %3 = vector.shape_cast %2 : vector<1x1x128xf32> to vector<1x128xf32>
    %c0_5 = arith.constant 0 : index
    %c0_6 = arith.constant 0 : index
    %c0_7 = arith.constant 0 : index
    %4 = vector.load %arg3[%c0_5, %c0_6, %c0_7] : memref<1x128x1xf32, #tpu.memory_space<vmem>>, vector<1x128x1xf32>
    %5 = vector.shape_cast %4 : vector<1x128x1xf32> to vector<128x1xf32>
    %c0_8 = arith.constant 0 : index
    %c0_9 = arith.constant 0 : index
    %6 = vector.load %arg4[%c0_8, %c0_9] : memref<1x128xf32, #tpu.memory_space<vmem>>, vector<1x128xf32>
    %c0_10 = arith.constant 0 : index
    %c0_11 = arith.constant 0 : index
    %7 = vector.load %arg5[%c0_10, %c0_11] : memref<128x1xf32, #tpu.memory_space<vmem>>, vector<128x1xf32>
    %c0_12 = arith.constant 0 : index
    %c0_13 = arith.constant 0 : index
    %8 = vector.load %arg6[%c0_12, %c0_13] : memref<32x64xf32, #tpu.memory_space<vmem>>, vector<32x64xf32>
    %cst = arith.constant dense<0.000000e+00> : vector<128x64xf32>
    %9 = tpu.matmul %1, %8, %cst {dimension_numbers = #tpu.dot_dimension_numbers<[1], [0], [0], [1], [0, 0, 1, 1], [], []>} : vector<128x32xf32>, vector<32x64xf32>, vector<128x64xf32> -> vector<128x64xf32>
    %c0_14 = arith.constant 0 : index
    %c0_15 = arith.constant 0 : index
    %10 = vector.load %arg7[%c0_14, %c0_15] : memref<1x64xf32, #tpu.memory_space<vmem>>, vector<1x64xf32>
    %11 = vector.broadcast %10 : vector<1x64xf32> to vector<128x64xf32>
    %12 = arith.addf %9, %11 : vector<128x64xf32>
    %13 = vector.extract_strided_slice %12 {offsets = [0, 0], sizes = [128, 32], strides = [1, 1]} : vector<128x64xf32> to vector<128x32xf32>
    %14 = vector.extract_strided_slice %12 {offsets = [0, 32], sizes = [128, 32], strides = [1, 1]} : vector<128x64xf32> to vector<128x32xf32>
    %cst_16 = arith.constant dense<0.000000e+00> : vector<128x128xf32>
    %15 = tpu.matmul %14, %13, %cst_16 {dimension_numbers = #tpu.dot_dimension_numbers<[1], [1], [0], [0], [0, 0, 1, 0], [], []>} : vector<128x32xf32>, vector<128x32xf32>, vector<128x128xf32> -> vector<128x128xf32>
    %c0_17 = arith.constant 0 : index
    %c0_18 = arith.constant 0 : index
    %16 = vector.load %arg8[%c0_17, %c0_18] : memref<1x32xf32, #tpu.memory_space<vmem>>, vector<1x32xf32>
    %17 = vector.broadcast %16 : vector<1x32xf32> to vector<128x32xf32>
    %18 = arith.mulf %1, %17 : vector<128x32xf32>
    %cst_19 = arith.constant dense<0.000000e+00> : vector<128xf32>
    %19 = vector.multi_reduction <add>, %18, %cst_19 [1] : vector<128x32xf32> to vector<128xf32>
    %20 = vector.shape_cast %19 : vector<128xf32> to vector<128x1xf32>
    %c0_20 = arith.constant 0 : index
    %c0_21 = arith.constant 0 : index
    %21 = vector.load %arg9[%c0_20, %c0_21] : memref<1x1xf32, #tpu.memory_space<vmem>>, vector<1x1xf32>
    %22 = vector.broadcast %21 : vector<1x1xf32> to vector<128x1xf32>
    %23 = arith.addf %20, %22 : vector<128x1xf32>
    %cst_22 = arith.constant 5.000000e+01 : f32
    %24 = vector.broadcast %cst_22 : f32 to vector<128x1xf32>
    %25 = arith.mulf %5, %24 : vector<128x1xf32>
    %26 = arith.subf %23, %25 : vector<128x1xf32>
    %cst_23 = arith.constant -4.000000e+01 : f32
    %27 = vector.broadcast %cst_23 : f32 to vector<128x1xf32>
    %28 = arith.maximumf %26, %27 : vector<128x1xf32>
    %29 = arith.mulf %28, %7 : vector<128x1xf32>
    %cst_24 = arith.constant 1.000000e+00 : f32
    %30 = vector.broadcast %cst_24 : f32 to vector<128x1xf32>
    %31 = arith.subf %30, %7 : vector<128x1xf32>
    %32 = arith.addf %29, %31 : vector<128x1xf32>
    %cst_25 = arith.constant 5.000000e+01 : f32
    %33 = vector.broadcast %cst_25 : f32 to vector<1x128xf32>
    %34 = arith.mulf %3, %33 : vector<1x128xf32>
    %35 = vector.broadcast %34 : vector<1x128xf32> to vector<128x128xf32>
    %36 = arith.subf %15, %35 : vector<128x128xf32>
    %cst_26 = arith.constant 5.000000e+01 : f32
    %37 = vector.broadcast %cst_26 : f32 to vector<128x1xf32>
    %38 = arith.mulf %5, %37 : vector<128x1xf32>
    %39 = vector.broadcast %38 : vector<128x1xf32> to vector<128x128xf32>
    %40 = arith.subf %36, %39 : vector<128x128xf32>
    %cst_27 = arith.constant -4.000000e+01 : f32
    %41 = vector.broadcast %cst_27 : f32 to vector<128x128xf32>
    %42 = arith.maximumf %40, %41 : vector<128x128xf32>
    %43 = vector.broadcast %6 : vector<1x128xf32> to vector<128x128xf32>
    %44 = arith.mulf %42, %43 : vector<128x128xf32>
    %45 = vector.broadcast %7 : vector<128x1xf32> to vector<128x128xf32>
    %46 = arith.mulf %44, %45 : vector<128x128xf32>
    %c0_28 = arith.constant 0 : index
    %c0_29 = arith.constant 0 : index
    %c0_30 = arith.constant 0 : index
    %47 = vector.load %arg10[%c0_28, %c0_29, %c0_30] : memref<1x128x128xf32, #tpu.memory_space<vmem>>, vector<1x128x128xf32>
    %48 = vector.shape_cast %47 : vector<1x128x128xf32> to vector<128x128xf32>
    %49 = vector.shape_cast %46 : vector<128x128xf32> to vector<1x128x128xf32>
    tpu.vector_store %arg10[%c0_28, %c0_29, %c0_30], %49 {strides = array<i32>} : memref<1x128x128xf32, #tpu.memory_space<vmem>>, vector<1x128x128xf32>,
    %50 = tpu.iota {dimensions = array<i32: 0>} : vector<128x1xi32>
    %51 = tpu.iota {dimensions = array<i32: 1>} : vector<1x128xi32>
    %52 = vector.broadcast %50 : vector<128x1xi32> to vector<128x128xi32>
    %53 = vector.broadcast %51 : vector<1x128xi32> to vector<128x128xi32>
    %54 = arith.cmpi eq, %52, %53 : vector<128x128xi32>
    %cst_31 = arith.constant dense<0.000000e+00> : vector<128xf32>
    %55 = vector.multi_reduction <add>, %46, %cst_31 [0] : vector<128x128xf32> to vector<128xf32>
    %56 = vector.shape_cast %55 : vector<128xf32> to vector<1x128xf32>
    %57 = vector.broadcast %56 : vector<1x128xf32> to vector<128x128xf32>
    %58 = vector.broadcast %32 : vector<128x1xf32> to vector<128x128xf32>
    %59 = arith.addf %57, %58 : vector<128x128xf32>
    %cst_32 = arith.constant 0.000000e+00 : f32
    %60 = vector.broadcast %cst_32 : f32 to vector<128x128xf32>
    %61 = arith.select %54, %59, %60 : vector<128x128xi1>, vector<128x128xf32>
    %62 = arith.subf %61, %46 : vector<128x128xf32>
    %c0_33 = arith.constant 0 : index
    %c0_34 = arith.constant 0 : index
    %63 = vector.load %arg12[%c0_33, %c0_34] : memref<128x128xf32, #tpu.memory_space<vmem>>, vector<128x128xf32>
    tpu.vector_store %arg12[%c0_33, %c0_34], %62 {strides = array<i32>} : memref<128x128xf32, #tpu.memory_space<vmem>>, vector<128x128xf32>,
    %cst_35 = arith.constant 1.000000e+00 : f32
    %cst_36 = arith.constant 0.000000e+00 : f32
    %64 = vector.broadcast %cst_35 : f32 to vector<128x128xf32>
    %65 = vector.broadcast %cst_36 : f32 to vector<128x128xf32>
    %66 = arith.select %54, %64, %65 : vector<128x128xi1>, vector<128x128xf32>
    %c0_37 = arith.constant 0 : index
    %c0_38 = arith.constant 0 : index
    %67 = vector.load %arg13[%c0_37, %c0_38] : memref<128x128xf32, #tpu.memory_space<vmem>>, vector<128x128xf32>
    tpu.vector_store %arg13[%c0_37, %c0_38], %66 {strides = array<i32>} : memref<128x128xf32, #tpu.memory_space<vmem>>, vector<128x128xf32>,
    %68 = tpu.iota {dimensions = array<i32: 1>} : vector<1x128xi32>
    %69 = tpu.iota {dimensions = array<i32: 0>} : vector<128x1xi32>
    %70 = tpu.iota {dimensions = array<i32: 0>} : vector<128x1xi32>
    %71 = tpu.iota {dimensions = array<i32: 1>} : vector<1x128xi32>
    %72 = vector.broadcast %70 : vector<128x1xi32> to vector<128x128xi32>
    %73 = vector.broadcast %71 : vector<1x128xi32> to vector<128x128xi32>
    %74 = arith.cmpi eq, %72, %73 : vector<128x128xi32>
    %cst_39 = arith.constant 1.000000e+00 : f32
    %cst_40 = arith.constant 0.000000e+00 : f32
    %75 = vector.broadcast %cst_39 : f32 to vector<128x128xf32>
    %76 = vector.broadcast %cst_40 : f32 to vector<128x128xf32>
    %77 = arith.select %74, %75, %76 : vector<128x128xi1>, vector<128x128xf32>
    %c0_41 = arith.constant 0 : index
    %c0_42 = arith.constant 0 : index
    %78 = vector.load %arg12[%c0_41, %c0_42] : memref<128x128xf32, #tpu.memory_space<vmem>>, vector<128x128xf32>
    %c0_43 = arith.constant 0 : index
    %c0_44 = arith.constant 0 : index
    %79 = vector.load %arg14[%c0_43, %c0_44] : memref<128x128xf32, #tpu.memory_space<vmem>>, vector<128x128xf32>
    tpu.vector_store %arg14[%c0_43, %c0_44], %78 {strides = array<i32>} : memref<128x128xf32, #tpu.memory_space<vmem>>, vector<128x128xf32>,
    %c0_45 = arith.constant 0 : index
    %c0_46 = arith.constant 0 : index
    %80 = vector.load %arg15[%c0_45, %c0_46] : memref<128x128xf32, #tpu.memory_space<vmem>>, vector<128x128xf32>
    tpu.vector_store %arg15[%c0_45, %c0_46], %77 {strides = array<i32>} : memref<128x128xf32, #tpu.memory_space<vmem>>, vector<128x128xf32>,
    %c0_i32 = arith.constant 0 : i32
    %c128_i32 = arith.constant 128 : i32
    %81 = arith.addi %c0_i32, %c128_i32 : i32
    %c1_i32 = arith.constant 1 : i32
    scf.for %arg16 = %c0_i32 to %81 step %c1_i32  : i32 {
      %139 = arith.index_cast %arg16 : i32 to index
      %c0_91 = arith.constant 0 : index
      %140 = vector.load %arg14[%139, %c0_91] : memref<128x128xf32, #tpu.memory_space<vmem>>, vector<1x128xf32>
      %141 = arith.index_cast %arg16 : i32 to index
      %c0_92 = arith.constant 0 : index
      %142 = vector.load %arg15[%141, %c0_92] : memref<128x128xf32, #tpu.memory_space<vmem>>, vector<1x128xf32>
      %143 = vector.broadcast %arg16 : i32 to vector<1x128xi32>
      %144 = arith.cmpi eq, %68, %143 : vector<1x128xi32>
      %cst_93 = arith.constant 0.000000e+00 : f32
      %145 = vector.broadcast %cst_93 : f32 to vector<1x128xf32>
      %146 = arith.select %144, %140, %145 : vector<1x128xi1>, vector<1x128xf32>
      %cst_94 = arith.constant dense<0.000000e+00> : vector<1xf32>
      %147 = vector.multi_reduction <add>, %146, %cst_94 [1] : vector<1x128xf32> to vector<1xf32>
      %148 = vector.shape_cast %147 : vector<1xf32> to vector<1x1xf32>
      %149 = tpu.reciprocal %148 : vector<1x1xf32> -> vector<1x1xf32>
      %150 = vector.broadcast %149 : vector<1x1xf32> to vector<1x128xf32>
      %151 = arith.mulf %140, %150 : vector<1x128xf32>
      %152 = vector.broadcast %149 : vector<1x1xf32> to vector<1x128xf32>
      %153 = arith.mulf %142, %152 : vector<1x128xf32>
      %c0_95 = arith.constant 0 : index
      %c0_96 = arith.constant 0 : index
      %154 = vector.load %arg14[%c0_95, %c0_96] : memref<128x128xf32, #tpu.memory_space<vmem>>, vector<128x128xf32>
      %cst_97 = arith.constant 0.000000e+00 : f32
      %155 = vector.shape_cast %144 : vector<1x128xi1> to vector<1x128xi1>
      %156 = vector.broadcast %155 : vector<1x128xi1> to vector<128x128xi1>
      %157 = vector.broadcast %cst_97 : f32 to vector<128x128xf32>
      %158 = arith.select %156, %154, %157 : vector<128x128xi1>, vector<128x128xf32>
      %cst_98 = arith.constant dense<0.000000e+00> : vector<128xf32>
      %159 = vector.multi_reduction <add>, %158, %cst_98 [1] : vector<128x128xf32> to vector<128xf32>
      %160 = vector.shape_cast %159 : vector<128xf32> to vector<128x1xf32>
      %161 = vector.broadcast %160 : vector<128x1xf32> to vector<128x128xf32>
      %162 = vector.broadcast %151 : vector<1x128xf32> to vector<128x128xf32>
      %163 = arith.mulf %161, %162 : vector<128x128xf32>
      %164 = arith.subf %154, %163 : vector<128x128xf32>
      %c0_99 = arith.constant 0 : index
      %c0_100 = arith.constant 0 : index
      %165 = vector.load %arg14[%c0_99, %c0_100] : memref<128x128xf32, #tpu.memory_space<vmem>>, vector<128x128xf32>
      tpu.vector_store %arg14[%c0_99, %c0_100], %164 {strides = array<i32>} : memref<128x128xf32, #tpu.memory_space<vmem>>, vector<128x128xf32>,
      %c0_101 = arith.constant 0 : index
      %c0_102 = arith.constant 0 : index
      %166 = vector.load %arg15[%c0_101, %c0_102] : memref<128x128xf32, #tpu.memory_space<vmem>>, vector<128x128xf32>
      %167 = vector.broadcast %160 : vector<128x1xf32> to vector<128x128xf32>
      %168 = vector.broadcast %153 : vector<1x128xf32> to vector<128x128xf32>
      %169 = arith.mulf %167, %168 : vector<128x128xf32>
      %170 = arith.subf %166, %169 : vector<128x128xf32>
      %c0_103 = arith.constant 0 : index
      %c0_104 = arith.constant 0 : index
      %171 = vector.load %arg15[%c0_103, %c0_104] : memref<128x128xf32, #tpu.memory_space<vmem>>, vector<128x128xf32>
      tpu.vector_store %arg15[%c0_103, %c0_104], %170 {strides = array<i32>} : memref<128x128xf32, #tpu.memory_space<vmem>>, vector<128x128xf32>,
      %172 = arith.index_cast %arg16 : i32 to index
      %c0_105 = arith.constant 0 : index
      %173 = vector.load %arg14[%172, %c0_105] : memref<128x128xf32, #tpu.memory_space<vmem>>, vector<1x128xf32>
      tpu.vector_store %arg14[%172, %c0_105], %151 {strides = array<i32>} : memref<128x128xf32, #tpu.memory_space<vmem>>, vector<1x128xf32>,
      %174 = arith.index_cast %arg16 : i32 to index
      %c0_106 = arith.constant 0 : index
      %175 = vector.load %arg15[%174, %c0_106] : memref<128x128xf32, #tpu.memory_space<vmem>>, vector<1x128xf32>
      tpu.vector_store %arg15[%174, %c0_106], %153 {strides = array<i32>} : memref<128x128xf32, #tpu.memory_space<vmem>>, vector<1x128xf32>,
    }
    %c128_i32_47 = arith.constant 128 : i32
    %c0_48 = arith.constant 0 : index
    %c0_49 = arith.constant 0 : index
    %82 = vector.load %arg15[%c0_48, %c0_49] : memref<128x128xf32, #tpu.memory_space<vmem>>, vector<128x128xf32>
    %c0_50 = arith.constant 0 : index
    %c0_51 = arith.constant 0 : index
    %83 = vector.load %arg12[%c0_50, %c0_51] : memref<128x128xf32, #tpu.memory_space<vmem>>, vector<128x128xf32>
    %cst_52 = arith.constant dense<0.000000e+00> : vector<128x128xf32>
    %84 = tpu.matmul %82, %83, %cst_52 {dimension_numbers = #tpu.dot_dimension_numbers<[1], [0], [0], [1], [0, 0, 1, 1], [], []>} : vector<128x128xf32>, vector<128x128xf32>, vector<128x128xf32> -> vector<128x128xf32>
    %c0_53 = arith.constant 0 : index
    %c0_54 = arith.constant 0 : index
    %85 = vector.load %arg13[%c0_53, %c0_54] : memref<128x128xf32, #tpu.memory_space<vmem>>, vector<128x128xf32>
    %cst_55 = arith.constant dense<0.000000e+00> : vector<128x128xf32>
    %86 = tpu.matmul %82, %85, %cst_55 {dimension_numbers = #tpu.dot_dimension_numbers<[1], [0], [0], [1], [0, 0, 1, 1], [], []>} : vector<128x128xf32>, vector<128x128xf32>, vector<128x128xf32> -> vector<128x128xf32>
    %c0_i32_56 = arith.constant 0 : i32
    %87 = vector.broadcast %c0_i32_56 : i32 to vector<128x1xi32>
    %88 = arith.cmpi sge, %69, %87 : vector<128x1xi32>
    %c128_i32_57 = arith.constant 128 : i32
    %89 = vector.broadcast %c128_i32_57 : i32 to vector<128x1xi32>
    %90 = arith.cmpi slt, %69, %89 : vector<128x1xi32>
    %91 = arith.andi %88, %90 : vector<128x1xi1>
    %c0_58 = arith.constant 0 : index
    %c0_59 = arith.constant 0 : index
    %92 = vector.load %arg12[%c0_58, %c0_59] : memref<128x128xf32, #tpu.memory_space<vmem>>, vector<128x128xf32>
    %cst_60 = arith.constant 0.000000e+00 : f32
    %93 = vector.shape_cast %91 : vector<128x1xi1> to vector<128x1xi1>
    %94 = vector.broadcast %93 : vector<128x1xi1> to vector<128x128xi1>
    %95 = vector.broadcast %cst_60 : f32 to vector<128x128xf32>
    %96 = arith.select %94, %95, %92 : vector<128x128xi1>, vector<128x128xf32>
    %c0_61 = arith.constant 0 : index
    %c0_62 = arith.constant 0 : index
    %97 = vector.load %arg12[%c0_61, %c0_62] : memref<128x128xf32, #tpu.memory_space<vmem>>, vector<128x128xf32>
    %cst_63 = arith.constant dense<0.000000e+00> : vector<128x128xf32>
    %98 = tpu.matmul %96, %84, %cst_63 {dimension_numbers = #tpu.dot_dimension_numbers<[1], [0], [0], [1], [0, 0, 1, 1], [], []>} : vector<128x128xf32>, vector<128x128xf32>, vector<128x128xf32> -> vector<128x128xf32>
    %99 = arith.subf %97, %98 : vector<128x128xf32>
    %c0_64 = arith.constant 0 : index
    %c0_65 = arith.constant 0 : index
    %100 = vector.load %arg12[%c0_64, %c0_65] : memref<128x128xf32, #tpu.memory_space<vmem>>, vector<128x128xf32>
    tpu.vector_store %arg12[%c0_64, %c0_65], %99 {strides = array<i32>} : memref<128x128xf32, #tpu.memory_space<vmem>>, vector<128x128xf32>,
    %c0_66 = arith.constant 0 : index
    %c0_67 = arith.constant 0 : index
    %101 = vector.load %arg13[%c0_66, %c0_67] : memref<128x128xf32, #tpu.memory_space<vmem>>, vector<128x128xf32>
    %cst_68 = arith.constant dense<0.000000e+00> : vector<128x128xf32>
    %102 = tpu.matmul %96, %86, %cst_68 {dimension_numbers = #tpu.dot_dimension_numbers<[1], [0], [0], [1], [0, 0, 1, 1], [], []>} : vector<128x128xf32>, vector<128x128xf32>, vector<128x128xf32> -> vector<128x128xf32>
    %103 = arith.subf %101, %102 : vector<128x128xf32>
    %c0_69 = arith.constant 0 : index
    %c0_70 = arith.constant 0 : index
    %104 = vector.load %arg13[%c0_69, %c0_70] : memref<128x128xf32, #tpu.memory_space<vmem>>, vector<128x128xf32>
    tpu.vector_store %arg13[%c0_69, %c0_70], %103 {strides = array<i32>} : memref<128x128xf32, #tpu.memory_space<vmem>>, vector<128x128xf32>,
    %c0_71 = arith.constant 0 : index
    %c0_72 = arith.constant 0 : index
    %105 = vector.load %arg12[%c0_71, %c0_72] : memref<128x128xf32, #tpu.memory_space<vmem>>, vector<128x128xf32>
    tpu.vector_store %arg12[%c0_71, %c0_72], %84 {strides = array<i32>} : memref<128x128xf32, #tpu.memory_space<vmem>>, vector<128x128xf32>,
    %c0_73 = arith.constant 0 : index
    %c0_74 = arith.constant 0 : index
    %106 = vector.load %arg13[%c0_73, %c0_74] : memref<128x128xf32, #tpu.memory_space<vmem>>, vector<128x128xf32>
    tpu.vector_store %arg13[%c0_73, %c0_74], %86 {strides = array<i32>} : memref<128x128xf32, #tpu.memory_space<vmem>>, vector<128x128xf32>,
    %c0_75 = arith.constant 0 : index
    %c0_76 = arith.constant 0 : index
    %107 = vector.load %arg13[%c0_75, %c0_76] : memref<128x128xf32, #tpu.memory_space<vmem>>, vector<128x128xf32>
    %108 = tpu.iota {dimensions = array<i32: 0>} : vector<128x1xi32>
    %109 = tpu.iota {dimensions = array<i32: 1>} : vector<1x128xi32>
    %110 = vector.broadcast %108 : vector<128x1xi32> to vector<128x128xi32>
    %111 = vector.broadcast %109 : vector<1x128xi32> to vector<128x128xi32>
    %112 = arith.cmpi eq, %110, %111 : vector<128x128xi32>
    %cst_77 = arith.constant 0.000000e+00 : f32
    %113 = vector.broadcast %cst_77 : f32 to vector<128x128xf32>
    %114 = arith.select %112, %107, %113 : vector<128x128xi1>, vector<128x128xf32>
    %cst_78 = arith.constant dense<0.000000e+00> : vector<128xf32>
    %115 = vector.multi_reduction <add>, %114, %cst_78 [1] : vector<128x128xf32> to vector<128xf32>
    %116 = vector.shape_cast %115 : vector<128xf32> to vector<128x1xf32>
    %117 = vector.broadcast %32 : vector<128x1xf32> to vector<128x128xf32>
    %118 = arith.mulf %114, %117 : vector<128x128xf32>
    %cst_79 = arith.constant dense<0.000000e+00> : vector<128xf32>
    %119 = vector.multi_reduction <add>, %118, %cst_79 [0] : vector<128x128xf32> to vector<128xf32>
    %120 = vector.shape_cast %119 : vector<128xf32> to vector<1x128xf32>
    %c0_80 = arith.constant 0 : index
    %c0_81 = arith.constant 0 : index
    %c0_82 = arith.constant 0 : index
    %121 = vector.load %arg10[%c0_80, %c0_81, %c0_82] : memref<1x128x128xf32, #tpu.memory_space<vmem>>, vector<1x128x128xf32>
    %122 = vector.shape_cast %121 : vector<1x128x128xf32> to vector<128x128xf32>
    %123 = tpu.transpose %122, [1, 0] : vector<128x128xf32> -> vector<128x128xf32>
    %124 = vector.broadcast %116 : vector<128x1xf32> to vector<128x128xf32>
    %125 = arith.subf %124, %107 : vector<128x128xf32>
    %126 = arith.mulf %123, %125 : vector<128x128xf32>
    %cst_83 = arith.constant 0.000000e+00 : f32
    %127 = vector.broadcast %cst_83 : f32 to vector<1x128xf32>
    %128 = arith.cmpf one, %3, %127 : vector<1x128xf32>
    %cst_84 = arith.constant 0.000000e+00 : f32
    %129 = vector.shape_cast %128 : vector<1x128xi1> to vector<1x128xi1>
    %130 = vector.broadcast %129 : vector<1x128xi1> to vector<128x128xi1>
    %131 = vector.broadcast %cst_84 : f32 to vector<128x128xf32>
    %132 = arith.select %130, %131, %126 : vector<128x128xi1>, vector<128x128xf32>
    %c0_85 = arith.constant 0 : index
    %c0_86 = arith.constant 0 : index
    %c0_87 = arith.constant 0 : index
    %133 = vector.load %arg10[%c0_85, %c0_86, %c0_87] : memref<1x128x128xf32, #tpu.memory_space<vmem>>, vector<1x128x128xf32>
    %134 = vector.shape_cast %133 : vector<1x128x128xf32> to vector<128x128xf32>
    %135 = vector.shape_cast %132 : vector<128x128xf32> to vector<1x128x128xf32>
    tpu.vector_store %arg10[%c0_85, %c0_86, %c0_87], %135 {strides = array<i32>} : memref<1x128x128xf32, #tpu.memory_space<vmem>>, vector<1x128x128xf32>,
    %c0_88 = arith.constant 0 : index
    %c0_89 = arith.constant 0 : index
    %c0_90 = arith.constant 0 : index
    %136 = vector.load %arg11[%c0_88, %c0_89, %c0_90] : memref<1x1x128xf32, #tpu.memory_space<vmem>>, vector<1x1x128xf32>
    %137 = vector.shape_cast %136 : vector<1x1x128xf32> to vector<1x128xf32>
    %138 = vector.shape_cast %120 : vector<1x128xf32> to vector<1x1x128xf32>
    tpu.vector_store %arg11[%c0_88, %c0_89, %c0_90], %138 {strides = array<i32>} : memref<1x1x128xf32, #tpu.memory_space<vmem>>, vector<1x1x128xf32>,
    return
  }
  func.func @transform_0(%arg0: i32) -> (i32, i32, i32) {
    %c0_i32 = arith.constant 0 : i32
    %c0_i32_0 = arith.constant 0 : i32
    %c0_i32_1 = arith.constant 0 : i32
    return %arg0, %c0_i32, %c0_i32_0 : i32, i32, i32
  }
  func.func @transform_1(%arg0: i32) -> (i32, i32, i32) {
    %c0_i32 = arith.constant 0 : i32
    %c0_i32_0 = arith.constant 0 : i32
    %c0_i32_1 = arith.constant 0 : i32
    return %arg0, %c0_i32, %c0_i32_0 : i32, i32, i32
  }
  func.func @transform_2(%arg0: i32) -> (i32, i32, i32) {
    %c0_i32 = arith.constant 0 : i32
    %c0_i32_0 = arith.constant 0 : i32
    %c0_i32_1 = arith.constant 0 : i32
    return %arg0, %c0_i32, %c0_i32_0 : i32, i32, i32
  }
  func.func @transform_3(%arg0: i32) -> (i32, i32) {
    %c0_i32 = arith.constant 0 : i32
    %c0_i32_0 = arith.constant 0 : i32
    %c0_i32_1 = arith.constant 0 : i32
    return %c0_i32, %c0_i32_0 : i32, i32
  }
  func.func @transform_4(%arg0: i32) -> (i32, i32) {
    %c0_i32 = arith.constant 0 : i32
    %c0_i32_0 = arith.constant 0 : i32
    %c0_i32_1 = arith.constant 0 : i32
    return %c0_i32, %c0_i32_0 : i32, i32
  }
  func.func @transform_5(%arg0: i32) -> (i32, i32) {
    %c0_i32 = arith.constant 0 : i32
    %c0_i32_0 = arith.constant 0 : i32
    %c0_i32_1 = arith.constant 0 : i32
    return %c0_i32, %c0_i32_0 : i32, i32
  }
  func.func @transform_6(%arg0: i32) -> (i32, i32) {
    %c0_i32 = arith.constant 0 : i32
    %c0_i32_0 = arith.constant 0 : i32
    %c0_i32_1 = arith.constant 0 : i32
    return %c0_i32, %c0_i32_0 : i32, i32
  }
  func.func @transform_7(%arg0: i32) -> (i32, i32) {
    %c0_i32 = arith.constant 0 : i32
    %c0_i32_0 = arith.constant 0 : i32
    %c0_i32_1 = arith.constant 0 : i32
    return %c0_i32, %c0_i32_0 : i32, i32
  }
  func.func @transform_8(%arg0: i32) -> (i32, i32) {
    %c0_i32 = arith.constant 0 : i32
    %c0_i32_0 = arith.constant 0 : i32
    %c0_i32_1 = arith.constant 0 : i32
    return %c0_i32, %c0_i32_0 : i32, i32
  }
  func.func @transform_9(%arg0: i32) -> (i32, i32, i32) {
    %c0_i32 = arith.constant 0 : i32
    %c0_i32_0 = arith.constant 0 : i32
    %c0_i32_1 = arith.constant 0 : i32
    return %arg0, %c0_i32, %c0_i32_0 : i32, i32, i32
  }
  func.func @transform_10(%arg0: i32) -> (i32, i32, i32) {
    %c0_i32 = arith.constant 0 : i32
    %c0_i32_0 = arith.constant 0 : i32
    %c0_i32_1 = arith.constant 0 : i32
    return %arg0, %c0_i32, %c0_i32_0 : i32, i32, i32
  }
}

</mosaic_0001>

<bundles_post_ra>
// kernel: tpu_custom_call.1
= control target key start
LH: loop header
LB: loop body
LE: loop exit
PB: predicated region body
PF: predicated region fallthrough
CT: control target
= control target key end

     0   :  { %s5585_s0 = inlined_call_operand.vmem [shape: f32[2,128,32], index: 0, kind: input, shape index: {}]   ;;  %s5586_s1 = inlined_call_operand.vmem [shape: f32[2,1,128], index: 1, kind: input, shape index: {}]   ;;  %s5587_s2 = inlined_call_operand.vmem [shape: f32[2,128,1], index: 2, kind: input, shape index: {}]   ;;  %s5588_s3 = inlined_call_operand.vmem [shape: f32[1,128], index: 3, kind: input, shape index: {}]   ;;  %s5589_s4 = inlined_call_operand.vmem [shape: f32[128,1], index: 4, kind: input, shape index: {}]   ;;  %s5590_s5 = inlined_call_operand.vmem [shape: f32[32,64], index: 5, kind: input, shape index: {}]   ;;  %s5591_s6 = inlined_call_operand.vmem [shape: f32[1,64], index: 6, kind: input, shape index: {}]   ;;  %s5592_s7 = inlined_call_operand.vmem [shape: f32[1,32], index: 7, kind: input, shape index: {}]   ;;  %s5593_s8 = inlined_call_operand.<no memory space> [shape: f32[1,1], index: 8, kind: input, shape index: {}]   ;;  %s5594_s9 = inlined_call_operand.hbm [shape: f32[2,128,128], index: 9, kind: output, shape index: {0}]   ;;  %s5595_s10 = inlined_call_operand.hbm [shape: f32[2,1,128], index: 10, kind: output, shape index: {1}]  }
   0x1   :  { %5624 = sst [smem:[#allocation35_spill]] %s5585_s0  ;;  %v16_v0 = vstv %s5593_s8 }
   0x2   :  { %17 = vst [vmem:[#allocation6] sm:$0x1] %v16_v0 }
   0x3   :  { %18 = vsyncpa [#allocation8], 0 }
   0x4   :  { %20 = vsyncpa [#allocation8 + $0x1], 0 }
   0x5   :  { %21 = vsyncpa [#allocation10], 0 }
   0x6   :  { %23 = vsyncpa [#allocation10 + $0x1], 0  ;;  %s4061_s15 = smov 0   ;;  %s4063_s16 = smov 0  }
   0x7   :  { %s4065_s17 = smov 0   ;;  %s4067_s18 = smov 0  }
   0x8 LB: > { %s4082_s8 = sadd.s32 4294967295, %s3990_s18   ;;  %s3069_s19 = sadd.s32 4294967294, %s3990_s18   ;;  %s3990_s18 = sphi %s4067_s18, %s5686_s18   ;;  %s3986_s17 = sphi %s4065_s17, %s5685_s17   ;;  %s3982_s16 = sphi %s4063_s16, %s5684_s16   ;;  %s3978_s15 = sphi %s4061_s15, %s5683_s15  }
   0x9   : > { %s4086_s20 = sadd.s32 1, %s3990_s18   ;;  %s240_s21 = sadd.s32 1, %s3986_s17 }
   0xa   : > { %s237_s22 = ssub.s32 %s3990_s18, %s4086_s20  ;;  %p250_p0 = scmp.ne.s32.totalorder %s3986_s17, %s3982_s16 }
   0xb   : > { %p238_p1 = scmp.eq.s32.totalorder %s237_s22, 0  ;;  %p251_p2 = scmp.eq.s32.totalorder %s4082_s8, 1 }
   0xc   : > { %p256_p3 = scmp.ne.s32.totalorder %s3982_s16, %s3978_s15  ;;  %p257_p4 = scmp.eq.s32.totalorder %s3069_s19, 1 }
   0xd   : > { %s4097_s23 = scalar_select %p238_p1, %s3986_s17, %s240_s21  }
   0xe   : > { %p4099_p5 = por %p251_p2, %p250_p0  ;;  %p4103_p6 = por %p257_p4, %p256_p3 }
   0xf   : > { %p3072_p7 = scmp.ge.s32.totalorder %s3990_s18, 1  ;;  %p341_p8 = scmp.lt.s32.totalorder %s3990_s18, 3 }
  0x11   : > { %p342_p9 = pnand %p3072_p7, %p341_p8 }
  0x13   : > { %345 = sbr.rel (%p342_p9) target bundleno = 1427 (0x593), region = 56 }
  0x1a   : > { %v454_v1 = vld [vmem:[%s5590_s5] sm:$0xff]  ;;  %v455_v2 = vld [vmem:[%s5590_s5 + $0x8] sm:$0xff]  ;;  %v456_v3 = vld [vmem:[%s5590_s5 + $0x10] sm:$0xff]  ;;  %p391_p10 = scmp.lt.s32.totalorder %s4082_s8, 1  ;;  %vm465_vm0 = vcmask 261120   ;;  %s5627_s0 = sld [smem:[#allocation35_spill]] }
  0x1b   : > { %v3631_v4 = vpack.c.bf16 %v455_v2, %v454_v1  ;;  %v457_v5 = vld [vmem:[%s5590_s5 + $0x18] sm:$0xff]  ;;  %v5596_v23 = vmov 0   ;;  %v3078_v24 = vld [vmem:[%s5591_s6] ss:$0 sm:$0xff]  ;;  %vm4220_vm1 = vmpackc.low %vm465_vm0, %vm465_vm0  ;;  %s3997_s29 = smov 96   ;;  %s5026_s11 = smov 0  }
  0x1c   : > { %v3635_v6 = vpack.c.bf16 %v457_v5, %v456_v3  ;;  %s4123_s14 = scalar_select %p391_p10, %s4082_s8, 1  ;;  %3888 = vset.pattern.permute.xlu1 %v5596_v23  ;;  %3889 = vset.pattern.permute.xlu0 %v5596_v23  ;;  %v3127_v2 = vld [vmem:[%s5592_s7] ss:$0 sm:$0xff] }
  0x1d   : > { %3632 = vmatprep.subr.bf16.mxu0 %v3631_v4 }
  0x1e   : > { %3634 = vmatpush3.bf16.msra.mxu0 %v3631_v4  ;;  %s3136_s19 = sshll.u32 %s4123_s14, 7  ;;  %s398_s27 = scalar_lea.vmem %s5586_s1, %s4123_s14 }
  0x1f   : > { %3636 = vmatprep.subr.bf16.mxu0 %v3635_v6  ;;  %s4312_s21 = scalar_lea.vmem %s5587_s2, %s3136_s19 }
  0x20   : > { %s4131_s26 = scalar_lea.vmem %s5627_s0, %s3136_s19  ;;  %s4488_s19 = sand.u32 1, %s3982_s16  }
  0x21   : > { %v4134_v7 = vld [vmem:[%s4131_s26] sm:$0xff]  ;;  %v4139_v8 = vld [vmem:[%s4131_s26 + $0x8] sm:$0xff]  ;;  %v4142_v9 = vld [vmem:[%s4131_s26 + $0x10] sm:$0xff]  ;;  %s3073_s28 = sshll.u32 %s4488_s19, 7  ;;  %s390_s30 = scalar_lea.vmem [#allocation9], %s4488_s19 }
  0x22   : > { %3327 = vmatprep.mubr.msk.f32.mxu0 %vm465_vm0, %v4134_v7  ;;  %3638 = vmatpush3.bf16.msra.mxu0 %v3635_v6  ;;  %v4149_v10 = vld [vmem:[%s4131_s26 + $0x18] sm:$0xff]  ;;  %v4152_v11 = vld [vmem:[%s4131_s26 + $0x20] sm:$0xff]  ;;  %v4159_v12 = vld [vmem:[%s4131_s26 + $0x28] sm:$0xff]  ;;  %v923_v3 = vmul.f32 %v3127_v2, %v4134_v7  ;;  %v925_v5 = vmul.f32 %v3127_v2, %v4142_v9 }
  0x23   : > { %v4162_v13 = vld [vmem:[%s4131_s26 + $0x30] sm:$0xff]  ;;  %v4169_v14 = vld [vmem:[%s4131_s26 + $0x38] sm:$0xff]  ;;  %v4172_v15 = vld [vmem:[%s4131_s26 + $0x40] sm:$0xff] }
  0x24   : > { %v4179_v16 = vld [vmem:[%s4131_s26 + $0x48] sm:$0xff]  ;;  %v4182_v17 = vld [vmem:[%s4131_s26 + $0x50] sm:$0xff]  ;;  %v4189_v18 = vld [vmem:[%s4131_s26 + $0x58] sm:$0xff]  ;;  %v939_v4 = vsel %vm465_vm0, %v923_v3, 0.0  ;;  %v945_v6 = vsel %vm465_vm0, %v925_v5, 0.0  ;;  %v930_v29 = vmul.f32 %v3127_v2, %v4169_v14 }
  0x25   : > { %3328 = vmatmul.mubr.msk.f32.vlgmr.msra.gmra.mrb[0].mxu0 %vm465_vm0, %v4139_v8  ;;  %v4192_v19 = vld [vmem:[%s4131_s26 + $0x60] sm:$0xff]  ;;  %v4199_v20 = vld [vmem:[%s4131_s26 + $0x68] sm:$0xff]  ;;  %v4202_v21 = vld [vmem:[%s4131_s26 + $0x70] sm:$0xff] }
  0x26   : > { %3330 = vmatprep.mubr.msk.f32.mxu0 %vm465_vm0, %v4142_v9  ;;  %v4209_v22 = vld [vmem:[%s4131_s26 + $0x78] sm:$0xff]  ;;  %v4374_v5 = vld [vmem:[%s5589_s4 + $0x10] sm:$0xff] }
  0x29   : > { %3331 = vmatmul.mubr.msk.f32.gmra.mrb[2].mxu0 %vm465_vm0, %v4149_v10 }
  0x2a   : > { %3333 = vmatprep.mubr.msk.f32.mxu0 %vm465_vm0, %v4152_v11 }
  0x2d   : > { %3334 = vmatmul.mubr.msk.f32.gmra.mrb[4].mxu0 %vm465_vm0, %v4159_v12 }
  0x2e   : > { %3336 = vmatprep.mubr.msk.f32.mxu0 %vm465_vm0, %v4162_v13 }
  0x31   : > { %3337 = vmatmul.mubr.msk.f32.gmra.mrb[6].mxu0 %vm465_vm0, %v4169_v14  ;;  %v934_v14 = vmul.f32 %v3127_v2, %v4189_v18 }
  0x32   : > { %3339 = vmatprep.mubr.msk.f32.mxu0 %vm465_vm0, %v4172_v15 }
  0x35   : > { %3340 = vmatmul.mubr.msk.f32.gmra.mrb[8].mxu0 %vm465_vm0, %v4179_v16 }
  0x36   : > { %3342 = vmatprep.mubr.msk.f32.mxu0 %vm465_vm0, %v4182_v17 }
  0x39   : > { %3343 = vmatmul.mubr.msk.f32.gmra.mrb[10].mxu0 %vm465_vm0, %v4189_v18  ;;  %v938_v18 = vmul.f32 %v3127_v2, %v4209_v22 }
  0x3a   : > { %3345 = vmatprep.mubr.msk.f32.mxu0 %vm465_vm0, %v4192_v19 }
  0x3d   : > { %3346 = vmatmul.mubr.msk.f32.gmra.mrb[12].mxu0 %vm465_vm0, %v4199_v20 }
  0x3e   : > { %3348 = vmatprep.mubr.msk.f32.mxu0 %vm465_vm0, %v4202_v21 }
  0x41   : > { %3349 = vmatmul.mubr.msk.f32.gmra.mrb[14].mxu0 %vm465_vm0, %v4209_v22  ;;  %v423_v22 = vld [vmem:[%s4312_s21 + $0x10] sm:$0xff] }
  0xf8   : > { %v3329_v25 = vpop.f32.mrb[0].mxu0 }
  0xf9   : > { %v586_v26 = vadd.f32 %v3329_v25, %v3078_v24  ;;  %v580_v27 = vpop.f32.mrb[1].mxu0  ;;  %v924_v25 = vmul.f32 %v3127_v2, %v4139_v8  ;;  %v960_v8 = vsel %vm465_vm0, %v930_v29, 0.0  ;;  %v432_v29 = vld [vmem:[%s4312_s21 + $0x58] sm:$0xff] }
  0xfa   : > { %v581_v28 = vadd.f32 %v3078_v24, %v580_v27 }
  0xfb   : > { %v942_v27 = vsel %vm465_vm0, %v924_v25, 0.0 }
  0xfc   : > { %v3332_v30 = vpop.f32.mrb[2].mxu0  ;;  %675 = vrot.lane.b32.xlu0 %v581_v28, %s3997_s29  ;;  %v3639_v31 = vpack.c.bf16 %v586_v26, %v581_v28  ;;  %v927_v28 = vmul.f32 %v3127_v2, %v4152_v11  ;;  %v931_v11 = vmul.f32 %v3127_v2, %v4172_v15  ;;  %v935_v15 = vmul.f32 %v3127_v2, %v4192_v19  ;;  %v421_v19 = vld [vmem:[%s4312_s21] sm:$0xff] }
  0xfd   : > { %v596_v32 = vadd.f32 %v3332_v30, %v3078_v24  ;;  %v590_v33 = vpop.f32.mrb[3].mxu0 }
  0xfe   : > { %v591_v34 = vadd.f32 %v3078_v24, %v590_v33  ;;  %3641 = vmatprep.subr.msk.bf16.mxu1 %vm4220_vm1, %v3639_v31  ;;  %v951_v30 = vsel %vm465_vm0, %v927_v28, 0.0  ;;  %v963_v33 = vsel %vm465_vm0, %v931_v11, 0.0  ;;  %v4410_v11 = vld [vmem:[%s5589_s4 + $0x40] sm:$0xff] }
  0xff   : > { %3644 = vmatpush3.bf16.xpose.msk.msra.mxu1 %vm4220_vm1, %v3639_v31 }
 0x100   : > { %v3645_v35 = vpack.c.bf16 %v596_v32, %v591_v34  ;;  %v3335_v36 = vpop.f32.mrb[4].mxu0  ;;  %679 = vrot.lane.b32.xlu1 %v591_v34, %s3997_s29  ;;  %677 = vrot.lane.b32.xlu0 %v586_v26, %s3997_s29  ;;  %v928_v26 = vmul.f32 %v3127_v2, %v4159_v12  ;;  %v932_v12 = vmul.f32 %v3127_v2, %v4179_v16  ;;  %v972_v34 = vsel %vm465_vm0, %v934_v14, 0.0 }
 0x101   : > { %v606_v37 = vadd.f32 %v3335_v36, %v3078_v24  ;;  %v600_v38 = vpop.f32.mrb[5].mxu0  ;;  %v936_v16 = vmul.f32 %v3127_v2, %v4199_v20 }
 0x102   : > { %v601_v39 = vadd.f32 %v3078_v24, %v600_v38  ;;  %3647 = vmatprep.subr.msk.bf16.mxu1 %vm4220_vm1, %v3645_v35  ;;  %v954_v9 = vsel %vm465_vm0, %v928_v26, 0.0  ;;  %v984_v38 = vsel %vm465_vm0, %v938_v18, 0.0  ;;  %v4386_v26 = vld [vmem:[%s5589_s4 + $0x20] sm:$0xff]  ;;  %v4454_v18 = vld [vmem:[%s5589_s4 + $0x28] sm:$0xff] }
 0x103   : > { %v978_v36 = vsel %vm465_vm0, %v936_v16, 0.0  ;;  %v4432_v16 = vld [vmem:[%s5589_s4 + $0x60] sm:$0xff] }
 0x104   : > { %v3651_v40 = vpack.c.bf16 %v606_v37, %v601_v39  ;;  %v3338_v41 = vpop.f32.mrb[6].mxu0  ;;  %681 = vrot.lane.b32.xlu1 %v596_v32, %s3997_s29  ;;  %683 = vrot.lane.b32.xlu0 %v601_v39, %s3997_s29  ;;  %v966_v32 = vsel %vm465_vm0, %v932_v12, 0.0  ;;  %v422_v39 = vld [vmem:[%s4312_s21 + $0x8] sm:$0xff] }
 0x105   : > { %v616_v42 = vadd.f32 %v3338_v41, %v3078_v24  ;;  %v610_v43 = vpop.f32.mrb[7].mxu0  ;;  %v4322_v41 = vmul.f32 50.0, %v422_v39 }
 0x106   : > { %v611_v44 = vadd.f32 %v3078_v24, %v610_v43  ;;  %v431_v43 = vld [vmem:[%s4312_s21 + $0x50] sm:$0xff] }
 0x107   : > { %3650 = vmatpush3.bf16.xpose.msk.msra.mxu1 %vm4220_vm1, %v3645_v35 }
 0x108   : > { %v3657_v45 = vpack.c.bf16 %v616_v42, %v611_v44  ;;  %v3341_v46 = vpop.f32.mrb[8].mxu0  ;;  %685 = vrot.lane.b32.xlu1 %v606_v37, %s3997_s29  ;;  %687 = vrot.lane.b32.xlu0 %v611_v44, %s3997_s29  ;;  %v975_v37 = vsel %vm465_vm0, %v935_v15, 0.0  ;;  %v4442_v15 = vld [vmem:[%s5589_s4 + $0x70] sm:$0xff] }
 0x109   : > { %v626_v47 = vadd.f32 %v3341_v46, %v3078_v24  ;;  %3653 = vmatprep.subr.msk.bf16.mxu1 %vm4220_vm1, %v3651_v40  ;;  %v620_v48 = vpop.f32.mrb[9].mxu0 }
 0x10a   : > { %v621_v49 = vadd.f32 %v3078_v24, %v620_v48  ;;  %v433_v48 = vld [vmem:[%s4312_s21 + $0x60] sm:$0xff] }
 0x10c   : > { %v3663_v50 = vpack.c.bf16 %v626_v47, %v621_v49  ;;  %v3344_v51 = vpop.f32.mrb[10].mxu0  ;;  %689 = vrot.lane.b32.xlu1 %v616_v42, %s3997_s29  ;;  %691 = vrot.lane.b32.xlu0 %v621_v49, %s3997_s29  ;;  %v424_v42 = vld [vmem:[%s4312_s21 + $0x18] sm:$0xff] }
 0x10d   : > { %v636_v52 = vadd.f32 %v3344_v51, %v3078_v24  ;;  %v630_v53 = vpop.f32.mrb[11].mxu0  ;;  %v4327_v44 = vmul.f32 50.0, %v424_v42 }
 0x10e   : > { %v631_v54 = vadd.f32 %v3078_v24, %v630_v53  ;;  %v426_v53 = vld [vmem:[%s4312_s21 + $0x28] sm:$0xff] }
 0x10f   : > { %3656 = vmatpush3.bf16.xpose.msk.msra.mxu1 %vm4220_vm1, %v3651_v40  ;;  %v4320_v40 = vmul.f32 50.0, %v423_v22  ;;  %v4490_v22 = vld [vmem:[#allocation6] ss:$0 sm:$0xff] }
 0x110   : > { %v3669_v55 = vpack.c.bf16 %v636_v52, %v631_v54  ;;  %v3347_v56 = vpop.f32.mrb[12].mxu0  ;;  %693 = vrot.lane.b32.xlu1 %v626_v47, %s3997_s29  ;;  %695 = vrot.lane.b32.xlu0 %v631_v54, %s3997_s29  ;;  %v425_v47 = vld [vmem:[%s4312_s21 + $0x20] sm:$0xff]  ;;  %v435_v54 = vld [vmem:[%s4312_s21 + $0x70] sm:$0xff] }
 0x111   : > { %v646_v57 = vadd.f32 %v3347_v56, %v3078_v24  ;;  %3659 = vmatprep.subr.msk.bf16.mxu1 %vm4220_vm1, %v3657_v45  ;;  %v640_v58 = vpop.f32.mrb[13].mxu0  ;;  %v4336_v49 = vmul.f32 50.0, %v425_v47  ;;  %v4349_v56 = vmul.f32 50.0, %v435_v54 }
 0x112   : > { %v641_v59 = vadd.f32 %v3078_v24, %v640_v58 }
 0x114   : > { %v3675_v60 = vpack.c.bf16 %v646_v57, %v641_v59  ;;  %v3350_v61 = vpop.f32.mrb[14].mxu0  ;;  %697 = vrot.lane.b32.xlu1 %v636_v52, %s3997_s29  ;;  %699 = vrot.lane.b32.xlu0 %v641_v59, %s3997_s29  ;;  %v427_v59 = vld [vmem:[%s4312_s21 + $0x30] sm:$0xff] }
 0x115   : > { %v656_v62 = vadd.f32 %v3350_v61, %v3078_v24  ;;  %v650_v63 = vpop.f32.mrb[15].mxu0 }
 0x116   : > { %v651_v0 = vadd.f32 %v3078_v24, %v650_v63  ;;  %v926_v24 = vmul.f32 %v3127_v2, %v4149_v10  ;;  %v929_v10 = vmul.f32 %v3127_v2, %v4162_v13  ;;  %v933_v13 = vmul.f32 %v3127_v2, %v4182_v17  ;;  %v428_v63 = vld [vmem:[%s4312_s21 + $0x38] sm:$0xff] }
 0x117   : > { %3662 = vmatpush3.bf16.xpose.msk.msra.mxu1 %vm4220_vm1, %v3657_v45  ;;  %v937_v17 = vmul.f32 %v3127_v2, %v4202_v21  ;;  %v4315_v21 = vmul.f32 50.0, %v421_v19  ;;  %v4330_v45 = vmul.f32 50.0, %v431_v43  ;;  %v4484_v19 = vld [vmem:[%s5589_s4 + $0x78] sm:$0xff] }
 0x118   : > { %v3681_v1 = vpack.c.bf16 %v656_v62, %v651_v0  ;;  %701 = vrot.lane.b32.xlu1 %v646_v57, %s3997_s29  ;;  %703 = vrot.lane.b32.xlu0 %v651_v0, %s3997_s29  ;;  %v948_v7 = vsel %vm465_vm0, %v926_v24, 0.0  ;;  %v957_v31 = vsel %vm465_vm0, %v929_v10, 0.0  ;;  %v969_v35 = vsel %vm465_vm0, %v933_v13, 0.0  ;;  %v4362_v0 = vld [vmem:[%s5589_s4] sm:$0xff]  ;;  %v4422_v13 = vld [vmem:[%s5589_s4 + $0x50] sm:$0xff] }
 0x119   : > { %3665 = vmatprep.subr.msk.bf16.mxu1 %vm4220_vm1, %v3663_v50  ;;  %v981_v20 = vsel %vm465_vm0, %v937_v17, 0.0  ;;  %v4403_v10 = vmul.f32 50.0, %v432_v29  ;;  %v4466_v17 = vld [vmem:[%s5589_s4 + $0x48] sm:$0xff]  ;;  %v1074_v47 = vsub.f32 1.0, %v4362_v0 }
 0x11c   : > { %705 = vrot.lane.b32.xlu1 %v656_v62, %s3997_s29  ;;  %s4779_s29 = scalar_lea.vmem [#allocation7], %s3073_s28 }
 0x11f   : > { %3668 = vmatpush3.bf16.xpose.msk.msra.mxu1 %vm4220_vm1, %v3663_v50  ;;  %v4339_v50 = vmul.f32 50.0, %v433_v48 }
 0x120   : > { %3671 = vmatprep.subr.msk.bf16.mxu1 %vm4220_vm1, %v3669_v55 }
 0x127   : > { %3674 = vmatpush3.bf16.xpose.msk.msra.mxu1 %vm4220_vm1, %v3669_v55  ;;  %v4346_v55 = vmul.f32 50.0, %v426_v53 }
 0x128   : > { %3677 = vmatprep.subr.msk.bf16.mxu1 %vm4220_vm1, %v3675_v60 }
 0x12f   : > { %3680 = vmatpush3.bf16.xpose.msk.msra.mxu1 %vm4220_vm1, %v3675_v60  ;;  %v4355_v60 = vmul.f32 50.0, %v427_v59 }
 0x130   : > { %3683 = vmatprep.subr.msk.bf16.mxu1 %vm4220_vm1, %v3681_v1 }
 0x137   : > { %940 = vadd.xlane.f32.xlu0 %v939_v4  ;;  %3686 = vmatpush3.bf16.xpose.msk.msra.mxu1 %vm4220_vm1, %v3681_v1  ;;  %v4367_v1 = vmul.f32 50.0, %v428_v63  ;;  %v429_v4 = vld [vmem:[%s4312_s21 + $0x40] sm:$0xff] }
 0x13b   : > { %946 = vadd.xlane.f32.xlu0 %v945_v6  ;;  %v4379_v6 = vmul.f32 50.0, %v429_v4 }
 0x13f   : > { %949 = vadd.xlane.f32.xlu0 %v948_v7  ;;  %v430_v7 = vld [vmem:[%s4312_s21 + $0x48] sm:$0xff] }
 0x140   : > { %943 = vadd.xlane.f32.xlu1 %v942_v27  ;;  %v4391_v27 = vmul.f32 50.0, %v430_v7 }
 0x143   : > { %955 = vadd.xlane.f32.xlu0 %v954_v9 }
 0x144   : > { %952 = vadd.xlane.f32.xlu1 %v951_v30  ;;  %v4398_v30 = vld [vmem:[%s5589_s4 + $0x30] sm:$0xff] }
 0x147   : > { %961 = vadd.xlane.f32.xlu0 %v960_v8 }
 0x148   : > { %958 = vadd.xlane.f32.xlu1 %v957_v31  ;;  %v434_v31 = vld [vmem:[%s4312_s21 + $0x68] sm:$0xff] }
 0x14b   : > { %967 = vadd.xlane.f32.xlu0 %v966_v32  ;;  %v4415_v32 = vmul.f32 50.0, %v434_v31 }
 0x14c   : > { %964 = vadd.xlane.f32.xlu1 %v963_v33  ;;  %v436_v33 = vld [vmem:[%s4312_s21 + $0x78] sm:$0xff] }
 0x14f   : > { %973 = vadd.xlane.f32.xlu0 %v972_v34  ;;  %v4426_v34 = vmul.f32 50.0, %v436_v33 }
 0x150   : > { %970 = vadd.xlane.f32.xlu1 %v969_v35  ;;  %v439_v35 = vld [vmem:[%s5589_s4 + $0x8] sm:$0xff] }
 0x151   : > { %v1075_v7 = vsub.f32 1.0, %v439_v35 }
 0x153   : > { %979 = vadd.xlane.f32.xlu0 %v978_v36  ;;  %v4448_v36 = vld [vmem:[%s5589_s4 + $0x18] sm:$0xff] }
 0x154   : > { %976 = vadd.xlane.f32.xlu1 %v975_v37  ;;  %v4460_v37 = vld [vmem:[%s5589_s4 + $0x38] sm:$0xff] }
 0x157   : > { %985 = vadd.xlane.f32.xlu0 %v984_v38  ;;  %v4472_v38 = vld [vmem:[%s5589_s4 + $0x58] sm:$0xff] }
 0x158   : > { %982 = vadd.xlane.f32.xlu1 %v981_v20  ;;  %v4478_v20 = vld [vmem:[%s5589_s4 + $0x68] sm:$0xff] }
 0x169   : > { %1131 = vperm.xlu1 %3888, %v4315_v21  }
 0x16d   : > { %1141 = vperm.xlu1 %3888, %v4320_v40   ;;  %1136 = vperm.xlu0 %3889, %v4322_v41  }
 0x16e   : > { %v676_v46 = vpop.permute.xlu0 %675 }
 0x16f   : > { %3383 = vmatprep.mubr.msk.f32.mxu1 %vm465_vm0, %v676_v46 }
 0x171   : > { %1146 = vperm.xlu1 %3888, %v4327_v44   ;;  %1181 = vperm.xlu0 %3889, %v4330_v45  }
 0x172   : > { %v680_v51 = vpop.permute.xlu1 %679  ;;  %v678_v52 = vpop.permute.xlu0 %677 }
 0x173   : > { %3384 = vmatmul.mubr.msk.f32.vlgmr.msra.gmra.mrb[0].mxu1 %vm465_vm0, %v678_v52 }
 0x174   : > { %3386 = vmatprep.mubr.msk.f32.mxu1 %vm465_vm0, %v680_v51 }
 0x175   : > { %1151 = vperm.xlu1 %3888, %v4336_v49   ;;  %1191 = vperm.xlu0 %3889, %v4339_v50  }
 0x176   : > { %v682_v57 = vpop.permute.xlu1 %681  ;;  %v684_v58 = vpop.permute.xlu0 %683 }
 0x177   : > { %3387 = vmatmul.mubr.msk.f32.gmra.mrb[2].mxu1 %vm465_vm0, %v682_v57  ;;  %v1076_v57 = vsub.f32 1.0, %v4374_v5 }
 0x178   : > { %3389 = vmatprep.mubr.msk.f32.mxu1 %vm465_vm0, %v684_v58 }
 0x179   : > { %1156 = vperm.xlu1 %3888, %v4346_v55   ;;  %1201 = vperm.xlu0 %3889, %v4349_v56  }
 0x17a   : > { %v686_v61 = vpop.permute.xlu1 %685  ;;  %v688_v62 = vpop.permute.xlu0 %687 }
 0x17b   : > { %3390 = vmatmul.mubr.msk.f32.gmra.mrb[4].mxu1 %vm465_vm0, %v686_v61 }
 0x17c   : > { %3392 = vmatprep.mubr.msk.f32.mxu1 %vm465_vm0, %v688_v62 }
 0x17d   : > { %1161 = vperm.xlu1 %3888, %v4355_v60   ;;  %1265 = vperm.xlu0 %3889, %v4362_v0  }
 0x17e   : > { %v690_v2 = vpop.permute.xlu1 %689  ;;  %v692_v3 = vpop.permute.xlu0 %691 }
 0x17f   : > { %3393 = vmatmul.mubr.msk.f32.gmra.mrb[6].mxu1 %vm465_vm0, %v690_v2 }
 0x180   : > { %3395 = vmatprep.mubr.msk.f32.mxu1 %vm465_vm0, %v692_v3 }
 0x181   : > { %1166 = vperm.xlu1 %3888, %v4367_v1   ;;  %1275 = vperm.xlu0 %3889, %v4374_v5  }
 0x182   : > { %v694_v24 = vpop.permute.xlu1 %693  ;;  %v696_v25 = vpop.permute.xlu0 %695 }
 0x183   : > { %3396 = vmatmul.mubr.msk.f32.gmra.mrb[8].mxu1 %vm465_vm0, %v694_v24 }
 0x184   : > { %3398 = vmatprep.mubr.msk.f32.mxu1 %vm465_vm0, %v696_v25 }
 0x185   : > { %1171 = vperm.xlu1 %3888, %v4379_v6   ;;  %1285 = vperm.xlu0 %3889, %v4386_v26  }
 0x186   : > { %v698_v28 = vpop.permute.xlu1 %697  ;;  %v700_v9 = vpop.permute.xlu0 %699 }
 0x187   : > { %3399 = vmatmul.mubr.msk.f32.gmra.mrb[10].mxu1 %vm465_vm0, %v698_v28 }
 0x188   : > { %3401 = vmatprep.mubr.msk.f32.mxu1 %vm465_vm0, %v700_v9 }
 0x189   : > { %1176 = vperm.xlu1 %3888, %v4391_v27   ;;  %1295 = vperm.xlu0 %3889, %v4398_v30  }
 0x18a   : > { %v702_v8 = vpop.permute.xlu1 %701  ;;  %v704_v12 = vpop.permute.xlu0 %703 }
 0x18b   : > { %3402 = vmatmul.mubr.msk.f32.gmra.mrb[12].mxu1 %vm465_vm0, %v702_v8 }
 0x18c   : > { %3404 = vmatprep.mubr.msk.f32.mxu1 %vm465_vm0, %v704_v12 }
 0x18d   : > { %1186 = vperm.xlu1 %3888, %v4403_v10   ;;  %1305 = vperm.xlu0 %3889, %v4410_v11  }
 0x18e   : > { %v706_v14 = vpop.permute.xlu1 %705 }
 0x18f   : > { %3405 = vmatmul.mubr.msk.f32.gmra.mrb[14].mxu1 %vm465_vm0, %v706_v14 }
 0x191   : > { %1196 = vperm.xlu1 %3888, %v4415_v32   ;;  %1315 = vperm.xlu0 %3889, %v4422_v13  }
 0x195   : > { %1206 = vperm.xlu1 %3888, %v4426_v34   ;;  %1325 = vperm.xlu0 %3889, %v4432_v16  }
 0x199   : > { %1270 = vperm.xlu1 %3888, %v439_v35   ;;  %1335 = vperm.xlu0 %3889, %v4442_v15  }
 0x19d   : > { %1280 = vperm.xlu1 %3888, %v4448_v36  }
 0x1a1   : > { %1290 = vperm.xlu1 %3888, %v4454_v18  }
 0x1a5   : > { %1300 = vperm.xlu1 %3888, %v4460_v37  }
 0x1a9   : > { %1310 = vperm.xlu1 %3888, %v4466_v17  }
 0x1ad   : > { %1320 = vperm.xlu1 %3888, %v4472_v38  }
 0x1b1   : > { %1330 = vperm.xlu1 %3888, %v4478_v20  }
 0x1b5   : > { %1340 = vperm.xlu1 %3888, %v4484_v19  }
 0x1c4   : > { %v941_v39 = vpop.xlane.xlu0 %940 }
 0x1c5   : > { %v994_v42 = vadd.f32 %v4490_v22, %v941_v39  ;;  %v1078_v39 = vsub.f32 1.0, %v4386_v26 }
 0x1c7   : > { %v1026_v43 = vsub.f32 %v994_v42, %v4315_v21 }
 0x1c8   : > { %v947_v46 = vpop.xlane.xlu0 %946 }
 0x1c9   : > { %v1042_v48 = vmax.f32 %v1026_v43, -40.0  ;;  %v996_v51 = vadd.f32 %v4490_v22, %v947_v46 }
 0x1cb   : > { %v1058_v52 = vmul.f32 %v1042_v48, %v4362_v0  ;;  %v1028_v53 = vsub.f32 %v996_v51, %v4320_v40 }
 0x1cc   : > { %v950_v54 = vpop.xlane.xlu0 %949 }
 0x1cd   : > { %v1044_v58 = vmax.f32 %v1028_v53, -40.0  ;;  %v944_v59 = vpop.xlane.xlu1 %943  ;;  %v1090_v61 = vadd.f32 %v1074_v47, %v1058_v52  ;;  %v997_v62 = vadd.f32 %v4490_v22, %v950_v54 }
 0x1ce   : > { %v995_v21 = vadd.f32 %v4490_v22, %v944_v59 }
 0x1cf   : > { %v1060_v63 = vmul.f32 %v1044_v58, %v4374_v5  ;;  %1433 = vperm.xlu0 %3889, %v1090_v61   ;;  %v1029_v2 = vsub.f32 %v997_v62, %v4327_v44  ;;  %v1077_v5 = vsub.f32 1.0, %v4448_v36 }
 0x1d0   : > { %v1027_v3 = vsub.f32 %v995_v21, %v4322_v41  ;;  %v956_v0 = vpop.xlane.xlu0 %955 }
 0x1d1   : > { %v953_v4 = vpop.xlane.xlu1 %952  ;;  %v1045_v40 = vmax.f32 %v1029_v2, -40.0  ;;  %v1092_v24 = vadd.f32 %v1076_v57, %v1060_v63  ;;  %v999_v25 = vadd.f32 %v4490_v22, %v956_v0  ;;  %v1080_v57 = vsub.f32 1.0, %v4398_v30 }
 0x1d2   : > { %v1043_v28 = vmax.f32 %v1027_v3, -40.0  ;;  %v998_v9 = vadd.f32 %v4490_v22, %v953_v4  ;;  %v1082_v4 = vsub.f32 1.0, %v4410_v11 }
 0x1d3   : > { %1443 = vperm.xlu0 %3889, %v1092_v24   ;;  %v1031_v29 = vsub.f32 %v999_v25, %v4346_v55  ;;  %v1061_v41 = vmul.f32 %v1045_v40, %v4448_v36  ;;  %v1079_v55 = vsub.f32 1.0, %v4454_v18 }
 0x1d4   : > { %v1059_v8 = vmul.f32 %v1043_v28, %v439_v35  ;;  %v1030_v44 = vsub.f32 %v998_v9, %v4336_v49  ;;  %v962_v12 = vpop.xlane.xlu0 %961 }
 0x1d5   : > { %v959_v31 = vpop.xlane.xlu1 %958  ;;  %v1047_v14 = vmax.f32 %v1031_v29, -40.0  ;;  %v1001_v33 = vadd.f32 %v4490_v22, %v962_v12  ;;  %v1093_v48 = vadd.f32 %v1077_v5, %v1061_v41 }
 0x1d6   : > { %v1046_v42 = vmax.f32 %v1030_v44, -40.0  ;;  %v1000_v43 = vadd.f32 %v4490_v22, %v959_v31  ;;  %v1091_v46 = vadd.f32 %v1075_v7, %v1059_v8  ;;  %v1084_v44 = vsub.f32 1.0, %v4422_v13 }
 0x1d7   : > { %v1033_v47 = vsub.f32 %v1001_v33, %v4367_v1  ;;  %v1063_v36 = vmul.f32 %v1047_v14, %v4454_v18  ;;  %v1081_v1 = vsub.f32 1.0, %v4460_v37  ;;  %v1085_v31 = vsub.f32 1.0, %v4472_v38 }
 0x1d8   : > { %v1062_v35 = vmul.f32 %v1046_v42, %v4386_v26  ;;  %v1032_v49 = vsub.f32 %v1000_v43, %v4355_v60  ;;  %1438 = vperm.xlu1 %3888, %v1091_v46   ;;  %v968_v51 = vpop.xlane.xlu0 %967 }
 0x1d9   : > { %v965_v52 = vpop.xlane.xlu1 %964  ;;  %v1049_v53 = vmax.f32 %v1033_v47, -40.0  ;;  %v1003_v54 = vadd.f32 %v4490_v22, %v968_v51  ;;  %v1095_v21 = vadd.f32 %v1079_v55, %v1063_v36  ;;  %v1086_v55 = vsub.f32 1.0, %v4432_v16 }
 0x1da   : > { %v1048_v58 = vmax.f32 %v1032_v49, -40.0  ;;  %v1002_v59 = vadd.f32 %v4490_v22, %v965_v52  ;;  %v1094_v61 = vadd.f32 %v1078_v39, %v1062_v35 }
 0x1db   : > { %v1065_v26 = vmul.f32 %v1049_v53, %v4460_v37  ;;  %v1035_v60 = vsub.f32 %v1003_v54, %v4391_v27  ;;  %v1088_v53 = vsub.f32 1.0, %v4442_v15 }
 0x1dc   : > { %v1064_v18 = vmul.f32 %v1048_v58, %v4398_v30  ;;  %v1034_v62 = vsub.f32 %v1002_v59, %v4379_v6  ;;  %1453 = vperm.xlu0 %3889, %v1094_v61   ;;  %1448 = vperm.xlu1 %3888, %v1093_v48   ;;  %v974_v63 = vpop.xlane.xlu0 %973  ;;  %v1083_v30 = vsub.f32 1.0, %v4466_v17 }
 0x1dd   : > { %v971_v2 = vpop.xlane.xlu1 %970  ;;  %v1051_v3 = vmax.f32 %v1035_v60, -40.0  ;;  %v1005_v0 = vadd.f32 %v4490_v22, %v974_v63  ;;  %v1097_v25 = vadd.f32 %v1081_v1, %v1065_v26  ;;  %v1108_v1 = vlaneseq }
 0x1de   : > { %v1050_v40 = vmax.f32 %v1034_v62, -40.0  ;;  %v1004_v24 = vadd.f32 %v4490_v22, %v971_v2  ;;  %v1096_v37 = vadd.f32 %v1080_v57, %v1064_v18 }
 0x1df   : > { %v1037_v27 = vsub.f32 %v1005_v0, %v4403_v10  ;;  %v1067_v28 = vmul.f32 %v1051_v3, %v4466_v17  ;;  %v4562_v60 = vshrl.u32 %v1108_v1, 7 }
 0x1e0   : > { %v1066_v6 = vmul.f32 %v1050_v40, %v4410_v11  ;;  %v1036_v7 = vsub.f32 %v1004_v24, %v4330_v45  ;;  %1463 = vperm.xlu0 %3889, %v1096_v37   ;;  %1458 = vperm.xlu1 %3888, %v1095_v21   ;;  %v980_v9 = vpop.xlane.xlu0 %979  ;;  %v4593_v40 = vand.u32 127, %v1108_v1  ;;  %v5597_v24 = vmov 0.0  }
 0x1e1   : > { %v977_v29 = vpop.xlane.xlu1 %976  ;;  %v1053_v5 = vmax.f32 %v1037_v27, -40.0  ;;  %v1007_v8 = vadd.f32 %v4490_v22, %v980_v9  ;;  %v1099_v33 = vadd.f32 %v1083_v30, %v1067_v28  ;;  %v4571_v18 = vadd.s32 24, %v4562_v60 }
 0x1e2   : > { %v1052_v41 = vmax.f32 %v1036_v7, -40.0  ;;  %v1006_v10 = vadd.f32 %v4490_v22, %v977_v29  ;;  %v1098_v12 = vadd.f32 %v1082_v4, %v1066_v6  ;;  %v4576_v21 = vadd.s32 32, %v4562_v60 }
 0x1e3   : > { %v1069_v11 = vmul.f32 %v1053_v5, %v4472_v38  ;;  %v1039_v45 = vsub.f32 %v1007_v8, %v4415_v32  ;;  %v4579_v63 = vadd.s32 40, %v4562_v60  ;;  %v4582_v2 = vadd.s32 48, %v4562_v60 }
 0x1e4   : > { %v1068_v17 = vmul.f32 %v1052_v41, %v4422_v13  ;;  %v1038_v14 = vsub.f32 %v1006_v10, %v4339_v50  ;;  %1473 = vperm.xlu0 %3889, %v1098_v12   ;;  %1468 = vperm.xlu1 %3888, %v1097_v25   ;;  %v986_v39 = vpop.xlane.xlu0 %985  ;;  %v1087_v13 = vsub.f32 1.0, %v4478_v20  ;;  %v4585_v3 = vadd.s32 56, %v4562_v60 }
 0x1e5   : > { %v983_v42 = vpop.xlane.xlu1 %982  ;;  %v1055_v43 = vmax.f32 %v1039_v45, -40.0  ;;  %v1009_v46 = vadd.f32 %v4490_v22, %v986_v39  ;;  %v1101_v49 = vadd.f32 %v1085_v31, %v1069_v11  ;;  %5630 = vst [vmem:[#allocation13_spill] sm:$0xff] %v4582_v2  ;;  %v4588_v0 = vadd.s32 64, %v4562_v60 }
 0x1e6   : > { %v1054_v47 = vmax.f32 %v1038_v14, -40.0  ;;  %v1008_v35 = vadd.f32 %v4490_v22, %v983_v42  ;;  %v1100_v38 = vadd.f32 %v1084_v44, %v1068_v17  ;;  %5631 = vst [vmem:[#allocation14_spill] sm:$0xff] %v4585_v3  ;;  %v4591_v4 = vadd.s32 72, %v4562_v60 }
 0x1e7   : > { %v1041_v32 = vsub.f32 %v1009_v46, %v4426_v34  ;;  %v1071_v48 = vmul.f32 %v1055_v43, %v4478_v20  ;;  %v1089_v34 = vsub.f32 1.0, %v4484_v19  ;;  %5632 = vst [vmem:[#allocation15_spill] sm:$0xff] %v4588_v0  ;;  %vm1394_vm2 = vcmp.eq.s32.totalorder %v4562_v60, %v4593_v40 }
 0x1e8   : > { %v1070_v50 = vmul.f32 %v1054_v47, %v4432_v16  ;;  %v1040_v36 = vsub.f32 %v1008_v35, %v4349_v56  ;;  %1483 = vperm.xlu0 %3889, %v1100_v38   ;;  %1478 = vperm.xlu1 %3888, %v1099_v33   ;;  %5633 = vst [vmem:[#allocation16_spill] sm:$0xff] %v4591_v4  ;;  %v1575_v37 = vsel %vm1394_vm2, 1.0, %v5597_v24  ;;  %v4658_v44 = vadd.s32 80, %v4562_v60 }
 0x1e9   : > { %v4550_v51 = vpop.permute.xlu1 %1131  ;;  %v1057_v52 = vmax.f32 %v1041_v32, -40.0  ;;  %v1103_v56 = vadd.f32 %v1087_v13, %v1071_v48  ;;  %vm1397_vm5 = vcmp.eq.s32.totalorder %v4571_v18, %v4593_v40  ;;  %vm1398_vm6 = vcmp.eq.s32.totalorder %v4576_v21, %v4593_v40  ;;  %1591 = vst [vmem:[#allocation3] sm:$0xff] %v1575_v37  ;;  %1639 = vst [vmem:[#allocation5] sm:$0xff] %v1575_v37 }
 0x1ea   : > { %v1056_v22 = vmax.f32 %v1040_v36, -40.0  ;;  %v1102_v54 = vadd.f32 %v1086_v55, %v1070_v50  ;;  %vm1399_vm7 = vcmp.eq.s32.totalorder %v4579_v63, %v4593_v40  ;;  %vm1400_vm8 = vcmp.eq.s32.totalorder %v4582_v2, %v4593_v40  ;;  %5634 = vst [vmem:[#allocation17_spill] sm:$0xff] %v4658_v44 }
 0x1eb   : > { %v1073_v58 = vmul.f32 %v1057_v52, %v4484_v19  ;;  %v4568_v19 = vadd.s32 16, %v4562_v60  ;;  %vm1401_vm9 = vcmp.eq.s32.totalorder %v4585_v3, %v4593_v40  ;;  %vm1402_vm10 = vcmp.eq.s32.totalorder %v4588_v0, %v4593_v40 }
 0x1ec   : > { %v1072_v57 = vmul.f32 %v1056_v22, %v4442_v15  ;;  %1493 = vperm.xlu0 %3889, %v1102_v54   ;;  %1488 = vperm.xlu1 %3888, %v1101_v49   ;;  %v4565_v15 = vadd.s32 8, %v4562_v60  ;;  %vm1403_vm11 = vcmp.eq.s32.totalorder %v4591_v4, %v4593_v40  ;;  %v1578_v6 = vsel %vm1397_vm5, 1.0, %v5597_v24  ;;  %v1137_v47 = vpop.permute.xlu0 %1136  ;;  %v4735_v54 = vld [vmem:[%s398_s27] sm:$0x1] }
 0x1ed   : > { %v4556_v16 = vpop.permute.xlu1 %1141  ;;  %v1105_v59 = vadd.f32 %v1089_v34, %v1073_v58  ;;  %vm1396_vm4 = vcmp.eq.s32.totalorder %v4568_v19, %v4593_v40  ;;  %v1579_v7 = vsel %vm1398_vm6, 1.0, %v5597_v24  ;;  %v1580_v28 = vsel %vm1399_vm7, 1.0, %v5597_v24  ;;  %1594 = vst [vmem:[#allocation3 + $0x18] sm:$0xff] %v1578_v6  ;;  %1642 = vst [vmem:[#allocation5 + $0x18] sm:$0xff] %v1578_v6 }
 0x1ee   : > { %v1104_v20 = vadd.f32 %v1088_v53, %v1072_v57  ;;  %vm1395_vm3 = vcmp.eq.s32.totalorder %v4565_v15, %v4593_v40  ;;  %v1577_v30 = vsel %vm1396_vm4, 1.0, %v5597_v24  ;;  %v1581_v9 = vsel %vm1400_vm8, 1.0, %v5597_v24  ;;  %1595 = vst [vmem:[#allocation3 + $0x20] sm:$0xff] %v1579_v7  ;;  %1596 = vst [vmem:[#allocation3 + $0x28] sm:$0xff] %v1580_v28 }
 0x1ef   : > { %v1576_v27 = vsel %vm1395_vm3, 1.0, %v5597_v24  ;;  %v1582_v29 = vsel %vm1401_vm9, 1.0, %v5597_v24  ;;  %v1583_v5 = vsel %vm1402_vm10, 1.0, %v5597_v24  ;;  %v1584_v8 = vsel %vm1403_vm11, 1.0, %v5597_v24  ;;  %1593 = vst [vmem:[#allocation3 + $0x10] sm:$0xff] %v1577_v30  ;;  %1641 = vst [vmem:[#allocation5 + $0x10] sm:$0xff] %v1577_v30 }
 0x1f0   : > { %1503 = vperm.xlu0 %3889, %v1104_v20   ;;  %1498 = vperm.xlu1 %3888, %v1103_v56   ;;  %1592 = vst [vmem:[#allocation3 + $0x8] sm:$0xff] %v1576_v27  ;;  %1640 = vst [vmem:[#allocation5 + $0x8] sm:$0xff] %v1576_v27  ;;  %v4661_v41 = vadd.s32 88, %v4562_v60  ;;  %v4664_v10 = vadd.s32 96, %v4562_v60  ;;  %v4667_v12 = vadd.s32 104, %v4562_v60  ;;  %v4670_v31 = vadd.s32 112, %v4562_v60  ;;  %v4719_v38 = vpop.permute.xlu0 %1181 }
 0x1f1   : > { %v4558_v61 = vpop.permute.xlu1 %1146  ;;  %1643 = vst [vmem:[#allocation5 + $0x20] sm:$0xff] %v1579_v7  ;;  %1644 = vst [vmem:[#allocation5 + $0x28] sm:$0xff] %v1580_v28  ;;  %v4673_v11 = vadd.s32 120, %v4562_v60  ;;  %vm1404_vm12 = vcmp.eq.s32.totalorder %v4658_v44, %v4593_v40  ;;  %v1106_v57 = vmul.f32 50.0, %v4735_v54  ;;  %v4741_v58 = vsub.s32 0, %v4562_v60 }
 0x1f2   : > { %1597 = vst [vmem:[#allocation3 + $0x30] sm:$0xff] %v1581_v9  ;;  %1598 = vst [vmem:[#allocation3 + $0x38] sm:$0xff] %v1582_v29  ;;  %v1585_v45 = vsel %vm1404_vm12, 1.0, %v5597_v24  ;;  %vm1405_vm13 = vcmp.eq.s32.totalorder %v4661_v41, %v4593_v40  ;;  %vm1406_vm14 = vcmp.eq.s32.totalorder %v4664_v10, %v4593_v40  ;;  %vm1407_vm15 = vcmp.eq.s32.totalorder %v4667_v12, %v4593_v40 }
 0x1f3   : > { %1599 = vst [vmem:[#allocation3 + $0x40] sm:$0xff] %v1583_v5  ;;  %1600 = vst [vmem:[#allocation3 + $0x48] sm:$0xff] %v1584_v8  ;;  %v1586_v14 = vsel %vm1405_vm13, 1.0, %v5597_v24  ;;  %v1587_v33 = vsel %vm1406_vm14, 1.0, %v5597_v24  ;;  %vm5606_vm0 = vcmp.eq.s32.totalorder %v4670_v31, %v4593_v40  ;;  %v1588_v39 = vsel %vm1407_vm15, 1.0, %v5597_v24 }
 0x1f4   : > { %1508 = vperm.xlu1 %3888, %v1105_v59   ;;  %1645 = vst [vmem:[#allocation5 + $0x30] sm:$0xff] %v1581_v9  ;;  %1646 = vst [vmem:[#allocation5 + $0x38] sm:$0xff] %v1582_v29  ;;  %v1589_v42 = vsel %vm5606_vm0, 1.0, %v5597_v24  ;;  %vm5605_vm1 = vcmp.eq.s32.totalorder %v4673_v11, %v4593_v40  ;;  %v4723_v49 = vpop.permute.xlu0 %1191  ;;  %v4748_v59 = vrot.slane %v1106_v57, %v4741_v58  ;;  %v4759_v9 = vld [vmem:[%s5588_s3] ss:$0 sm:$0xff] }
 0x1f5   : > { %v4560_v26 = vpop.permute.xlu1 %1151  ;;  %1647 = vst [vmem:[#allocation5 + $0x40] sm:$0xff] %v1583_v5  ;;  %1648 = vst [vmem:[#allocation5 + $0x48] sm:$0xff] %v1584_v8  ;;  %v1590_v43 = vsel %vm5605_vm1, 1.0, %v5597_v24 }
 0x1f6   : > { %5635 = vst [vmem:[#allocation18_spill] sm:$0xff] %v4661_v41  ;;  %5636 = vst [vmem:[#allocation19_spill] sm:$0xff] %v4664_v10 }
 0x1f7   : > { %5637 = vst [vmem:[#allocation20_spill] sm:$0xff] %v4667_v12  ;;  %5638 = vst [vmem:[#allocation21_spill] sm:$0xff] %v4670_v31 }
 0x1f8   : > { %5639 = vst [vmem:[#allocation22_spill] sm:$0xff] %v4673_v11  ;;  %1601 = vst [vmem:[#allocation3 + $0x50] sm:$0xff] %v1585_v45  ;;  %v4727_v50 = vpop.permute.xlu0 %1201 }
 0x1f9   : > { %v4573_v62 = vpop.permute.xlu1 %1156  ;;  %1649 = vst [vmem:[#allocation5 + $0x50] sm:$0xff] %v1585_v45  ;;  %1602 = vst [vmem:[#allocation3 + $0x58] sm:$0xff] %v1586_v14 }
 0x1fa   : > { %1650 = vst [vmem:[#allocation5 + $0x58] sm:$0xff] %v1586_v14  ;;  %1603 = vst [vmem:[#allocation3 + $0x60] sm:$0xff] %v1587_v33 }
 0x1fb   : > { %1651 = vst [vmem:[#allocation5 + $0x60] sm:$0xff] %v1587_v33  ;;  %1604 = vst [vmem:[#allocation3 + $0x68] sm:$0xff] %v1588_v39 }
 0x1fc   : > { %1652 = vst [vmem:[#allocation5 + $0x68] sm:$0xff] %v1588_v39  ;;  %1605 = vst [vmem:[#allocation3 + $0x70] sm:$0xff] %v1589_v42  ;;  %v1266_v48 = vpop.permute.xlu0 %1265 }
 0x1fd   : > { %v4623_v25 = vpop.permute.xlu1 %1161  ;;  %1653 = vst [vmem:[#allocation5 + $0x70] sm:$0xff] %v1589_v42  ;;  %1606 = vst [vmem:[#allocation3 + $0x78] sm:$0xff] %v1590_v43 }
 0x1fe   : > { %1654 = vst [vmem:[#allocation5 + $0x78] sm:$0xff] %v1590_v43  ;;  %5640 = vst [vmem:[#allocation23_spill] sm:$0xff] %v4735_v54 }
 0x1ff   : > { %5641 = vst [vmem:[#allocation24_spill] sm:$0xff] %v4741_v58 }
 0x200   : > { %v1276_v53 = vpop.permute.xlu0 %1275 }
 0x201   : > { %v4685_v17 = vpop.permute.xlu1 %1166 }
 0x204   : > { %v4737_v34 = vpop.permute.xlu0 %1285 }
 0x205   : > { %v4713_v46 = vpop.permute.xlu1 %1171 }
 0x208   : > { %v4745_v20 = vpop.permute.xlu0 %1295 }
 0x209   : > { %v4715_v55 = vpop.permute.xlu1 %1176 }
 0x20c   : > { %v4753_v6 = vpop.permute.xlu0 %1305 }
 0x20d   : > { %v4717_v35 = vpop.permute.xlu1 %1186 }
 0x210   : > { %v4769_v57 = vpop.permute.xlu0 %1315 }
 0x211   : > { %v4721_v32 = vpop.permute.xlu1 %1196 }
 0x215   : > { %v4725_v13 = vpop.permute.xlu1 %1206 }
 0x219   : > { %v1271_v36 = vpop.permute.xlu1 %1270 }
 0x21d   : > { %v1281_v52 = vpop.permute.xlu1 %1280 }
 0x221   : > { %v4733_v22 = vpop.permute.xlu1 %1290 }
 0x225   : > { %v4743_v56 = vpop.permute.xlu1 %1300 }
 0x229   : > { %v4750_v1 = vpop.permute.xlu1 %1310 }
 0x22d   : > { %v4764_v33 = vpop.permute.xlu1 %1320 }
 0x246   : > { %v3385_v37 = vpop.f32.mrb[0].mxu1 }
 0x247   : > { %v1114_v27 = vsub.f32 %v3385_v37, %v4748_v59  ;;  %v837_v30 = vpop.f32.mrb[1].mxu1 }
 0x248   : > { %v1113_v7 = vsub.f32 %v837_v30, %v4748_v59 }
 0x249   : > { %v1210_v28 = vsub.f32 %v1114_v27, %v1137_v47 }
 0x24a   : > { %v1209_v29 = vsub.f32 %v1113_v7, %v4550_v51  ;;  %v3388_v5 = vpop.f32.mrb[2].mxu1 }
 0x24b   : > { %v1226_v8 = vmax.f32 %v1210_v28, -40.0  ;;  %v1116_v45 = vsub.f32 %v3388_v5, %v4748_v59  ;;  %v847_v14 = vpop.f32.mrb[3].mxu1 }
 0x24c   : > { %v1225_v39 = vmax.f32 %v1209_v29, -40.0  ;;  %v1115_v42 = vsub.f32 %v847_v14, %v4748_v59 }
 0x24d   : > { %v1248_v43 = vmul.f32 %v4759_v9, %v1226_v8  ;;  %v1212_v47 = vsub.f32 %v1116_v45, %v4558_v61 }
 0x24e   : > { %v1247_v37 = vmul.f32 %v4759_v9, %v1225_v39  ;;  %v1211_v51 = vsub.f32 %v1115_v42, %v4556_v16  ;;  %v3391_v27 = vpop.f32.mrb[4].mxu1 }
 0x24f   : > { %v4773_v30 = vmul.f32 %v1271_v36, %v1248_v43  ;;  %v1228_v7 = vmax.f32 %v1212_v47, -40.0  ;;  %v1118_v28 = vsub.f32 %v3391_v27, %v4748_v59  ;;  %v857_v5 = vpop.f32.mrb[5].mxu1  ;;  %v4785_v36 = vpop.permute.xlu1 %1330 }
 0x250   : > { %v4776_v29 = vmul.f32 %v1266_v48, %v1247_v37  ;;  %v1227_v14 = vmax.f32 %v1211_v51, -40.0  ;;  %v1117_v8 = vsub.f32 %v857_v5, %v4748_v59 }
 0x251   : > { %1360 = vst [vmem:[%s4779_s29 + $0x8] sm:$0xff] %v4773_v30  ;;  %v1250_v16 = vmul.f32 %v4759_v9, %v1228_v7  ;;  %v1214_v61 = vsub.f32 %v1118_v28, %v4573_v62  ;;  %v4796_v62 = vpop.permute.xlu0 %1325 }
 0x252   : > { %1359 = vst [vmem:[%s4779_s29] sm:$0xff] %v4776_v29  ;;  %v1410_v48 = vadd.f32 %v4773_v30, %v4776_v29  ;;  %v1249_v45 = vmul.f32 %v4759_v9, %v1227_v14  ;;  %v1213_v39 = vsub.f32 %v1117_v8, %v4560_v26  ;;  %v3394_v42 = vpop.f32.mrb[6].mxu1 }
 0x253   : > { %v4793_v43 = vmul.f32 %v1281_v52, %v1250_v16  ;;  %v1230_v47 = vmax.f32 %v1214_v61, -40.0  ;;  %v1120_v37 = vsub.f32 %v3394_v42, %v4748_v59  ;;  %v867_v51 = vpop.f32.mrb[7].mxu1  ;;  %v4814_v42 = vpop.permute.xlu1 %1340 }
 0x254   : > { %v4798_v27 = vmul.f32 %v1276_v53, %v1249_v45  ;;  %v1229_v7 = vmax.f32 %v1213_v39, -40.0  ;;  %v1119_v28 = vsub.f32 %v867_v51, %v4748_v59 }
 0x255   : > { %1362 = vst [vmem:[%s4779_s29 + $0x18] sm:$0xff] %v4793_v43  ;;  %v1252_v5 = vmul.f32 %v4759_v9, %v1230_v47  ;;  %v1216_v26 = vsub.f32 %v1120_v37, %v4685_v17  ;;  %v4825_v51 = vpop.permute.xlu0 %1335 }
 0x256   : > { %1361 = vst [vmem:[%s4779_s29 + $0x10] sm:$0xff] %v4798_v27  ;;  %v1411_v52 = vadd.f32 %v1410_v48, %v4798_v27  ;;  %v1251_v14 = vmul.f32 %v4759_v9, %v1229_v7  ;;  %v1215_v53 = vsub.f32 %v1119_v28, %v4623_v25  ;;  %v3397_v8 = vpop.f32.mrb[8].mxu1 }
 0x257   : > { %v4811_v16 = vmul.f32 %v4733_v22, %v1252_v5  ;;  %v1232_v61 = vmax.f32 %v1216_v26, -40.0  ;;  %v1122_v45 = vsub.f32 %v3397_v8, %v4748_v59  ;;  %v877_v39 = vpop.f32.mrb[9].mxu1  ;;  %v4840_v8 = vpop.permute.xlu1 %1438 }
 0x258   : > { %v4817_v17 = vmul.f32 %v4737_v34, %v1251_v14  ;;  %v1412_v48 = vadd.f32 %v1411_v52, %v4793_v43  ;;  %v1231_v47 = vmax.f32 %v1215_v53, -40.0  ;;  %v1121_v37 = vsub.f32 %v877_v39, %v4748_v59 }
 0x259   : > { %1364 = vst [vmem:[%s4779_s29 + $0x28] sm:$0xff] %v4811_v16  ;;  %v1254_v25 = vmul.f32 %v4759_v9, %v1232_v61  ;;  %v1218_v22 = vsub.f32 %v1122_v45, %v4715_v55 }
 0x25a   : > { %1363 = vst [vmem:[%s4779_s29 + $0x20] sm:$0xff] %v4817_v17  ;;  %v1413_v7 = vadd.f32 %v1412_v48, %v4817_v17  ;;  %v1253_v34 = vmul.f32 %v4759_v9, %v1231_v47  ;;  %v1217_v28 = vsub.f32 %v1121_v37, %v4713_v46  ;;  %v3400_v5 = vpop.f32.mrb[10].mxu1  ;;  %v4847_v48 = vpop.permute.xlu0 %1433 }
 0x25b   : > { %v4833_v26 = vmul.f32 %v4743_v56, %v1254_v25  ;;  %v1234_v52 = vmax.f32 %v1218_v22, -40.0  ;;  %v1124_v14 = vsub.f32 %v3400_v5, %v4748_v59  ;;  %v887_v45 = vpop.f32.mrb[11].mxu1 }
 0x25c   : > { %v4837_v55 = vmul.f32 %v4745_v20, %v1253_v34  ;;  %v1414_v53 = vadd.f32 %v1413_v7, %v4811_v16  ;;  %v1233_v61 = vmax.f32 %v1217_v28, -40.0  ;;  %v1123_v39 = vsub.f32 %v887_v45, %v4748_v59 }
 0x25d   : > { %1366 = vst [vmem:[%s4779_s29 + $0x38] sm:$0xff] %v4833_v26  ;;  %v1256_v46 = vmul.f32 %v4759_v9, %v1234_v52  ;;  %v1220_v56 = vsub.f32 %v1124_v14, %v4717_v35 }
 0x25e   : > { %1365 = vst [vmem:[%s4779_s29 + $0x30] sm:$0xff] %v4837_v55  ;;  %v1415_v20 = vadd.f32 %v1414_v53, %v4837_v55  ;;  %v1255_v47 = vmul.f32 %v4759_v9, %v1233_v61  ;;  %v3403_v37 = vpop.f32.mrb[12].mxu1  ;;  %v1219_v7 = vsub.f32 %v1123_v39, %v4719_v38  ;;  %v4870_v61 = vpop.permute.xlu1 %1448 }
 0x25f   : > { %v4854_v25 = vmul.f32 %v4750_v1, %v1256_v46  ;;  %v1236_v22 = vmax.f32 %v1220_v56, -40.0  ;;  %v1126_v35 = vsub.f32 %v3403_v37, %v4748_v59  ;;  %v897_v5 = vpop.f32.mrb[13].mxu1 }
 0x260   : > { %v4859_v34 = vmul.f32 %v4753_v6, %v1255_v47  ;;  %v1416_v28 = vadd.f32 %v1415_v20, %v4833_v26  ;;  %v1235_v14 = vmax.f32 %v1219_v7, -40.0  ;;  %v1125_v53 = vsub.f32 %v897_v5, %v4748_v59  ;;  %v4877_v20 = vpop.permute.xlu0 %1443 }
 0x261   : > { %1368 = vst [vmem:[%s4779_s29 + $0x48] sm:$0xff] %v4854_v25  ;;  %v1258_v52 = vmul.f32 %v4759_v9, %v1236_v22  ;;  %v1222_v1 = vsub.f32 %v1126_v35, %v4721_v32 }
 0x262   : > { %1367 = vst [vmem:[%s4779_s29 + $0x40] sm:$0xff] %v4859_v34  ;;  %v1417_v38 = vadd.f32 %v1416_v28, %v4859_v34  ;;  %v3406_v6 = vpop.f32.mrb[14].mxu1  ;;  %v1257_v46 = vmul.f32 %v4759_v9, %v1235_v14  ;;  %v1221_v39 = vsub.f32 %v1125_v53, %v4723_v49 }
 0x263   : > { %v4873_v45 = vmul.f32 %v4764_v33, %v1258_v52  ;;  %v1238_v56 = vmax.f32 %v1222_v1, -40.0  ;;  %v1128_v47 = vsub.f32 %v3406_v6, %v4748_v59  ;;  %v907_v37 = vpop.f32.mrb[15].mxu1  ;;  %v4899_v1 = vpop.permute.xlu1 %1458 }
 0x264   : > { %v1418_v32 = vadd.f32 %v1417_v38, %v4854_v25  ;;  %v4884_v22 = vmul.f32 %v4769_v57, %v1257_v46  ;;  %v1237_v7 = vmax.f32 %v1221_v39, -40.0  ;;  %v1127_v35 = vsub.f32 %v907_v37, %v4748_v59  ;;  %v4897_v14 = vpop.permute.xlu0 %1453 }
 0x265   : > { %1370 = vst [vmem:[%s4779_s29 + $0x58] sm:$0xff] %v4873_v45  ;;  %v1260_v33 = vmul.f32 %v4759_v9, %v1238_v56  ;;  %v1224_v49 = vsub.f32 %v1128_v47, %v4725_v13 }
 0x266   : > { %1369 = vst [vmem:[%s4779_s29 + $0x50] sm:$0xff] %v4884_v22  ;;  %v1419_v28 = vadd.f32 %v1418_v32, %v4884_v22  ;;  %v1259_v52 = vmul.f32 %v4759_v9, %v1237_v7  ;;  %v1223_v57 = vsub.f32 %v1127_v35, %v4727_v50 }
 0x267   : > { %v4893_v5 = vmul.f32 %v4785_v36, %v1260_v33  ;;  %v1240_v59 = vmax.f32 %v1224_v49, -40.0  ;;  %v4923_v32 = vpop.permute.xlu1 %1468 }
 0x268   : > { %v4904_v13 = vmul.f32 %v4796_v62, %v1259_v52  ;;  %v1420_v53 = vadd.f32 %v1419_v28, %v4873_v45  ;;  %v1239_v36 = vmax.f32 %v1223_v57, -40.0  ;;  %v4919_v39 = vpop.permute.xlu0 %1463  ;;  %5643 = vst [vmem:[#allocation26_spill] sm:$0xff] %v4923_v32 }
 0x269   : > { %1372 = vst [vmem:[%s4779_s29 + $0x68] sm:$0xff] %v4893_v5  ;;  %v1262_v38 = vmul.f32 %v4759_v9, %v1240_v59  ;;  %5642 = vst [vmem:[#allocation25_spill] sm:$0xff] %v4919_v39 }
 0x26a   : > { %1371 = vst [vmem:[%s4779_s29 + $0x60] sm:$0xff] %v4904_v13  ;;  %v1421_v50 = vadd.f32 %v1420_v53, %v4904_v13  ;;  %v1261_v6 = vmul.f32 %v4759_v9, %v1239_v36 }
 0x26b   : > { %v4913_v46 = vmul.f32 %v4814_v42, %v1262_v38  ;;  %v4931_v33 = vpop.permute.xlu1 %1478 }
 0x26c   : > { %v4916_v56 = vmul.f32 %v4825_v51, %v1261_v6  ;;  %v1422_v62 = vadd.f32 %v1421_v50, %v4893_v5  ;;  %v4929_v42 = vpop.permute.xlu0 %1473  ;;  %5645 = vst [vmem:[#allocation28_spill] sm:$0xff] %v4931_v33 }
 0x26d   : > { %1374 = vst [vmem:[%s4779_s29 + $0x78] sm:$0xff] %v4913_v46  ;;  %5644 = vst [vmem:[#allocation27_spill] sm:$0xff] %v4929_v42 }
 0x26e   : > { %1373 = vst [vmem:[%s4779_s29 + $0x70] sm:$0xff] %v4916_v56  ;;  %v1423_v47 = vadd.f32 %v1422_v62, %v4916_v56 }
 0x26f   : > { %v4935_v28 = vpop.permute.xlu1 %1488 }
 0x270   : > { %v1424_v9 = vadd.f32 %v1423_v47, %v4913_v46  ;;  %v4933_v49 = vpop.permute.xlu0 %1483  ;;  %5647 = vst [vmem:[#allocation30_spill] sm:$0xff] %v4935_v28 }
 0x271   : > { %5646 = vst [vmem:[#allocation29_spill] sm:$0xff] %v4933_v49 }
 0x272   : > { %v1425_v37 = vrot.slane %v1424_v9, 4 }
 0x274   : > { %v1426_v51 = vadd.f32 %v1425_v37, %v1424_v9  ;;  %v4945_v9 = vpop.permute.xlu0 %1493  ;;  %v4947_v37 = vpop.permute.xlu1 %1498 }
 0x275   : > { %5648 = vst [vmem:[#allocation31_spill] sm:$0xff] %v4945_v9  ;;  %5649 = vst [vmem:[#allocation32_spill] sm:$0xff] %v4947_v37 }
 0x276   : > { %v1427_v7 = vrot.slane %v1426_v51, 2 }
 0x278   : > { %v1428_v35 = vadd.f32 %v1427_v7, %v1426_v51 }
 0x27a   : > { %v1429_v52 = vrot.slane %v1428_v35, 1 }
 0x27c   : > { %v1430_v57 = vadd.f32 %v1429_v52, %v1428_v35 }
 0x27e   : > { %v1511_v59 = vadd.f32 %v4847_v48, %v1430_v57  ;;  %v1512_v53 = vadd.f32 %v4840_v8, %v1430_v57  ;;  %v1513_v36 = vadd.f32 %v4877_v20, %v1430_v57  ;;  %v1514_v38 = vadd.f32 %v4870_v61, %v1430_v57 }
 0x27f   : > { %v1515_v50 = vadd.f32 %v4897_v14, %v1430_v57  ;;  %v1516_v6 = vadd.f32 %v4899_v1, %v1430_v57  ;;  %v1517_v62 = vadd.f32 %v4919_v39, %v1430_v57  ;;  %v1518_v47 = vadd.f32 %v4923_v32, %v1430_v57 }
 0x280   : > { %v1519_v51 = vadd.f32 %v4929_v42, %v1430_v57  ;;  %v1520_v7 = vadd.f32 %v4931_v33, %v1430_v57  ;;  %v1527_v35 = vsel %vm1394_vm2, %v1511_v59, 0.0  ;;  %v1528_v52 = vsel %vm1395_vm3, %v1512_v53, 0.0 }
 0x281   : > { %v1529_v23 = vsel %vm1396_vm4, %v1513_v36, 0.0  ;;  %v1530_v24 = vsel %vm1397_vm5, %v1514_v38, 0.0  ;;  %v1531_v54 = vsel %vm1398_vm6, %v1515_v50, 0.0  ;;  %v1532_v59 = vsel %vm1399_vm7, %v1516_v6, 0.0 }
 0x282   : > { %v1533_v53 = vsel %vm1400_vm8, %v1517_v62, 0.0  ;;  %v1534_v36 = vsel %vm1401_vm9, %v1518_v47, 0.0  ;;  %v1535_v38 = vsel %vm1402_vm10, %v1519_v51, 0.0  ;;  %v1536_v50 = vsel %vm1403_vm11, %v1520_v7, 0.0 }
 0x283   : > { %v1543_v33 = vsub.f32 %v1527_v35, %v4776_v29  ;;  %v1544_v6 = vsub.f32 %v1528_v52, %v4773_v30  ;;  %v1545_v42 = vsub.f32 %v1529_v23, %v4798_v27  ;;  %v1546_v62 = vsub.f32 %v1530_v24, %v4793_v43  ;;  %v4995_v30 = vpop.permute.xlu1 %1508 }
 0x284   : > { %v1547_v32 = vsub.f32 %v1531_v54, %v4817_v17  ;;  %v1548_v47 = vsub.f32 %v1532_v59, %v4811_v16  ;;  %v1549_v39 = vsub.f32 %v1533_v53, %v4837_v55  ;;  %v1550_v51 = vsub.f32 %v1534_v36, %v4833_v26  ;;  %v4993_v54 = vpop.permute.xlu0 %1503  ;;  %5651 = vst [vmem:[#allocation34_spill] sm:$0xff] %v4995_v30 }
 0x285   : > { %v1551_v0 = vsub.f32 %v1535_v38, %v4859_v34  ;;  %v1552_v7 = vsub.f32 %v1536_v50, %v4854_v25  ;;  %1559 = vst [vmem:[#allocation2] sm:$0xff] %v1543_v33  ;;  %1560 = vst [vmem:[#allocation2 + $0x8] sm:$0xff] %v1544_v6  ;;  %v1521_v23 = vadd.f32 %v4933_v49, %v1430_v57 }
 0x286   : > { %1561 = vst [vmem:[#allocation2 + $0x10] sm:$0xff] %v1545_v42  ;;  %1562 = vst [vmem:[#allocation2 + $0x18] sm:$0xff] %v1546_v62  ;;  %v1522_v24 = vadd.f32 %v4935_v28, %v1430_v57  ;;  %v1523_v29 = vadd.f32 %v4945_v9, %v1430_v57  ;;  %v1524_v43 = vadd.f32 %v4947_v37, %v1430_v57 }
 0x287   : > { %1623 = vst [vmem:[#allocation4] sm:$0xff] %v1543_v33  ;;  %1624 = vst [vmem:[#allocation4 + $0x8] sm:$0xff] %v1544_v6  ;;  %v1525_v27 = vadd.f32 %v4993_v54, %v1430_v57  ;;  %v1526_v16 = vadd.f32 %v4995_v30, %v1430_v57  ;;  %v1537_v17 = vsel %vm1404_vm12, %v1521_v23, 0.0 }
 0x288   : > { %1625 = vst [vmem:[#allocation4 + $0x10] sm:$0xff] %v1545_v42  ;;  %1626 = vst [vmem:[#allocation4 + $0x18] sm:$0xff] %v1546_v62  ;;  %v1538_v26 = vsel %vm1405_vm13, %v1522_v24, 0.0  ;;  %v1553_v55 = vsub.f32 %v1537_v17, %v4884_v22  ;;  %v1539_v34 = vsel %vm1406_vm14, %v1523_v29, 0.0 }
 0x289   : > { %5650 = vst [vmem:[#allocation33_spill] sm:$0xff] %v4993_v54  ;;  %1563 = vst [vmem:[#allocation2 + $0x20] sm:$0xff] %v1547_v32  ;;  %v1554_v25 = vsub.f32 %v1538_v26, %v4873_v45  ;;  %v1541_v42 = vsel %vm5606_vm0, %v1525_v27, 0.0  ;;  %v1542_v45 = vsel %vm5605_vm1, %v1526_v16, 0.0 }
 0x28a   : > { %1564 = vst [vmem:[#allocation2 + $0x28] sm:$0xff] %v1548_v47  ;;  %1565 = vst [vmem:[#allocation2 + $0x30] sm:$0xff] %v1549_v39  ;;  %v1557_v22 = vsub.f32 %v1541_v42, %v4916_v56  ;;  %v1558_v33 = vsub.f32 %v1542_v45, %v4913_v46 }
 0x28b   : > { %1566 = vst [vmem:[#allocation2 + $0x38] sm:$0xff] %v1550_v51  ;;  %1627 = vst [vmem:[#allocation4 + $0x20] sm:$0xff] %v1547_v32 }
 0x28c   : > { %1628 = vst [vmem:[#allocation4 + $0x28] sm:$0xff] %v1548_v47  ;;  %1629 = vst [vmem:[#allocation4 + $0x30] sm:$0xff] %v1549_v39  ;;  %v1555_v39 = vsub.f32 %v1539_v34, %v4904_v13 }
 0x28d   : > { %1630 = vst [vmem:[#allocation4 + $0x38] sm:$0xff] %v1550_v51  ;;  %1567 = vst [vmem:[#allocation2 + $0x40] sm:$0xff] %v1551_v0 }
 0x28e   : > { %1568 = vst [vmem:[#allocation2 + $0x48] sm:$0xff] %v1552_v7  ;;  %1631 = vst [vmem:[#allocation4 + $0x40] sm:$0xff] %v1551_v0  ;;  %v1540_v0 = vsel %vm1407_vm15, %v1524_v43, 0.0 }
 0x28f   : > { %1632 = vst [vmem:[#allocation4 + $0x48] sm:$0xff] %v1552_v7  ;;  %v1556_v32 = vsub.f32 %v1540_v0, %v4893_v5  ;;  %1569 = vst [vmem:[#allocation2 + $0x50] sm:$0xff] %v1553_v55 }
 0x290   : > { %1633 = vst [vmem:[#allocation4 + $0x50] sm:$0xff] %v1553_v55  ;;  %1570 = vst [vmem:[#allocation2 + $0x58] sm:$0xff] %v1554_v25 }
 0x291   : > { %1634 = vst [vmem:[#allocation4 + $0x58] sm:$0xff] %v1554_v25  ;;  %1571 = vst [vmem:[#allocation2 + $0x60] sm:$0xff] %v1555_v39 }
 0x292   : > { %1635 = vst [vmem:[#allocation4 + $0x60] sm:$0xff] %v1555_v39  ;;  %1572 = vst [vmem:[#allocation2 + $0x68] sm:$0xff] %v1556_v32 }
 0x293   : > { %1636 = vst [vmem:[#allocation4 + $0x68] sm:$0xff] %v1556_v32  ;;  %1573 = vst [vmem:[#allocation2 + $0x70] sm:$0xff] %v1557_v22 }
 0x294   : > { %1637 = vst [vmem:[#allocation4 + $0x70] sm:$0xff] %v1557_v22  ;;  %1574 = vst [vmem:[#allocation2 + $0x78] sm:$0xff] %v1558_v33 }
 0x295   : > { %1638 = vst [vmem:[#allocation4 + $0x78] sm:$0xff] %v1558_v33 }
 0x296 LB: >> { %v5652_v58 = vld [vmem:[#allocation24_spill] sm:$0xff]  ;;  %v5031_v5 = vld [vmem:[#allocation4 + $0x8] sm:$0xff]  ;;  %v1665_v46 = vstv %s3994_s11  ;;  %s1661_s12 = scalar_lea.vmem [#allocation4], %s3994_s11  ;;  %v5046_v35 = vld [vmem:[#allocation4 + $0x10] sm:$0xff]  ;;  %vm1668_vm0 = vcmask 1040384   ;;  %s1663_s13 = scalar_lea.vmem [#allocation5], %s3994_s11  ;;  %s3994_s11 = sphi %s5026_s11, %s1660_s11  }
 0x297   : >> { %v5033_v13 = vld [vmem:[#allocation4] sm:$0xff]  ;;  %vm5037_vm1 = vcmp.eq.s32.totalorder %v4593_v40, %v1665_v46  ;;  %v5062_v6 = vld [vmem:[#allocation4 + $0x18] sm:$0xff]  ;;  %v5070_v51 = vld [vmem:[#allocation4 + $0x30] sm:$0xff]  ;;  %s1660_s11 = sadd.s32 1, %s3994_s11  }
 0x298   : >> { %v1694_v52 = vsel %vm5037_vm1, %v5031_v5, 0.0  ;;  %v1693_v59 = vsel %vm5037_vm1, %v5033_v13, 0.0  ;;  %v1695_v36 = vsel %vm5037_vm1, %v5046_v35, 0.0  ;;  %v5060_v50 = vld [vmem:[#allocation4 + $0x20] sm:$0xff]  ;;  %v1696_v47 = vsel %vm5037_vm1, %v5062_v6, 0.0  ;;  %v5072_v7 = vld [vmem:[#allocation4 + $0x28] sm:$0xff] }
 0x299   : >> { %1711 = vadd.xlane.f32.xlu1 %v1694_v52  ;;  %1709 = vadd.xlane.f32.xlu0 %v1693_v59  ;;  %v1697_v62 = vsel %vm5037_vm1, %v5060_v50, 0.0  ;;  %v1699_v23 = vsel %vm5037_vm1, %v5070_v51, 0.0  ;;  %v1698_v24 = vsel %vm5037_vm1, %v5072_v7, 0.0  ;;  %v5080_v29 = vld [vmem:[#allocation4 + $0x40] sm:$0xff]  ;;  %v5082_v43 = vld [vmem:[#allocation4 + $0x38] sm:$0xff]  ;;  %v5090_v17 = vld [vmem:[#allocation4 + $0x50] sm:$0xff] }
 0x29a   : >> { %v1701_v27 = vsel %vm5037_vm1, %v5080_v29, 0.0  ;;  %v1700_v16 = vsel %vm5037_vm1, %v5082_v43, 0.0  ;;  %v5092_v26 = vld [vmem:[#allocation4 + $0x48] sm:$0xff]  ;;  %v1703_v55 = vsel %vm5037_vm1, %v5090_v17, 0.0  ;;  %v5100_v34 = vld [vmem:[#allocation4 + $0x60] sm:$0xff]  ;;  %v5102_v0 = vld [vmem:[#allocation4 + $0x58] sm:$0xff] }
 0x29b   : >> { %v1702_v25 = vsel %vm5037_vm1, %v5092_v26, 0.0  ;;  %v1705_v39 = vsel %vm5037_vm1, %v5100_v34, 0.0  ;;  %v1704_v32 = vsel %vm5037_vm1, %v5102_v0, 0.0  ;;  %v5110_v42 = vld [vmem:[#allocation4 + $0x70] sm:$0xff]  ;;  %v5112_v45 = vld [vmem:[#allocation4 + $0x68] sm:$0xff]  ;;  %v1797_v54 = vld [vmem:[#allocation5 + $0x20] sm:$0xff] }
 0x29c   : >> { %v5044_v57 = vld [vmem:[%s1661_s12] sm:$0x1]  ;;  %v1707_v22 = vsel %vm5037_vm1, %v5110_v42, 0.0  ;;  %v1706_v33 = vsel %vm5037_vm1, %v5112_v45, 0.0  ;;  %v5120_v46 = vld [vmem:[#allocation4 + $0x78] sm:$0xff]  ;;  %p1657_p11 = scmp.ge.s32.totalorder %s1660_s11, 128  }
 0x29d   : >> { %v1667_v53 = vsel %vm5037_vm1, %v5044_v57, 0.0  ;;  %1713 = vadd.xlane.f32.xlu1 %v1695_v36  ;;  %v1708_v52 = vsel %vm5037_vm1, %v5120_v46, 0.0  ;;  %v1796_v3 = vld [vmem:[#allocation5 + $0x18] sm:$0xff]  ;;  %s3133_s22 = sshll.u32 (%p1657_p11), %s4082_s8, 4  ;;  %s2954_s26 = sshll.u32 (%p1657_p11), %s390_s30, 4  ;;  %s2955_s26 = int_to_ptr.vmem [resolvable:$true] %s2954_s26 }
 0x29e   : >> { %v1669_v38 = vsel %vm1668_vm0, %v1667_v53, 0.0  ;;  %s5426_s21 = scalar_lea.hbm (%p1657_p11), %s5595_s10, %s3133_s22  ;;  %s2926_s28 = scalar_lea.sflag (%p1657_p11), [#allocation10], %s4488_s19 }
 0x29f   : >> { %1670 = vadd.xlane.f32.xlu0 %v1669_v38  ;;  %s3892_s11 = scalar_lea.vmem (%p1657_p11), %s2955_s26, 16 }
 0x2a0   : > { %p3893_p12 = scmp.ne.s32.totalorder (%p1657_p11), %s2955_s26, %s3892_s11 }
 0x2a1   : >> { %1717 = vadd.xlane.f32.xlu1 %v1697_v62 }
 0x2a2   : > { %p3894_p13 = pnand (%p1657_p11), %p3893_p12, %p4099_p5 }
 0x2a3   : >> { %1715 = vadd.xlane.f32.xlu0 %v1696_v47 }
 0x2a4   : > { %p3895_p0 = pneg (%p1657_p11), %p3894_p13 }
 0x2a5   : >> { %1721 = vadd.xlane.f32.xlu1 %v1699_v23 }
 0x2a7   : >> { %1719 = vadd.xlane.f32.xlu0 %v1698_v24 }
 0x2a9   : >> { %1725 = vadd.xlane.f32.xlu1 %v1701_v27  ;;  %v1664_v27 = vld [vmem:[%s1663_s13] sm:$0x1] }
 0x2ab   : >> { %1723 = vadd.xlane.f32.xlu0 %v1700_v16 }
 0x2ad   : >> { %1729 = vadd.xlane.f32.xlu1 %v1703_v55 }
 0x2af   : >> { %1727 = vadd.xlane.f32.xlu0 %v1702_v25 }
 0x2b1   : >> { %1733 = vadd.xlane.f32.xlu1 %v1705_v39 }
 0x2b3   : >> { %1731 = vadd.xlane.f32.xlu0 %v1704_v32 }
 0x2b5   : >> { %1737 = vadd.xlane.f32.xlu1 %v1707_v22 }
 0x2b7   : >> { %1735 = vadd.xlane.f32.xlu0 %v1706_v33  ;;  %v1793_v33 = vld [vmem:[#allocation5] sm:$0xff] }
 0x2bb   : >> { %1739 = vadd.xlane.f32.xlu0 %v1708_v52  ;;  %v1794_v52 = vld [vmem:[#allocation5 + $0x8] sm:$0xff] }
 0x326   : >> { %v1712_v59 = vpop.xlane.xlu1 %1711  ;;  %v1710_v53 = vpop.xlane.xlu0 %1709 }
 0x32a   : >> { %v1714_v36 = vpop.xlane.xlu1 %1713 }
 0x32c   : >> { %v1671_v38 = vpop.xlane.xlu0 %1670 }
 0x32d   : >> { %3890 = vrcp.f32 %v1671_v38  ;;  %v1795_v38 = vld [vmem:[#allocation5 + $0x10] sm:$0xff] }
 0x32e   : >> { %v1718_v62 = vpop.xlane.xlu1 %1717 }
 0x330   : >> { %v1716_v47 = vpop.xlane.xlu0 %1715 }
 0x332   : >> { %v1722_v23 = vpop.xlane.xlu1 %1721 }
 0x334   : >> { %v1720_v24 = vpop.xlane.xlu0 %1719 }
 0x336   : >> { %v1726_v56 = vpop.xlane.xlu1 %1725 }
 0x337   : >> { %v3891_v16 = vpop.eup %3890 }
 0x338   : >> { %v5129_v55 = vmul.f32 %v3891_v16, %v5044_v57  ;;  %v5131_v25 = vmul.f32 %v3891_v16, %v1664_v27  ;;  %v1724_v39 = vpop.xlane.xlu0 %1723 }
 0x33a   : >> { %v5135_v32 = vrot.slane %v5129_v55, %v5652_v58  ;;  %v5139_v22 = vrot.slane %v5131_v25, %v5652_v58  ;;  %v1730_v11 = vpop.xlane.xlu1 %1729 }
 0x33c   : >> { %v1745_v30 = vmul.f32 %v5135_v32, %v1710_v53  ;;  %v1746_v57 = vmul.f32 %v5135_v32, %v1712_v59  ;;  %v1747_v27 = vmul.f32 %v5135_v32, %v1714_v36  ;;  %v1813_v16 = vmul.f32 %v5139_v22, %v1710_v53  ;;  %v1728_v31 = vpop.xlane.xlu0 %1727 }
 0x33d   : >> { %v1814_v37 = vmul.f32 %v5139_v22, %v1712_v59  ;;  %v1815_v9 = vmul.f32 %v5139_v22, %v1714_v36  ;;  %v1749_v58 = vmul.f32 %v5135_v32, %v1718_v62  ;;  %v1817_v10 = vmul.f32 %v5139_v22, %v1718_v62  ;;  %v1799_v59 = vld [vmem:[#allocation5 + $0x30] sm:$0xff] }
 0x33e   : >> { %v1761_v12 = vsub.f32 %v5033_v13, %v1745_v30  ;;  %v1762_v28 = vsub.f32 %v5031_v5, %v1746_v57  ;;  %v1763_v49 = vsub.f32 %v5046_v35, %v1747_v27  ;;  %v1829_v44 = vsub.f32 %v1793_v33, %v1813_v16  ;;  %v1798_v35 = vld [vmem:[#allocation5 + $0x28] sm:$0xff]  ;;  %v1803_v33 = vld [vmem:[#allocation5 + $0x50] sm:$0xff] }
 0x33f   : >> { %v1830_v41 = vsub.f32 %v1794_v52, %v1814_v37  ;;  %v1831_v53 = vsub.f32 %v1795_v38, %v1815_v9  ;;  %v1765_v4 = vsub.f32 %v5060_v50, %v1749_v58  ;;  %v1833_v2 = vsub.f32 %v1797_v54, %v1817_v10  ;;  %v1801_v37 = vld [vmem:[#allocation5 + $0x40] sm:$0xff]  ;;  %v1734_v9 = vpop.xlane.xlu1 %1733 }
 0x340   : >> { %1777 = vst [vmem:[#allocation4] sm:$0xff] %v1761_v12  ;;  %1778 = vst [vmem:[#allocation4 + $0x8] sm:$0xff] %v1762_v28  ;;  %v1748_v36 = vmul.f32 %v5135_v32, %v1716_v47  ;;  %v1816_v30 = vmul.f32 %v5139_v22, %v1716_v47  ;;  %v1751_v5 = vmul.f32 %v5135_v32, %v1722_v23  ;;  %v1732_v62 = vpop.xlane.xlu0 %1731 }
 0x341   : >> { %1779 = vst [vmem:[#allocation4 + $0x10] sm:$0xff] %v1763_v49  ;;  %1845 = vst [vmem:[#allocation5] sm:$0xff] %v1829_v44  ;;  %v1819_v13 = vmul.f32 %v5139_v22, %v1722_v23  ;;  %v1750_v10 = vmul.f32 %v5135_v32, %v1720_v24  ;;  %v1818_v44 = vmul.f32 %v5139_v22, %v1720_v24  ;;  %v1800_v23 = vld [vmem:[#allocation5 + $0x38] sm:$0xff] }
 0x342   : >> { %1846 = vst [vmem:[#allocation5 + $0x8] sm:$0xff] %v1830_v41  ;;  %1847 = vst [vmem:[#allocation5 + $0x10] sm:$0xff] %v1831_v53  ;;  %v1753_v12 = vmul.f32 %v5135_v32, %v1726_v56  ;;  %v1821_v58 = vmul.f32 %v5139_v22, %v1726_v56  ;;  %v1764_v49 = vsub.f32 %v5062_v6, %v1748_v36  ;;  %v1802_v56 = vld [vmem:[#allocation5 + $0x48] sm:$0xff] }
 0x343   : >> { %1781 = vst [vmem:[#allocation4 + $0x20] sm:$0xff] %v1765_v4  ;;  %1849 = vst [vmem:[#allocation5 + $0x20] sm:$0xff] %v1833_v2  ;;  %v1832_v28 = vsub.f32 %v1796_v3, %v1816_v30  ;;  %v1767_v54 = vsub.f32 %v5070_v51, %v1751_v5  ;;  %v1835_v50 = vsub.f32 %v1799_v59, %v1819_v13 }
 0x344   : >> { %v1766_v47 = vsub.f32 %v5072_v7, %v1750_v10  ;;  %v1834_v41 = vsub.f32 %v1798_v35, %v1818_v44  ;;  %v1769_v4 = vsub.f32 %v5080_v29, %v1753_v12  ;;  %v1837_v2 = vsub.f32 %v1801_v37, %v1821_v58  ;;  %1780 = vst [vmem:[#allocation4 + $0x18] sm:$0xff] %v1764_v49  ;;  %v1805_v7 = vld [vmem:[#allocation5 + $0x60] sm:$0xff]  ;;  %v1736_v52 = vpop.xlane.xlu0 %1735  ;;  %v1804_v35 = vld [vmem:[#allocation5 + $0x58] sm:$0xff]  ;;  %v1807_v37 = vld [vmem:[#allocation5 + $0x70] sm:$0xff] }
 0x345   : >> { %1848 = vst [vmem:[#allocation5 + $0x18] sm:$0xff] %v1832_v28  ;;  %1783 = vst [vmem:[#allocation4 + $0x30] sm:$0xff] %v1767_v54  ;;  %v1752_v24 = vmul.f32 %v5135_v32, %v1724_v39  ;;  %v1820_v6 = vmul.f32 %v5139_v22, %v1724_v39  ;;  %v1755_v3 = vmul.f32 %v5135_v32, %v1730_v11  ;;  %v1738_v39 = vpop.xlane.xlu1 %1737  ;;  %v1806_v10 = vld [vmem:[#allocation5 + $0x68] sm:$0xff] }
 0x346   : >> { %1851 = vst [vmem:[#allocation5 + $0x30] sm:$0xff] %v1835_v50  ;;  %v1823_v51 = vmul.f32 %v5139_v22, %v1730_v11  ;;  %1782 = vst [vmem:[#allocation4 + $0x28] sm:$0xff] %v1766_v47  ;;  %v1754_v29 = vmul.f32 %v5135_v32, %v1728_v31  ;;  %v1822_v38 = vmul.f32 %v5139_v22, %v1728_v31 }
 0x347   : >> { %1850 = vst [vmem:[#allocation5 + $0x28] sm:$0xff] %v1834_v41  ;;  %1785 = vst [vmem:[#allocation4 + $0x40] sm:$0xff] %v1769_v4  ;;  %v1757_v57 = vmul.f32 %v5135_v32, %v1734_v9  ;;  %v1825_v27 = vmul.f32 %v5139_v22, %v1734_v9  ;;  %v1768_v16 = vsub.f32 %v5082_v43, %v1752_v24  ;;  %v1884_v24 = vld [vmem:[#allocation2 + $0x28] sm:$0xff] (%p1657_p11) }
 0x348   : >> { %1853 = vst [vmem:[#allocation5 + $0x40] sm:$0xff] %v1837_v2  ;;  %v1836_v53 = vsub.f32 %v1800_v23, %v1820_v6  ;;  %v1771_v11 = vsub.f32 %v5090_v17, %v1755_v3  ;;  %v1839_v59 = vsub.f32 %v1803_v33, %v1823_v51  ;;  %v1770_v36 = vsub.f32 %v5092_v26, %v1754_v29  ;;  %v1808_v26 = vld [vmem:[#allocation5 + $0x78] sm:$0xff]  ;;  %v1740_v44 = vpop.xlane.xlu0 %1739  ;;  %v1883_v33 = vld [vmem:[#allocation2 + $0x20] sm:$0xff] (%p1657_p11)  ;;  %v1885_v6 = vld [vmem:[#allocation2 + $0x30] sm:$0xff] (%p1657_p11) }
 0x349   : >> { %v1838_v30 = vsub.f32 %v1802_v56, %v1822_v38  ;;  %v1773_v5 = vsub.f32 %v5100_v34, %v1757_v57  ;;  %v1841_v13 = vsub.f32 %v1805_v7, %v1825_v27  ;;  %1784 = vst [vmem:[#allocation4 + $0x38] sm:$0xff] %v1768_v16  ;;  %v1756_v31 = vmul.f32 %v5135_v32, %v1732_v62  ;;  %v1886_v3 = vld [vmem:[#allocation2 + $0x38] sm:$0xff] (%p1657_p11)  ;;  %v1887_v56 = vld [vmem:[#allocation2 + $0x40] sm:$0xff] (%p1657_p11)  ;;  %v1888_v7 = vld [vmem:[#allocation2 + $0x48] sm:$0xff] (%p1657_p11) }
 0x34a   : >> { %1852 = vst [vmem:[#allocation5 + $0x38] sm:$0xff] %v1836_v53  ;;  %1787 = vst [vmem:[#allocation4 + $0x50] sm:$0xff] %v1771_v11  ;;  %v1824_v43 = vmul.f32 %v5139_v22, %v1732_v62  ;;  %v1759_v9 = vmul.f32 %v5135_v32, %v1738_v39  ;;  %v1827_v17 = vmul.f32 %v5139_v22, %v1738_v39  ;;  %v1889_v29 = vld [vmem:[#allocation2 + $0x50] sm:$0xff] (%p1657_p11)  ;;  %v1890_v38 = vld [vmem:[#allocation2 + $0x58] sm:$0xff] (%p1657_p11) }
 0x34b   : >> { %1855 = vst [vmem:[#allocation5 + $0x50] sm:$0xff] %v1839_v59  ;;  %1786 = vst [vmem:[#allocation4 + $0x48] sm:$0xff] %v1770_v36  ;;  %v1758_v34 = vmul.f32 %v5135_v32, %v1736_v52  ;;  %v1826_v12 = vmul.f32 %v5139_v22, %v1736_v52  ;;  %v1760_v58 = vmul.f32 %v5135_v32, %v1740_v44  ;;  %v1891_v27 = vld [vmem:[#allocation2 + $0x60] sm:$0xff] (%p1657_p11)  ;;  %v1892_v39 = vld [vmem:[#allocation2 + $0x68] sm:$0xff] (%p1657_p11) }
 0x34c   : >> { %1854 = vst [vmem:[#allocation5 + $0x48] sm:$0xff] %v1838_v30  ;;  %1789 = vst [vmem:[#allocation4 + $0x60] sm:$0xff] %v1773_v5  ;;  %v1828_v49 = vmul.f32 %v5139_v22, %v1740_v44  ;;  %v1772_v62 = vsub.f32 %v5102_v0, %v1756_v31  ;;  %v1840_v28 = vsub.f32 %v1804_v35, %v1824_v43  ;;  %v1879_v0 = vld [vmem:[#allocation2] sm:$0xff] (%p1657_p11)  ;;  %v1882_v22 = vld [vmem:[#allocation2 + $0x18] sm:$0xff] (%p1657_p11) }
 0x34d   : >> { %1857 = vst [vmem:[#allocation5 + $0x60] sm:$0xff] %v1841_v13  ;;  %v1775_v54 = vsub.f32 %v5110_v42, %v1759_v9  ;;  %v1843_v50 = vsub.f32 %v1807_v37, %v1827_v17  ;;  %v1774_v47 = vsub.f32 %v5112_v45, %v1758_v34  ;;  %v1842_v41 = vsub.f32 %v1806_v10, %v1826_v12  ;;  %1659 = sbr.rel (!%p1657_p11) target bundleno = 662 (0x296), region = 123  ;;  %v1880_v42 = vld [vmem:[#allocation2 + $0x8] sm:$0xff] (%p1657_p11)  ;;  %v1881_v45 = vld [vmem:[#allocation2 + $0x10] sm:$0xff] (%p1657_p11)  ;;  %v1894_v11 = vld [vmem:[#allocation2 + $0x78] sm:$0xff] (%p1657_p11) }
 0x34e   : >> { %v1776_v4 = vsub.f32 %v5120_v46, %v1760_v58  ;;  %v1844_v2 = vsub.f32 %v1808_v26, %v1828_v49  ;;  %1788 = vst [vmem:[#allocation4 + $0x58] sm:$0xff] %v1772_v62  ;;  %1856 = vst [vmem:[#allocation5 + $0x58] sm:$0xff] %v1840_v28  ;;  %v5655_v46 = vmov (%p1657_p11), 0.0   ;;  %v3687_v32 = vpack.c.bf16 (%p1657_p11), %v1880_v42, %v1879_v0  ;;  %v1893_v53 = vld [vmem:[#allocation2 + $0x70] sm:$0xff] (%p1657_p11)  ;;  %v2040_v36 = vld [vmem:[#allocation3] sm:$0xff] (%p1657_p11) }
 0x34f   : >> { %1791 = vst [vmem:[#allocation4 + $0x70] sm:$0xff] %v1775_v54  ;;  %1859 = vst [vmem:[#allocation5 + $0x70] sm:$0xff] %v1843_v50  ;;  %3551 = vmatprep.mubr.f32.mxu1 (%p1657_p11), %v5655_v46  ;;  %v3691_v23 = vpack.c.bf16 (%p1657_p11), %v1882_v22, %v1881_v45  ;;  %v3699_v51 = vpack.c.bf16 (%p1657_p11), %v1886_v3, %v1885_v6  ;;  %v3703_v52 = vpack.c.bf16 (%p1657_p11), %v1888_v7, %v1887_v56  ;;  %v2041_v30 = vld [vmem:[#allocation3 + $0x8] sm:$0xff] (%p1657_p11)  ;;  %v2042_v13 = vld [vmem:[#allocation3 + $0x10] sm:$0xff] (%p1657_p11) }
 0x350   : >> { %1790 = vst [vmem:[#allocation4 + $0x68] sm:$0xff] %v1774_v47  ;;  %1858 = vst [vmem:[#allocation5 + $0x68] sm:$0xff] %v1842_v41  ;;  %3688 = vmatprep.subr.bf16.mxu0 (%p1657_p11), %v3687_v32  ;;  %v3707_v57 = vpack.c.bf16 (%p1657_p11), %v1890_v38, %v1889_v29  ;;  %v3711_v16 = vpack.c.bf16 (%p1657_p11), %v1892_v39, %v1891_v27  ;;  %v3715_v59 = vpack.c.bf16 (%p1657_p11), %v1894_v11, %v1893_v53  ;;  %v2043_v35 = vld [vmem:[#allocation3 + $0x18] sm:$0xff] (%p1657_p11)  ;;  %v2044_v9 = vld [vmem:[#allocation3 + $0x20] sm:$0xff] (%p1657_p11) }
 0x351   : >> { %1792 = vst [vmem:[#allocation4 + $0x78] sm:$0xff] %v1776_v4  ;;  %1860 = vst [vmem:[#allocation5 + $0x78] sm:$0xff] %v1844_v2  ;;  %3690 = vmatpush3.bf16.msra.mxu0 (%p1657_p11), %v3687_v32  ;;  %v3719_v5 = vpack.c.bf16 (%p1657_p11), %v2041_v30, %v2040_v36  ;;  %v3723_v43 = vpack.c.bf16 (%p1657_p11), %v2043_v35, %v2042_v13  ;;  %v2045_v17 = vld [vmem:[#allocation3 + $0x28] sm:$0xff] (%p1657_p11)  ;;  %v2046_v34 = vld [vmem:[#allocation3 + $0x30] sm:$0xff] (%p1657_p11) }
 0x352   : >> { %1861 = vst [vmem:[%s1661_s12] sm:$0x1] %v5129_v55  ;;  %1862 = vst [vmem:[%s1663_s13] sm:$0x1] %v5131_v25  ;;  %3692 = vmatprep.subr.bf16.mxu0 (%p1657_p11), %v3691_v23  ;;  %v3695_v55 = vpack.c.bf16 (%p1657_p11), %v1884_v24, %v1883_v33  ;;  %v3727_v44 = vpack.c.bf16 (%p1657_p11), %v2045_v17, %v2044_v9  ;;  %v2047_v12 = vld [vmem:[#allocation3 + $0x38] sm:$0xff] (%p1657_p11)  ;;  %v2048_v28 = vld [vmem:[#allocation3 + $0x40] sm:$0xff] (%p1657_p11)  ;;  %s3999_s12 = smov (%p1657_p11), [#allocation9]  }
 0x353   : > { %v3731_v62 = vpack.c.bf16 (%p1657_p11), %v2047_v12, %v2046_v34  ;;  %v2049_v54 = vld [vmem:[#allocation3 + $0x48] sm:$0xff] (%p1657_p11)  ;;  %v2050_v4 = vld [vmem:[#allocation3 + $0x50] sm:$0xff] (%p1657_p11)  ;;  %v2051_v2 = vld [vmem:[#allocation3 + $0x58] sm:$0xff] (%p1657_p11)  ;;  %s3896_s13 = sshll.u32 (%p1657_p11), %s3999_s12, 4  ;;  %s3897_s13 = int_to_ptr.vmem [resolvable:$false] %s3896_s13 }
 0x354   : > { %v3735_v41 = vpack.c.bf16 %v2049_v54, %v2048_v28  ;;  %v3739_v45 = vpack.c.bf16 %v2051_v2, %v2050_v4  ;;  %v2052_v32 = vld [vmem:[#allocation3 + $0x60] sm:$0xff]  ;;  %v2053_v22 = vld [vmem:[#allocation3 + $0x68] sm:$0xff]  ;;  %v2055_v6 = vld [vmem:[#allocation3 + $0x78] sm:$0xff]  ;;  %s3898_s0 = scalar_lea.vmem %s3897_s13, 32  ;;  %p3899_p1 = scmp.lt.s32.totalorder %s2955_s26, %s3897_s13 }
 0x355   : > { %3694 = vmatpush3.bf16.msra.mxu0 %v3691_v23  ;;  %v3743_v24 = vpack.c.bf16 %v2053_v22, %v2052_v32  ;;  %p3900_p2 = scmp.lt.s32.totalorder %s3898_s0, %s3892_s11 }
 0x356   : > { %3696 = vmatprep.subr.bf16.mxu0 %v3695_v55 }
 0x357   : > { %p3901_p3 = por %p3900_p2, %p3899_p1 }
 0x359   : > { %v5199_v25 = vld [vmem:[#allocation5] sm:$0xff]  ;;  %3698 = vmatpush3.bf16.msra.mxu0 %v3695_v55  ;;  %v5202_v37 = vld [vmem:[#allocation5 + $0x8] sm:$0xff]  ;;  %v5204_v31 = vld [vmem:[#allocation5 + $0x10] sm:$0xff]  ;;  %p3902_p4 = pnand %p3901_p3, %p3895_p0 }
 0x35a   : > { %3439 = vmatprep.mubr.f32.mxu0 %v5199_v25  ;;  %3700 = vmatprep.subr.bf16.mxu0 %v3699_v51  ;;  %v1866_v10 = vld [vmem:[#allocation5 + $0x18] sm:$0xff]  ;;  %v1867_v26 = vld [vmem:[#allocation5 + $0x20] sm:$0xff]  ;;  %v1868_v58 = vld [vmem:[#allocation5 + $0x28] sm:$0xff] }
 0x35b   : > { %v1869_v49 = vld [vmem:[#allocation5 + $0x30] sm:$0xff]  ;;  %v1870_v50 = vld [vmem:[#allocation5 + $0x38] sm:$0xff]  ;;  %v1871_v47 = vld [vmem:[#allocation5 + $0x40] sm:$0xff] }
 0x35c   : > { %v1872_v0 = vld [vmem:[#allocation5 + $0x48] sm:$0xff]  ;;  %v1873_v42 = vld [vmem:[#allocation5 + $0x50] sm:$0xff]  ;;  %v1874_v23 = vld [vmem:[#allocation5 + $0x58] sm:$0xff] }
 0x35d   : > { %3702 = vmatpush3.bf16.msra.mxu0 %v3699_v51  ;;  %v1875_v33 = vld [vmem:[#allocation5 + $0x60] sm:$0xff]  ;;  %v2054_v55 = vld [vmem:[#allocation3 + $0x70] sm:$0xff]  ;;  %v1876_v3 = vld [vmem:[#allocation5 + $0x68] sm:$0xff] }
 0x35e   : > { %3704 = vmatprep.subr.bf16.mxu0 %v3703_v52  ;;  %v1877_v51 = vld [vmem:[#allocation5 + $0x70] sm:$0xff]  ;;  %v3747_v56 = vpack.c.bf16 %v2055_v6, %v2054_v55  ;;  %v1878_v7 = vld [vmem:[#allocation5 + $0x78] sm:$0xff]  ;;  %v5658_v6 = vld [vmem:[#allocation25_spill] sm:$0xff] }
 0x361   : > { %3706 = vmatpush3.bf16.msra.mxu0 %v3703_v52 }
 0x362   : > { %3708 = vmatprep.subr.bf16.mxu0 %v3707_v57 }
 0x365   : > { %3710 = vmatpush3.bf16.msra.mxu0 %v3707_v57 }
 0x366   : > { %3712 = vmatprep.subr.bf16.mxu0 %v3711_v16 }
 0x369   : > { %3714 = vmatpush3.bf16.msra.mxu0 %v3711_v16 }
 0x36a   : > { %3716 = vmatprep.subr.bf16.mxu0 %v3715_v59 }
 0x36d   : > { %3718 = vmatpush3.bf16.msra.mxu0 %v3715_v59 }
 0x36e   : > { %3720 = vmatprep.subr.bf16.mxu0 %v3719_v5 }
 0x370   : > { %3440 = vmatmul.mubr.f32.vlgmr.msra.gmra.mrb[16].mxu0 %v5202_v37 }
 0x371   : > { %3722 = vmatpush3.bf16.msra.mxu0 %v3719_v5  ;;  %3442 = vmatprep.mubr.f32.mxu0 %v5204_v31 }
 0x372   : > { %3724 = vmatprep.subr.bf16.mxu0 %v3723_v43 }
 0x374   : > { %3443 = vmatmul.mubr.f32.gmra.mrb[18].mxu0 %v1866_v10 }
 0x375   : > { %3726 = vmatpush3.bf16.msra.mxu0 %v3723_v43  ;;  %3445 = vmatprep.mubr.f32.mxu0 %v1867_v26 }
 0x376   : > { %3728 = vmatprep.subr.bf16.mxu0 %v3727_v44 }
 0x378   : > { %3446 = vmatmul.mubr.f32.gmra.mrb[20].mxu0 %v1868_v58 }
 0x379   : > { %3730 = vmatpush3.bf16.msra.mxu0 %v3727_v44  ;;  %3448 = vmatprep.mubr.f32.mxu0 %v1869_v49 }
 0x37a   : > { %3732 = vmatprep.subr.bf16.mxu0 %v3731_v62 }
 0x37c   : > { %3449 = vmatmul.mubr.f32.gmra.mrb[22].mxu0 %v1870_v50 }
 0x37d   : > { %3734 = vmatpush3.bf16.msra.mxu0 %v3731_v62  ;;  %3451 = vmatprep.mubr.f32.mxu0 %v1871_v47 }
 0x37e   : > { %3736 = vmatprep.subr.bf16.mxu0 %v3735_v41 }
 0x380   : > { %3452 = vmatmul.mubr.f32.gmra.mrb[24].mxu0 %v1872_v0 }
 0x381   : > { %3738 = vmatpush3.bf16.msra.mxu0 %v3735_v41  ;;  %3454 = vmatprep.mubr.f32.mxu0 %v1873_v42 }
 0x382   : > { %3740 = vmatprep.subr.bf16.mxu0 %v3739_v45 }
 0x384   : > { %3455 = vmatmul.mubr.f32.gmra.mrb[26].mxu0 %v1874_v23 }
 0x385   : > { %3742 = vmatpush3.bf16.msra.mxu0 %v3739_v45  ;;  %3457 = vmatprep.mubr.f32.mxu0 %v1875_v33 }
 0x386   : > { %3744 = vmatprep.subr.bf16.mxu0 %v3743_v24 }
 0x388   : > { %3458 = vmatmul.mubr.f32.gmra.mrb[28].mxu0 %v1876_v3 }
 0x389   : > { %3746 = vmatpush3.bf16.msra.mxu0 %v3743_v24  ;;  %3460 = vmatprep.mubr.f32.mxu0 %v1877_v51 }
 0x38a   : > { %3748 = vmatprep.subr.bf16.mxu0 %v3747_v56 }
 0x38c   : > { %3461 = vmatmul.mubr.f32.gmra.mrb[30].mxu0 %v1878_v7 }
 0x38d   : > { %3750 = vmatpush3.bf16.msra.mxu0 %v3747_v56  ;;  %3495 = vmatprep.mubr.f32.mxu0 %v5199_v25 }
 0x390   : > { %3496 = vmatmul.mubr.f32.vlgmr.msra.gmra.mrb[32].mxu0 %v5202_v37 }
 0x391   : > { %3498 = vmatprep.mubr.f32.mxu0 %v5204_v31 }
 0x394   : > { %3499 = vmatmul.mubr.f32.gmra.mrb[34].mxu0 %v1866_v10 }
 0x395   : > { %3501 = vmatprep.mubr.f32.mxu0 %v1867_v26 }
 0x398   : > { %3502 = vmatmul.mubr.f32.gmra.mrb[36].mxu0 %v1868_v58 }
 0x399   : > { %3504 = vmatprep.mubr.f32.mxu0 %v1869_v49 }
 0x39c   : > { %3505 = vmatmul.mubr.f32.gmra.mrb[38].mxu0 %v1870_v50 }
 0x39d   : > { %3507 = vmatprep.mubr.f32.mxu0 %v1871_v47 }
 0x3a0   : > { %3508 = vmatmul.mubr.f32.gmra.mrb[40].mxu0 %v1872_v0 }
 0x3a1   : > { %3510 = vmatprep.mubr.f32.mxu0 %v1873_v42 }
 0x3a4   : > { %3511 = vmatmul.mubr.f32.gmra.mrb[42].mxu0 %v1874_v23 }
 0x3a5   : > { %3513 = vmatprep.mubr.f32.mxu0 %v1875_v33 }
 0x3a8   : > { %3514 = vmatmul.mubr.f32.gmra.mrb[44].mxu0 %v1876_v3 }
 0x3a9   : > { %3516 = vmatprep.mubr.f32.mxu0 %v1877_v51 }
 0x3ac   : > { %3517 = vmatmul.mubr.f32.gmra.mrb[46].mxu0 %v1878_v7  ;;  %v5659_v7 = vld [vmem:[#allocation26_spill] sm:$0xff] }
 0x3ad   : > { %3607 = vmatprep.mubr.f32.mxu0 %v5655_v46 }
 0x443   : > { %v3441_v25 = vpop.f32.mrb[16].mxu0 }
 0x444   : > { %v1961_v52 = vpop.f32.mrb[17].mxu0  ;;  %2668 = vst [vmem:[#allocation2 + $0x8] sm:$0xff] %v3441_v25 }
 0x445   : > { %v3751_v29 = vpack.c.bf16 %v3441_v25, %v1961_v52  ;;  %2667 = vst [vmem:[#allocation2] sm:$0xff] %v1961_v52 }
 0x447   : > { %v3444_v38 = vpop.f32.mrb[18].mxu0  ;;  %3752 = vmatprep.subr.bf16.mxu1 %v3751_v29 }
 0x448   : > { %v1971_v57 = vpop.f32.mrb[19].mxu0  ;;  %3754 = vmatpush3.bf16.msra.mxu1 %v3751_v29  ;;  %2670 = vst [vmem:[#allocation2 + $0x18] sm:$0xff] %v3444_v38 }
 0x449   : > { %v3755_v27 = vpack.c.bf16 %v3444_v38, %v1971_v57  ;;  %2669 = vst [vmem:[#allocation2 + $0x10] sm:$0xff] %v1971_v57 }
 0x44b   : > { %v3447_v39 = vpop.f32.mrb[20].mxu0  ;;  %3756 = vmatprep.subr.bf16.mxu1 %v3755_v27 }
 0x44c   : > { %v1981_v16 = vpop.f32.mrb[21].mxu0  ;;  %3758 = vmatpush3.bf16.msra.mxu1 %v3755_v27  ;;  %2672 = vst [vmem:[#allocation2 + $0x28] sm:$0xff] %v3447_v39 }
 0x44d   : > { %v3759_v53 = vpack.c.bf16 %v3447_v39, %v1981_v16  ;;  %2671 = vst [vmem:[#allocation2 + $0x20] sm:$0xff] %v1981_v16 }
 0x44f   : > { %v3450_v11 = vpop.f32.mrb[22].mxu0  ;;  %3760 = vmatprep.subr.bf16.mxu1 %v3759_v53 }
 0x450   : > { %v1991_v59 = vpop.f32.mrb[23].mxu0  ;;  %3762 = vmatpush3.bf16.msra.mxu1 %v3759_v53  ;;  %2674 = vst [vmem:[#allocation2 + $0x38] sm:$0xff] %v3450_v11  ;;  %v5662_v53 = vld [vmem:[#allocation27_spill] sm:$0xff] }
 0x451   : > { %v3763_v36 = vpack.c.bf16 %v3450_v11, %v1991_v59  ;;  %2673 = vst [vmem:[#allocation2 + $0x30] sm:$0xff] %v1991_v59 }
 0x453   : > { %v3453_v30 = vpop.f32.mrb[24].mxu0  ;;  %3764 = vmatprep.subr.bf16.mxu1 %v3763_v36 }
 0x454   : > { %v2001_v5 = vpop.f32.mrb[25].mxu0  ;;  %3766 = vmatpush3.bf16.msra.mxu1 %v3763_v36  ;;  %2676 = vst [vmem:[#allocation2 + $0x48] sm:$0xff] %v3453_v30 }
 0x455   : > { %v3767_v13 = vpack.c.bf16 %v3453_v30, %v2001_v5  ;;  %2675 = vst [vmem:[#allocation2 + $0x40] sm:$0xff] %v2001_v5  ;;  %v5663_v30 = vld [vmem:[#allocation28_spill] sm:$0xff] }
 0x457   : > { %v3456_v35 = vpop.f32.mrb[26].mxu0  ;;  %3768 = vmatprep.subr.bf16.mxu1 %v3767_v13 }
 0x458   : > { %v2011_v37 = vpop.f32.mrb[27].mxu0  ;;  %3770 = vmatpush3.bf16.msra.mxu1 %v3767_v13  ;;  %2678 = vst [vmem:[#allocation2 + $0x58] sm:$0xff] %v3456_v35 }
 0x459   : > { %v3771_v31 = vpack.c.bf16 %v3456_v35, %v2011_v37  ;;  %2677 = vst [vmem:[#allocation2 + $0x50] sm:$0xff] %v2011_v37  ;;  %v2809_v37 = vld [vmem:[%s4779_s29 + $0x48] sm:$0xff] }
 0x45b   : > { %v3459_v43 = vpop.f32.mrb[28].mxu0  ;;  %3772 = vmatprep.subr.bf16.mxu1 %v3771_v31 }
 0x45c   : > { %v2021_v9 = vpop.f32.mrb[29].mxu0  ;;  %3774 = vmatpush3.bf16.msra.mxu1 %v3771_v31  ;;  %2680 = vst [vmem:[#allocation2 + $0x68] sm:$0xff] %v3459_v43 }
 0x45d   : > { %v3775_v17 = vpack.c.bf16 %v3459_v43, %v2021_v9  ;;  %2679 = vst [vmem:[#allocation2 + $0x60] sm:$0xff] %v2021_v9  ;;  %v2811_v43 = vld [vmem:[%s4779_s29 + $0x58] sm:$0xff] }
 0x45f   : > { %v3462_v10 = vpop.f32.mrb[30].mxu0  ;;  %3776 = vmatprep.subr.bf16.mxu1 %v3775_v17 }
 0x460   : > { %v2031_v26 = vpop.f32.mrb[31].mxu0  ;;  %3778 = vmatpush3.bf16.msra.mxu1 %v3775_v17  ;;  %2682 = vst [vmem:[#allocation2 + $0x78] sm:$0xff] %v3462_v10 }
 0x461   : > { %v3779_v44 = vpack.c.bf16 %v3462_v10, %v2031_v26  ;;  %2681 = vst [vmem:[#allocation2 + $0x70] sm:$0xff] %v2031_v26  ;;  %v5666_v10 = vld [vmem:[#allocation29_spill] sm:$0xff] }
 0x463   : > { %v5212_v34 = vpop.f32.mrb[32].mxu0  ;;  %3780 = vmatprep.subr.bf16.mxu1 %v3779_v44 }
 0x464   : > { %v5214_v12 = vpop.f32.mrb[33].mxu0  ;;  %3782 = vmatpush3.bf16.msra.mxu1 %v3779_v44  ;;  %2684 = vst [vmem:[#allocation3 + $0x8] sm:$0xff] %v5212_v34  ;;  %v2716_v58 = vsel %vm1395_vm3, %v5212_v34, 0.0 }
 0x465   : > { %v3783_v49 = vpack.c.bf16 %v5212_v34, %v5214_v12  ;;  %2683 = vst [vmem:[#allocation3] sm:$0xff] %v5214_v12  ;;  %2733 = vadd.xlane.f32.xlu0 %v2716_v58  ;;  %v2764_v62 = vmul.f32 %v2716_v58, %v4840_v8  ;;  %v2715_v28 = vsel %vm1394_vm2, %v5214_v12, 0.0 }
 0x466   : > { %v2763_v54 = vmul.f32 %v2715_v28, %v4847_v48 }
 0x467   : > { %v5230_v50 = vpop.f32.mrb[34].mxu0  ;;  %3552 = vmatmul.mubr.f32.vlgmr.msra.gmra.mrb[16].mxu1 %v5655_v46  ;;  %3784 = vmatprep.subr.bf16.mxu0 %v3783_v49 }
 0x468   : > { %3815 = vmatprep.subr.bf16.mxu1 %v3783_v49  ;;  %v5233_v15 = vpop.f32.mrb[35].mxu0  ;;  %3786 = vmatpush3.bf16.msra.mxu0 %v3783_v49  ;;  %2686 = vst [vmem:[#allocation3 + $0x18] sm:$0xff] %v5230_v50  ;;  %v2779_v47 = vadd.f32 %v2764_v62, %v2763_v54  ;;  %v2718_v60 = vsel %vm1397_vm5, %v5230_v50, 0.0 }
 0x469   : > { %v3787_v8 = vpack.c.bf16 %v5230_v50, %v5233_v15  ;;  %3823 = vmatpush3.bf16.msra.mxu1 %v3783_v49  ;;  %3554 = vmatprep.mubr.f32.mxu1 %v5655_v46  ;;  %2685 = vst [vmem:[#allocation3 + $0x10] sm:$0xff] %v5233_v15  ;;  %v2717_v48 = vsel %vm1396_vm4, %v5233_v15, 0.0  ;;  %v2766_v2 = vmul.f32 %v2718_v60, %v4870_v61  ;;  %v5667_v49 = vld [vmem:[#allocation30_spill] sm:$0xff] }
 0x46a   : > { %2731 = vadd.xlane.f32.xlu0 %v2715_v28  ;;  %2737 = vadd.xlane.f32.xlu1 %v2718_v60  ;;  %v2765_v41 = vmul.f32 %v2717_v48, %v4877_v20 }
 0x46b   : > { %v5249_v4 = vpop.f32.mrb[36].mxu0  ;;  %3555 = vmatmul.mubr.f32.gmra.mrb[18].mxu1 %v5655_v46  ;;  %3788 = vmatprep.subr.bf16.mxu0 %v3787_v8 }
 0x46c   : > { %3816 = vmatprep.subr.bf16.mxu1 %v3787_v8  ;;  %v5252_v18 = vpop.f32.mrb[37].mxu0  ;;  %3790 = vmatpush3.bf16.msra.mxu0 %v3787_v8  ;;  %2688 = vst [vmem:[#allocation3 + $0x28] sm:$0xff] %v5249_v4  ;;  %v2780_v0 = vadd.f32 %v2779_v47, %v2765_v41  ;;  %v2720_v20 = vsel %vm1399_vm7, %v5249_v4, 0.0 }
 0x46d   : > { %v3791_v19 = vpack.c.bf16 %v5249_v4, %v5252_v18  ;;  %3824 = vmatpush3.bf16.msra.mxu1 %v3787_v8  ;;  %3557 = vmatprep.mubr.f32.mxu1 %v5655_v46  ;;  %2687 = vst [vmem:[#allocation3 + $0x20] sm:$0xff] %v5252_v18  ;;  %v5268_v42 = vsel %vm1398_vm6, %v5252_v18, 0.0  ;;  %v2768_v21 = vmul.f32 %v2720_v20, %v4899_v1 }
 0x46e   : > { %2735 = vadd.xlane.f32.xlu1 %v2717_v48  ;;  %v2781_v61 = vadd.f32 %v2780_v0, %v2766_v2  ;;  %v2767_v45 = vmul.f32 %v5268_v42, %v4897_v14  ;;  %v5670_v2 = vld [vmem:[#allocation31_spill] sm:$0xff] }
 0x46f   : > { %v5272_v32 = vpop.f32.mrb[38].mxu0  ;;  %3558 = vmatmul.mubr.f32.gmra.mrb[20].mxu1 %v5655_v46  ;;  %3792 = vmatprep.subr.bf16.mxu0 %v3791_v19 }
 0x470   : > { %3817 = vmatprep.subr.bf16.mxu1 %v3791_v19  ;;  %v5275_v22 = vpop.f32.mrb[39].mxu0  ;;  %3794 = vmatpush3.bf16.msra.mxu0 %v3791_v19  ;;  %2690 = vst [vmem:[#allocation3 + $0x38] sm:$0xff] %v5272_v32  ;;  %v2782_v63 = vadd.f32 %v2781_v61, %v2767_v45  ;;  %v2722_v33 = vsel %vm1401_vm9, %v5272_v32, 0.0  ;;  %v5671_v61 = vld [vmem:[#allocation32_spill] sm:$0xff] }
 0x471   : > { %v3795_v23 = vpack.c.bf16 %v5272_v32, %v5275_v22  ;;  %3825 = vmatpush3.bf16.msra.mxu1 %v3791_v19  ;;  %3560 = vmatprep.mubr.f32.mxu1 %v5655_v46  ;;  %2689 = vst [vmem:[#allocation3 + $0x30] sm:$0xff] %v5275_v22  ;;  %v5291_v55 = vsel %vm1400_vm8, %v5275_v22, 0.0  ;;  %v2770_v25 = vmul.f32 %v2722_v33, %v5659_v7  ;;  %v5677_v7 = vld [vmem:[#allocation34_spill] sm:$0xff] }
 0x472   : > { %2741 = vadd.xlane.f32.xlu1 %v2720_v20  ;;  %v2783_v1 = vadd.f32 %v2782_v63, %v2768_v21  ;;  %v2769_v3 = vmul.f32 %v5291_v55, %v5658_v6 }
 0x473   : > { %v5295_v51 = vpop.f32.mrb[40].mxu0  ;;  %3561 = vmatmul.mubr.f32.gmra.mrb[22].mxu1 %v5655_v46  ;;  %3796 = vmatprep.subr.bf16.mxu0 %v3795_v23 }
 0x474   : > { %3818 = vmatprep.subr.bf16.mxu1 %v3795_v23  ;;  %v5298_v56 = vpop.f32.mrb[41].mxu0  ;;  %3798 = vmatpush3.bf16.msra.mxu0 %v3795_v23  ;;  %2692 = vst [vmem:[#allocation3 + $0x48] sm:$0xff] %v5295_v51  ;;  %v2784_v52 = vadd.f32 %v2783_v1, %v2769_v3  ;;  %v2724_v57 = vsel %vm1403_vm11, %v5295_v51, 0.0  ;;  %v5676_v1 = vld [vmem:[#allocation33_spill] sm:$0xff] }
 0x475   : > { %v3799_v29 = vpack.c.bf16 %v5295_v51, %v5298_v56  ;;  %3826 = vmatpush3.bf16.msra.mxu1 %v3795_v23  ;;  %3563 = vmatprep.mubr.f32.mxu1 %v5655_v46  ;;  %2691 = vst [vmem:[#allocation3 + $0x40] sm:$0xff] %v5298_v56  ;;  %v5314_v39 = vsel %vm1402_vm10, %v5298_v56, 0.0  ;;  %v2772_v5 = vmul.f32 %v2724_v57, %v5663_v30  ;;  %v5672_v23 = vld [vmem:[#allocation21_spill] sm:$0xff] }
 0x476   : > { %2745 = vadd.xlane.f32.xlu1 %v2722_v33  ;;  %v2785_v16 = vadd.f32 %v2784_v52, %v2770_v25  ;;  %v2771_v11 = vmul.f32 %v5314_v39, %v5662_v53  ;;  %vm5673_vm2 = vcmp.eq.s32.totalorder %v5672_v23, %v4593_v40  ;;  %v5674_v33 = vld [vmem:[#allocation22_spill] sm:$0xff]  ;;  %v2804_v30 = vld [vmem:[%s4779_s29 + $0x20] sm:$0xff] }
 0x477   : > { %v5318_v59 = vpop.f32.mrb[42].mxu0  ;;  %3564 = vmatmul.mubr.f32.gmra.mrb[24].mxu1 %v5655_v46  ;;  %3800 = vmatprep.subr.bf16.mxu0 %v3799_v29  ;;  %vm5675_vm3 = vcmp.eq.s32.totalorder %v5674_v33, %v4593_v40  ;;  %v2802_v53 = vld [vmem:[%s4779_s29 + $0x10] sm:$0xff] }
 0x478   : > { %3819 = vmatprep.subr.bf16.mxu1 %v3799_v29  ;;  %v5321_v36 = vpop.f32.mrb[43].mxu0  ;;  %3802 = vmatpush3.bf16.msra.mxu0 %v3799_v29  ;;  %2694 = vst [vmem:[#allocation3 + $0x58] sm:$0xff] %v5318_v59  ;;  %v2786_v13 = vadd.f32 %v2785_v16, %v2771_v11  ;;  %v2726_v31 = vsel %vm1405_vm13, %v5318_v59, 0.0  ;;  %v2801_v16 = vld [vmem:[%s4779_s29 + $0x8] sm:$0xff]  ;;  %v2803_v11 = vld [vmem:[%s4779_s29 + $0x18] sm:$0xff] }
 0x479   : > { %v3803_v35 = vpack.c.bf16 %v5318_v59, %v5321_v36  ;;  %3827 = vmatpush3.bf16.msra.mxu1 %v3799_v29  ;;  %3566 = vmatprep.mubr.f32.mxu1 %v5655_v46  ;;  %2693 = vst [vmem:[#allocation3 + $0x50] sm:$0xff] %v5321_v36  ;;  %v5337_v9 = vsel %vm1404_vm12, %v5321_v36, 0.0  ;;  %v2774_v62 = vmul.f32 %v2726_v31, %v5667_v49 }
 0x47a   : > { %2749 = vadd.xlane.f32.xlu1 %v2724_v57  ;;  %v2787_v17 = vadd.f32 %v2786_v13, %v2772_v5  ;;  %v2773_v26 = vmul.f32 %v5337_v9, %v5666_v10  ;;  %v2805_v5 = vld [vmem:[%s4779_s29 + $0x28] sm:$0xff]  ;;  %v2806_v13 = vld [vmem:[%s4779_s29 + $0x30] sm:$0xff] }
 0x47b   : > { %v5341_v44 = vpop.f32.mrb[44].mxu0  ;;  %3567 = vmatmul.mubr.f32.gmra.mrb[26].mxu1 %v5655_v46  ;;  %3804 = vmatprep.subr.bf16.mxu0 %v3803_v35  ;;  %v2814_v10 = vld [vmem:[%s4779_s29 + $0x70] sm:$0xff] }
 0x47c   : > { %3820 = vmatprep.subr.bf16.mxu1 %v3803_v35  ;;  %v5344_v58 = vpop.f32.mrb[45].mxu0  ;;  %3806 = vmatpush3.bf16.msra.mxu0 %v3803_v35  ;;  %2696 = vst [vmem:[#allocation3 + $0x68] sm:$0xff] %v5341_v44  ;;  %v2788_v28 = vadd.f32 %v2787_v17, %v2773_v26  ;;  %v2728_v60 = vsel %vm1407_vm15, %v5341_v44, 0.0  ;;  %v2813_v17 = vld [vmem:[%s4779_s29 + $0x68] sm:$0xff]  ;;  %v2815_v26 = vld [vmem:[%s4779_s29 + $0x78] sm:$0xff] }
 0x47d   : > { %v3807_v54 = vpack.c.bf16 %v5341_v44, %v5344_v58  ;;  %3828 = vmatpush3.bf16.msra.mxu1 %v3803_v35  ;;  %3569 = vmatprep.mubr.f32.mxu1 %v5655_v46  ;;  %2695 = vst [vmem:[#allocation3 + $0x60] sm:$0xff] %v5344_v58  ;;  %v2727_v48 = vsel %vm1406_vm14, %v5344_v58, 0.0  ;;  %v2776_v45 = vmul.f32 %v2728_v60, %v5671_v61  ;;  %v2808_v35 = vld [vmem:[%s4779_s29 + $0x40] sm:$0xff] }
 0x47e   : > { %2753 = vadd.xlane.f32.xlu1 %v2726_v31  ;;  %v2789_v41 = vadd.f32 %v2788_v28, %v2774_v62  ;;  %v2775_v0 = vmul.f32 %v2727_v48, %v5670_v2  ;;  %v2810_v31 = vld [vmem:[%s4779_s29 + $0x50] sm:$0xff] }
 0x47f   : > { %v5361_v19 = vpop.f32.mrb[46].mxu0  ;;  %3570 = vmatmul.mubr.f32.gmra.mrb[28].mxu1 %v5655_v46  ;;  %3808 = vmatprep.subr.bf16.mxu0 %v3807_v54 }
 0x480   : > { %3821 = vmatprep.subr.bf16.mxu1 %v3807_v54  ;;  %v5364_v20 = vpop.f32.mrb[47].mxu0  ;;  %3810 = vmatpush3.bf16.msra.mxu0 %v3807_v54  ;;  %2698 = vst [vmem:[#allocation3 + $0x78] sm:$0xff] %v5361_v19  ;;  %v2790_v21 = vadd.f32 %v2789_v41, %v2775_v0  ;;  %v2730_v24 = vsel %vm5675_vm3, %v5361_v19, 0.0 }
 0x481   : > { %v3811_v63 = vpack.c.bf16 %v5361_v19, %v5364_v20  ;;  %3829 = vmatpush3.bf16.msra.mxu1 %v3807_v54  ;;  %3572 = vmatprep.mubr.f32.mxu1 %v5655_v46  ;;  %2697 = vst [vmem:[#allocation3 + $0x70] sm:$0xff] %v5364_v20  ;;  %v2729_v14 = vsel %vm5673_vm2, %v5364_v20, 0.0  ;;  %v2778_v25 = vmul.f32 %v2730_v24, %v5677_v7 }
 0x482   : > { %v2777_v6 = vmul.f32 %v2729_v14, %v5676_v1  ;;  %2759 = vadd.xlane.f32.xlu0 %v2729_v14  ;;  %2757 = vadd.xlane.f32.xlu1 %v2728_v60  ;;  %v2791_v3 = vadd.f32 %v2790_v21, %v2776_v45 }
 0x483   : > { %3573 = vmatmul.mubr.f32.gmra.mrb[30].mxu1 %v5655_v46  ;;  %3812 = vmatprep.subr.bf16.mxu0 %v3811_v63 }
 0x484   : > { %3822 = vmatprep.subr.bf16.mxu1 %v3811_v63  ;;  %3814 = vmatpush3.bf16.msra.mxu0 %v3811_v63  ;;  %v2792_v52 = vadd.f32 %v2791_v3, %v2777_v6 }
 0x485   : > { %3830 = vmatpush3.bf16.msra.mxu1 %v3811_v63  ;;  %3628 = vmatprep.mubr.f32.mxu1 %v5655_v46 }
 0x486   : > { %2739 = vadd.xlane.f32.xlu0 %v5268_v42  ;;  %2761 = vadd.xlane.f32.xlu1 %v2730_v24  ;;  %v2793_v40 = vadd.f32 %v2792_v52, %v2778_v25 }
 0x487   : > { %3608 = vmatmul.mubr.f32.vlgmr.msra.gmra.mrb[48].mxu0 %v5655_v46 }
 0x488   : > { %3629 = vmatmul.mubr.f32.vlgmr.msra.gmra.mrb[32].mxu1 %v5655_v46  ;;  %3610 = vmatprep.mubr.f32.mxu0 %v5655_v46  ;;  %v2794_v29 = vrot.slane %v2793_v40, 4 }
 0x48a   : > { %2743 = vadd.xlane.f32.xlu0 %v5291_v55  ;;  %v2795_v38 = vadd.f32 %v2794_v29, %v2793_v40 }
 0x48b   : > { %3611 = vmatmul.mubr.f32.gmra.mrb[50].mxu0 %v5655_v46 }
 0x48c   : > { %3613 = vmatprep.mubr.f32.mxu0 %v5655_v46  ;;  %v2796_v57 = vrot.slane %v2795_v38, 2 }
 0x48e   : > { %2747 = vadd.xlane.f32.xlu0 %v5314_v39  ;;  %v2797_v42 = vadd.f32 %v2796_v57, %v2795_v38  ;;  %v2800_v39 = vld [vmem:[%s4779_s29] sm:$0xff] }
 0x48f   : > { %3614 = vmatmul.mubr.f32.gmra.mrb[52].mxu0 %v5655_v46 }
 0x490   : > { %3616 = vmatprep.mubr.f32.mxu0 %v5655_v46  ;;  %v2798_v27 = vrot.slane %v2797_v42, 1 }
 0x492   : > { %2751 = vadd.xlane.f32.xlu0 %v5337_v9  ;;  %v2799_v55 = vadd.f32 %v2798_v27, %v2797_v42  ;;  %v2812_v9 = vld [vmem:[%s4779_s29 + $0x60] sm:$0xff] }
 0x493   : > { %3617 = vmatmul.mubr.f32.gmra.mrb[54].mxu0 %v5655_v46 }
 0x494   : > { %3619 = vmatprep.mubr.f32.mxu0 %v5655_v46  ;;  %2919 = vst [vmem:[%s390_s30] sm:$0x1] %v2799_v55 }
 0x496   : > { %2755 = vadd.xlane.f32.xlu0 %v2727_v48 }
 0x497   : > { %3620 = vmatmul.mubr.f32.gmra.mrb[56].mxu0 %v5655_v46 }
 0x498   : > { %3622 = vmatprep.mubr.f32.mxu0 %v5655_v46 }
 0x49b   : > { %3623 = vmatmul.mubr.f32.gmra.mrb[58].mxu0 %v5655_v46 }
 0x49c   : > { %3625 = vmatprep.mubr.f32.mxu0 %v5655_v46 }
 0x49f   : > { %3626 = vmatmul.mubr.f32.gmra.mrb[60].mxu0 %v5655_v46  ;;  %v2807_v46 = vld [vmem:[%s4779_s29 + $0x38] sm:$0xff] }
 0x4c3   : > { %2816 = vxpose.xlu0.b32.start [1/16] %v2800_v39, 128 }
 0x4c7   : > { %2817 = vxpose.xlu0.b32.cont [2/16] %v2801_v16, 128 }
 0x4cb   : > { %2818 = vxpose.xlu0.b32.cont [3/16] %v2802_v53, 128 }
 0x4cf   : > { %2819 = vxpose.xlu0.b32.cont [4/16] %v2803_v11, 128 }
 0x4d3   : > { %2820 = vxpose.xlu0.b32.cont [5/16] %v2804_v30, 128 }
 0x4d7   : > { %2821 = vxpose.xlu0.b32.cont [6/16] %v2805_v5, 128 }
 0x4db   : > { %2822 = vxpose.xlu0.b32.cont [7/16] %v2806_v13, 128 }
 0x4df   : > { %2823 = vxpose.xlu0.b32.cont [8/16] %v2807_v46, 128 }
 0x4e3   : > { %2824 = vxpose.xlu0.b32.cont [9/16] %v2808_v35, 128 }
 0x4e7   : > { %2825 = vxpose.xlu0.b32.cont [10/16] %v2809_v37, 128 }
 0x4eb   : > { %2826 = vxpose.xlu0.b32.cont [11/16] %v2810_v31, 128 }
 0x4ef   : > { %2827 = vxpose.xlu0.b32.cont [12/16] %v2811_v43, 128 }
 0x4f2   : > { %v2734_v49 = vpop.xlane.xlu0 %2733 }
 0x4f3   : > { %2828 = vxpose.xlu0.b32.cont [13/16] %v2812_v9, 128 }
 0x4f7   : > { %2829 = vxpose.xlu0.b32.cont [14/16] %v2813_v17, 128 }
 0x4fb   : > { %2830 = vxpose.xlu0.b32.cont [15/16] %v2814_v10, 128 }
 0x4ff   : > { %2831 = vxpose.xlu0.b32.end [16/16] %v2815_v26, 128 }
 0x500   : > { %3905 = shalt.err (!%p3902_p4)
}
 0x501   : > { %s3906_s30 = scalar_lea.hbm %s5426_s21, 16  ;;  %s3910_s14 = scalar_lea.hbm %s5595_s10, 32 }
 0x502   : > { %p3907_p7 = scmp.ne.s32.totalorder %s5426_s21, %s3906_s30  ;;  %p3911_p10 = scmp.lt.u32.totalorder %s5426_s21, %s5595_s10 }
 0x503   : > { %p3912_p11 = scmp.lt.u32.totalorder %s3910_s14, %s3906_s30  ;;  %p3914_p13 = scmp.lt.u32.totalorder %s3906_s30, %s5426_s21 }
 0x504   : > { %p3908_p8 = pnand %p3907_p7, %p4099_p5 }
 0x505   : > { %p3913_p12 = por %p3912_p11, %p3911_p10 }
 0x506   : > { %p3909_p9 = pneg %p3908_p8 }
 0x507   : > { %p3915_p0 = por %p3914_p13, %p3913_p12 }
 0x509   : > { %p3916_p1 = pnand %p3915_p0, %p3909_p9 }
 0x50b   : > { %3919 = shalt.err (!%p3916_p1)
}
 0x50c   : > { %3832 = dma.vmem_to_hbm [thread:$0]  (%p4099_p5), %s2955_s26, 16, %s5426_s21, %s2926_s28   ;;  %v2732_v62 = vpop.xlane.xlu0 %2731  ;;  %v5678_v41 = vld [vmem:[#allocation23_spill] sm:$0xff]  ;;  %v5679_v61 = vmov 0   ;;  %v5680_v14 = vld [vmem:[#allocation24_spill] sm:$0xff]  ;;  %v2738_v24 = vpop.xlane.xlu1 %2737  ;;  %v2849_v29 = vsub.f32 %v2734_v49, %v5212_v34 }
 0x50d   : > { %vm2880_vm4 = vcmp.ne.f32.partialorder %v5678_v41, 0.0  ;;  %v2848_v6 = vsub.f32 %v2732_v62, %v5214_v12  ;;  %v2851_v5 = vsub.f32 %v2738_v24, %v5230_v50  ;;  %s3138_s0 = sshll.u32 %s4082_s8, 11  ;;  %s2938_s26 = sshll.u32 %s4779_s29, 4  ;;  %s5539_s26 = int_to_ptr.vmem [resolvable:$true] %s2938_s26 }
 0x50e   : > { %v2881_v45 = vsel %vm2880_vm4, 1, %v5679_v61  ;;  %s5537_s11 = scalar_lea.hbm %s5594_s9, %s3138_s0  ;;  %s2921_s8 = scalar_lea.sflag [#allocation8], %s4488_s19 }
 0x50f   : > { %v2885_v33 = vrot.slane %v2881_v45, %v5680_v14  ;;  %s3920_s30 = scalar_lea.vmem %s5539_s26, 2048  ;;  %s4000_s22 = smov [#allocation7]  }
 0x510   : > { %v5446_v28 = vpop.xlane.xlu0 %2759  ;;  %v2736_v38 = vpop.xlane.xlu1 %2735  ;;  %p3921_p2 = scmp.ne.s32.totalorder %s5539_s26, %s3920_s30  ;;  %s3924_s27 = sshll.u32 %s4000_s22, 4  ;;  %s3925_s27 = int_to_ptr.vmem [resolvable:$false] %s3924_s27 }
 0x511   : > { %v2862_v54 = vsub.f32 %v5446_v28, %v5364_v20  ;;  %vm5462_vm5 = vcmp.eq.s32.totalorder %v2885_v33, 1  ;;  %v2850_v39 = vsub.f32 %v2736_v38, %v5233_v15  ;;  %s3926_s14 = scalar_lea.vmem %s3925_s27, 4096  ;;  %p3927_p7 = scmp.lt.s32.totalorder %s5539_s26, %s3925_s27 }
 0x512   : > { %p3922_p3 = pnand %p3921_p2, %p4099_p5  ;;  %p3928_p8 = scmp.lt.s32.totalorder %s3926_s14, %s3920_s30 }
 0x514   : > { %v2740_v47 = vpop.xlane.xlu0 %2739  ;;  %v2742_v31 = vpop.xlane.xlu1 %2741  ;;  %p3923_p4 = pneg %p3922_p3  ;;  %p3929_p9 = por %p3928_p8, %p3927_p7 }
 0x515   : > { %v2852_v43 = vsub.f32 %v2740_v47, %v5252_v18  ;;  %v2853_v49 = vsub.f32 %v2742_v31, %v5249_v4 }
 0x516   : > { %p3930_p10 = pnand %p3929_p9, %p3923_p4 }
 0x518   : > { %v5450_v60 = vpop.xlane.xlu0 %2743  ;;  %v2746_v47 = vpop.xlane.xlu1 %2745 }
 0x51c   : > { %v5452_v8 = vpop.xlane.xlu0 %2747  ;;  %v2750_v38 = vpop.xlane.xlu1 %2749 }
 0x520   : > { %v5454_v48 = vpop.xlane.xlu0 %2751 }
 0x524   : > { %v5458_v23 = vpop.xlane.xlu0 %2755 }
 0x525   : > { %v2860_v31 = vsub.f32 %v5458_v23, %v5344_v58 }
 0x53a   : > { %v3553_v2 = vpop.f32.mrb[16].mxu1 }
 0x53b   : > { %v2363_v0 = vpop.f32.mrb[17].mxu1 }
 0x53e   : > { %v3556_v21 = vpop.f32.mrb[18].mxu1 }
 0x53f   : > { %v2373_v63 = vpop.f32.mrb[19].mxu1 }
 0x540   : > { %v2854_v63 = vsub.f32 %v5450_v60, %v5275_v22  ;;  %v2856_v22 = vsub.f32 %v5452_v8, %v5298_v56 }
 0x542   : > { %v3559_v1 = vpop.f32.mrb[20].mxu1 }
 0x543   : > { %v2383_v3 = vpop.f32.mrb[21].mxu1  ;;  %v2832_v25 = vpop.trf.xlu0 }
 0x544   : > { %v2864_v52 = vmul.f32 %v2848_v6, %v2832_v25  ;;  %v2855_v6 = vsub.f32 %v2746_v47, %v5272_v32 }
 0x546   : > { %v3562_v40 = vpop.f32.mrb[22].mxu1  ;;  %v2887_v57 = vsel %vm5462_vm5, 0.0, %v2864_v52 }
 0x547   : > { %v2393_v42 = vpop.f32.mrb[23].mxu1  ;;  %2903 = vst [vmem:[%s4779_s29] sm:$0xff] %v2887_v57  ;;  %v2833_v27 = vpop.trf.xlu0 }
 0x548   : > { %v2865_v12 = vmul.f32 %v2849_v29, %v2833_v27 }
 0x54a   : > { %v3565_v55 = vpop.f32.mrb[24].mxu1  ;;  %v2888_v16 = vsel %vm5462_vm5, 0.0, %v2865_v12  ;;  %v2857_v12 = vsub.f32 %v2750_v38, %v5295_v51 }
 0x54b   : > { %v2403_v53 = vpop.f32.mrb[25].mxu1  ;;  %2904 = vst [vmem:[%s4779_s29 + $0x8] sm:$0xff] %v2888_v16  ;;  %v2834_v11 = vpop.trf.xlu0 }
 0x54c   : > { %v2866_v34 = vmul.f32 %v2850_v39, %v2834_v11  ;;  %v2858_v53 = vsub.f32 %v5454_v48, %v5321_v36 }
 0x54e   : > { %v3568_v30 = vpop.f32.mrb[26].mxu1  ;;  %v2889_v13 = vsel %vm5462_vm5, 0.0, %v2866_v34  ;;  %v2754_v34 = vpop.xlane.xlu1 %2753 }
 0x54f   : > { %v2413_v46 = vpop.f32.mrb[27].mxu1  ;;  %2905 = vst [vmem:[%s4779_s29 + $0x10] sm:$0xff] %v2889_v13  ;;  %v2835_v35 = vpop.trf.xlu0 }
 0x550   : > { %v2867_v37 = vmul.f32 %v2851_v5, %v2835_v35  ;;  %v2859_v46 = vsub.f32 %v2754_v34, %v5318_v59 }
 0x552   : > { %v3571_v15 = vpop.f32.mrb[28].mxu1  ;;  %v2890_v9 = vsel %vm5462_vm5, 0.0, %v2867_v37 }
 0x553   : > { %v2423_v17 = vpop.f32.mrb[29].mxu1  ;;  %2906 = vst [vmem:[%s4779_s29 + $0x18] sm:$0xff] %v2890_v9  ;;  %v2836_v10 = vpop.trf.xlu0 }
 0x554   : > { %v2868_v50 = vmul.f32 %v2852_v43, %v2836_v10  ;;  %v2758_v9 = vpop.xlane.xlu1 %2757 }
 0x555   : > { %v2861_v10 = vsub.f32 %v2758_v9, %v5341_v44 }
 0x556   : > { %v3574_v26 = vpop.f32.mrb[30].mxu1  ;;  %v2891_v62 = vsel %vm5462_vm5, 0.0, %v2868_v50 }
 0x557   : > { %v2433_v41 = vpop.f32.mrb[31].mxu1  ;;  %2907 = vst [vmem:[%s4779_s29 + $0x20] sm:$0xff] %v2891_v62  ;;  %v2837_v2 = vpop.trf.xlu0 }
 0x558   : > { %v2869_v0 = vmul.f32 %v2853_v49, %v2837_v2  ;;  %v2762_v23 = vpop.xlane.xlu1 %2761 }
 0x559   : > { %v2863_v44 = vsub.f32 %v2762_v23, %v5361_v19 }
 0x55a   : > { %v3609_v18 = vpop.f32.mrb[48].mxu0  ;;  %v2892_v61 = vsel %vm5462_vm5, 0.0, %v2869_v0 }
 0x55b   : > { %v3630_v45 = vpop.f32.mrb[32].mxu1  ;;  %v2556_v21 = vpop.f32.mrb[49].mxu0  ;;  %2908 = vst [vmem:[%s4779_s29 + $0x28] sm:$0xff] %v2892_v61 }
 0x55c   : > { %v2626_v4 = vpop.f32.mrb[33].mxu1  ;;  %v2838_v14 = vpop.trf.xlu0 }
 0x55d   : > { %v2870_v33 = vmul.f32 %v2854_v63, %v2838_v14 }
 0x55e   : > { %v3612_v24 = vpop.f32.mrb[50].mxu0 }
 0x55f   : > { %v2566_v1 = vpop.f32.mrb[51].mxu0  ;;  %v2893_v3 = vsel %vm5462_vm5, 0.0, %v2870_v33 }
 0x560   : > { %2909 = vst [vmem:[%s4779_s29 + $0x30] sm:$0xff] %v2893_v3  ;;  %v2839_v25 = vpop.trf.xlu0 }
 0x561   : > { %v2871_v52 = vmul.f32 %v2855_v6, %v2839_v25 }
 0x562   : > { %v3615_v40 = vpop.f32.mrb[52].mxu0 }
 0x563   : > { %v2576_v29 = vpop.f32.mrb[53].mxu0  ;;  %v2894_v60 = vsel %vm5462_vm5, 0.0, %v2871_v52 }
 0x564   : > { %2910 = vst [vmem:[%s4779_s29 + $0x38] sm:$0xff] %v2894_v60  ;;  %v2840_v57 = vpop.trf.xlu0 }
 0x565   : > { %v2872_v32 = vmul.f32 %v2856_v22, %v2840_v57 }
 0x566   : > { %v3618_v42 = vpop.f32.mrb[54].mxu0 }
 0x567   : > { %v2586_v27 = vpop.f32.mrb[55].mxu0  ;;  %v2895_v55 = vsel %vm5462_vm5, 0.0, %v2872_v32 }
 0x568   : > { %2911 = vst [vmem:[%s4779_s29 + $0x40] sm:$0xff] %v2895_v55  ;;  %v2841_v39 = vpop.trf.xlu0 }
 0x569   : > { %v2873_v16 = vmul.f32 %v2857_v12, %v2841_v39 }
 0x56a   : > { %v3621_v56 = vpop.f32.mrb[56].mxu0 }
 0x56b   : > { %v2596_v8 = vpop.f32.mrb[57].mxu0  ;;  %v2896_v11 = vsel %vm5462_vm5, 0.0, %v2873_v16 }
 0x56c   : > { %2912 = vst [vmem:[%s4779_s29 + $0x48] sm:$0xff] %v2896_v11  ;;  %v2842_v30 = vpop.trf.xlu0 }
 0x56d   : > { %v2874_v51 = vmul.f32 %v2858_v53, %v2842_v30 }
 0x56e   : > { %v3624_v5 = vpop.f32.mrb[58].mxu0 }
 0x56f   : > { %v2606_v13 = vpop.f32.mrb[59].mxu0  ;;  %v2897_v35 = vsel %vm5462_vm5, 0.0, %v2874_v51 }
 0x570   : > { %2913 = vst [vmem:[%s4779_s29 + $0x50] sm:$0xff] %v2897_v35  ;;  %v2843_v37 = vpop.trf.xlu0 }
 0x571   : > { %v2875_v15 = vmul.f32 %v2859_v46, %v2843_v37 }
 0x572   : > { %v3627_v36 = vpop.f32.mrb[60].mxu0 }
 0x573   : > { %v2616_v48 = vpop.f32.mrb[61].mxu0  ;;  %v2898_v43 = vsel %vm5462_vm5, 0.0, %v2875_v15 }
 0x574   : > { %2914 = vst [vmem:[%s4779_s29 + $0x58] sm:$0xff] %v2898_v43  ;;  %v2844_v59 = vpop.trf.xlu0 }
 0x575   : > { %v2876_v17 = vmul.f32 %v2860_v31, %v2844_v59 }
 0x577   : > { %v2899_v50 = vsel %vm5462_vm5, 0.0, %v2876_v17 }
 0x578   : > { %2915 = vst [vmem:[%s4779_s29 + $0x60] sm:$0xff] %v2899_v50  ;;  %v2845_v26 = vpop.trf.xlu0 }
 0x579   : > { %v2877_v49 = vmul.f32 %v2861_v10, %v2845_v26 }
 0x57b   : > { %v2900_v58 = vsel %vm5462_vm5, 0.0, %v2877_v49 }
 0x57c   : > { %2916 = vst [vmem:[%s4779_s29 + $0x68] sm:$0xff] %v2900_v58  ;;  %v2846_v62 = vpop.trf.xlu0 }
 0x57d   : > { %v2878_v41 = vmul.f32 %v2862_v54, %v2846_v62 }
 0x57f   : > { %v2901_v2 = vsel %vm5462_vm5, 0.0, %v2878_v41 }
 0x580   : > { %2917 = vst [vmem:[%s4779_s29 + $0x70] sm:$0xff] %v2901_v2  ;;  %v2847_v0 = vpop.trf.xlu0 }
 0x581   : > { %v2879_v18 = vmul.f32 %v2863_v44, %v2847_v0 }
 0x583   : > { %v2902_v20 = vsel %vm5462_vm5, 0.0, %v2879_v18 }
 0x584   : > { %2918 = vst [vmem:[%s4779_s29 + $0x78] sm:$0xff] %v2902_v20 }
 0x585   : > { %3933 = shalt.err (!%p3930_p10)
}
 0x586   : > { %s3934_s29 = scalar_lea.hbm %s5537_s11, 2048  ;;  %s3938_s0 = scalar_lea.hbm %s5594_s9, 4096 }
 0x587   : > { %p3935_p11 = scmp.ne.s32.totalorder %s5537_s11, %s3934_s29  ;;  %p3939_p0 = scmp.lt.u32.totalorder %s5537_s11, %s5594_s9 }
 0x588   : > { %p3940_p1 = scmp.lt.u32.totalorder %s3938_s0, %s3934_s29  ;;  %p3942_p3 = scmp.lt.u32.totalorder %s3934_s29, %s5537_s11 }
 0x589   : > { %p3936_p12 = pnand %p3935_p11, %p4099_p5 }
 0x58a   : > { %p3941_p2 = por %p3940_p1, %p3939_p0 }
 0x58b   : > { %p3937_p13 = pneg %p3936_p12 }
 0x58c   : > { %p3943_p4 = por %p3942_p3, %p3941_p2 }
 0x58e   : > { %p3944_p7 = pnand %p3943_p4, %p3937_p13 }
 0x590   : > { %3947 = shalt.err (!%p3944_p7)
}
 0x591   : > { %s4001_s30 = smov 128   ;;  %s4002_s22 = smov 8  }
 0x592   : > { %3831 = dma.vmem_to_hbm [thread:$0]  (%p4099_p5), %s5539_s26, 2048, %s5537_s11, %s2921_s8, %s4001_s30, %s4001_s30, %s4002_s22  }
 0x593 PF: > { %p3842_p8 = scmp.ge.s32.totalorder %s3990_s18, 2  ;;  %s2966_s27 = sand.u32 1, %s3978_s15  }
 0x594   : > { %s2967_s14 = scalar_lea.sflag [#allocation8], %s2966_s27 }
 0x595   : > { %p3836_p9 = pnand %p3842_p8, %p4103_p6 }
 0x597   : > { %3969 = dma.done.wait (!%p3836_p9), %s2967_s14, 2048  }
 0x598   : > { %3971 = vsyncadd (!%p3836_p9), %s2967_s14, 4294965248  ;;  %s2976_s29 = scalar_lea.sflag [#allocation10], %s2966_s27 }
 0x599   : > { %3973 = dma.done.wait (!%p3836_p9), %s2976_s29, 16  }
 0x59a   : > { %3975 = vsyncadd (!%p3836_p9), %s2976_s29, 4294967280  ;;  %p26_p5 = scmp.ge.s32.totalorder %s4086_s20, 4   ;;  %s5683_s15 = smov %s3982_s16 }
 0x59b   : > { %s5684_s16 = smov %s3986_s17  ;;  %s5685_s17 = smov %s4097_s23 }
 0x59c   : > { %s5686_s18 = smov %s4086_s20  ;;  %28 = sbr.rel (!%p26_p5) target bundleno = 8 (0x8), region = 134 }
 0x5a3   :  { %2980 = vsyncpa [#allocation8], 1 }
 0x5a4   :  { %2982 = vsyncpa [#allocation8 + $0x1], 1 }
 0x5a5   :  { %2983 = vsyncpa [#allocation10], 1 }
 0x5a6   :  { %2985 = vsyncpa [#allocation10 + $0x1], 1 }

</bundles_post_ra>
